<compile_context>
chip_gen: v5e
topology: v5e:2x2
jax: 0.10.0
libtpu: 0.0.40
codegen_flags: <defaults>
</compile_context>

<pallas_src>
import functools
import numpy as np
import jax
import jax.numpy as jnp
from jax.experimental import pallas as pl
from jax.experimental.pallas import tpu as pltpu

K = 7            # largest depthwise kernel
PAD = K // 2     # 'same' padding for the folded 7x7 filter


def _ppeg_conv_kernel(x_ref, w_ref, b_ref, o_ref, pad_ref, shf_ref,
                      *, H, W, N, M, C, BT, HC, HOUT):
    """One grid step: BT samples x one 128-channel slice of the folded conv.

    x_ref:   (BT, N, C)             raw token stream (no wrap/zero padding)
    w_ref:   (K*K, C)               folded depthwise weights, taps flattened
    b_ref:   (1, C)                 folded bias
    o_ref:   (BT, N, C)             output token stream (padding never written)
    pad_ref: (H+6, W+6, C)          VMEM: zero-halo padded grid of one sample
    shf_ref: (2, K, HC+6, W, C)     VMEM: double-buffered dx-shifted chunk copies
    """
    Hp, Wp = H + 2 * PAD, W + 2 * PAD
    f32 = jnp.float32

    # ---- per-grid-step constant region of pad_ref --------------------------
    # Halo (top/bottom rows, left/right columns) and grid tokens >= M (wrap /
    # 7x7 zero padding) are identical for every sample in this step, so they
    # are written once; the live interior is rewritten per sample below.
    pad_ref[0:PAD, :, :] = jnp.zeros((PAD, Wp, C), f32)
    pad_ref[PAD + H:Hp, :, :] = jnp.zeros((PAD, Wp, C), f32)
    pad_ref[PAD:PAD + H, 0:PAD, :] = jnp.zeros((H, PAD, C), f32)
    pad_ref[PAD:PAD + H, PAD + W:Wp, :] = jnp.zeros((H, PAD, C), f32)
    for h in range(H):                       # tokens >= M are always zero
        t0 = h * W
        if t0 + W <= M:
            continue
        z0 = max(t0, M) - t0
        pad_ref[PAD + h, PAD + z0:PAD + W, :] = jnp.zeros((W - z0, C), f32)

    # ---- hoisted weights / bias (loaded & sliced once per grid step) -------
    w_all = w_ref[...]                                        # (49, C)
    w_t = [w_all[t].reshape(1, 1, C) for t in range(K * K)]   # per-tap (1,1,C)
    b_t = b_ref[...].reshape(1, 1, C)

    # ---- stage A1: build padded sample i (tokens < M; rest stays zero) -----
    def build_pad(i):
        for h in range(H):
            t0 = h * W
            t, end = t0, min(t0 + W, M)
            while t < end:
                if t < N:                         # real tokens
                    s = min(end, N)
                    src = x_ref[i, t:s, :]
                else:                             # wrapped tokens x[:, :wrap]
                    s = end
                    src = x_ref[i, t - N:s - N, :]
                pad_ref[PAD + h, PAD + (t - t0):PAD + (s - t0), :] = \
                    src.astype(f32)
                t = s

    # ---- stage A2: the K dx-shifted copies of one row chunk ----------------
    # 7 sublane-offset reads per chunk; every read in the tap loop is aligned.
    def build_shf(slot, h0, hs):
        rows = hs + 2 * PAD
        for dx in range(K):
            shf_ref[slot, dx, 0:rows, :, :] = pad_ref[h0:h0 + rows, dx:dx + W, :]

    # ---- stage B: 49-tap depthwise MAC + bias, store real tokens only ------
    def mac(slot, i, h0, hs):
        acc = shf_ref[slot, 0, 0:hs, :, :] * w_t[0]
        for dy in range(K):
            for dx in range(K):
                if dy == 0 and dx == 0:
                    continue
                acc = acc + shf_ref[slot, dx, dy:dy + hs, :, :] * w_t[dy * K + dx]
        acc = (acc + b_t).astype(o_ref.dtype)
        for l in range(hs):                       # row-wise flat-token store
            t0 = (h0 + l) * W
            w_len = min(W, N - t0)
            if w_len <= 0:
                continue
            o_ref[i, t0:t0 + w_len, :] = acc[l, 0:w_len, :]

    # ---- 2-stage software pipeline over (sample, row-chunk) items ----------
    chunks = []
    h0 = 0
    while h0 < HOUT:
        chunks.append((h0, min(HC, HOUT - h0)))
        h0 += HC
    items = [(i, c0, cs) for i in range(BT) for (c0, cs) in chunks]

    build_pad(0)
    build_shf(0, items[0][1], items[0][2])
    for t, (i, c0, cs) in enumerate(items):
        slot = t & 1
        if t + 1 < len(items):
            i_n, c0_n, cs_n = items[t + 1]
            if i_n != i:                # next item starts a new sample
                build_pad(i_n)
            build_shf(1 - slot, c0_n, cs_n)   # overlaps with mac() below
        mac(slot, i, c0, cs)


def _default_target_block_bytes():
    # v5e/v6e have 128 MiB physical VMEM -> bigger blocks; v7x only 64 MiB.
    try:
        info = pltpu.get_tpu_info()
        vmem = getattr(info, "vmem_capacity_bytes", None)
        if vmem is not None and vmem >= (100 << 20):
            return 4 << 20
    except Exception:
        pass
    return 2 << 20


def _ppeg_pallas(x, w_eff, b_eff, *, H, W, N, M,
                 target_block_bytes=None, max_unroll_items=16):
    """x: (B, N, Cp) raw tokens, Cp a multiple of 128 (or == Cp if small)."""
    B, _, C = x.shape
    if target_block_bytes is None:
        target_block_bytes = _default_target_block_bytes()

    ct = 128 if C % 128 == 0 else C          # lane-dense channel tile
    H_out = -(-N // W)                       # rows that contain real tokens
    # Rows per accumulator chunk: keep the f32 acc around ~16 vregs.
    hc = max(1, min(H_out, 16384 // max(1, W * ct)))
    n_chunks = -(-H_out // hc)

    # Batch tile: a few MiB per grid step, capped for unrolled code size, and
    # keeping the batch grid axis >= 2 and even so a v7x megacore balances.
    per_sample = N * ct * x.dtype.itemsize
    bt = max(1, min(B, target_block_bytes // max(1, per_sample)))
    bt = min(bt, max(1, max_unroll_items // n_chunks))
    if B >= 2:
        bt = min(bt, B // 2)
    while bt > 1 and (B % bt != 0 or (B // bt) % 2 != 0):
        bt -= 1
    while B % bt:
        bt -= 1

    Hp, Wp = H + 2 * PAD, W + 2 * PAD
    # Explicit scoped-VMEM budget: double-buffered in/out blocks + weights +
    # pad scratch + double-buffered per-chunk shift scratch, with headroom.
    est = (2 * bt * N * ct * (2 * x.dtype.itemsize)
           + 2 * (K * K + 1) * ct * 4
           + Hp * Wp * ct * 4
           + 2 * K * (hc + 2 * PAD) * W * ct * 4)
    vmem_limit = int(min(64 << 20, max(32 << 20, int(est * 1.25) + (1 << 20))))

    kernel = functools.partial(_ppeg_conv_kernel, H=H, W=W, N=N, M=M,
                               C=ct, BT=bt, HC=hc, HOUT=H_out)
    return pl.pallas_call(
        kernel,
        out_shape=jax.ShapeDtypeStruct((B, N, C), x.dtype),
        grid=(B // bt, C // ct),
        in_specs=[
            pl.BlockSpec((bt, N, ct), lambda g, cg: (g, 0, cg)),
            pl.BlockSpec((K * K, ct), lambda g, cg: (0, cg)),
            pl.BlockSpec((1, ct), lambda g, cg: (0, cg)),
        ],
        out_specs=pl.BlockSpec((bt, N, ct), lambda g, cg: (g, 0, cg)),
        scratch_shapes=[
            pltpu.VMEM((Hp, Wp, ct), jnp.float32),
            pltpu.VMEM((2, K, hc + 2 * PAD, W, ct), jnp.float32),
        ],
        compiler_params=pltpu.CompilerParams(
            dimension_semantics=("parallel", "parallel"),
            vmem_limit_bytes=vmem_limit),
    )(x, w_eff, b_eff)


def ppeg_forward(x, params):
    """x: (B, N, C) float32. params: (w7, b7, w5, b5, w3, b3) with
    w_k: (C, k, k), b_k: (C,) — PyTorch depthwise Conv2d weights squeezed."""
    B, N, C = x.shape
    H0 = int(np.ceil(np.sqrt(N)))
    wrap = H0 * H0 - N                  # wrapped tokens x[:, :wrap]
    H = W = max(H0, 7)
    M = N + wrap                        # grid tokens >= M are zero

    # Fold proj(7x7) + proj1(5x5) + proj2(3x3) + identity into one 7x7 filter.
    w7, b7, w5, b5, w3, b3 = params
    w = (w7
         + jnp.pad(w5, ((0, 0), (1, 1), (1, 1)))
         + jnp.pad(w3, ((0, 0), (2, 2), (2, 2))))
    w = w.at[:, PAD, PAD].add(1.0)              # identity (cnn_feat) skip
    b = b7 + b5 + b3
    w_eff = jnp.transpose(w, (1, 2, 0)).reshape(K * K, C)
    b_eff = b.reshape(1, C)

    # Pad channels up to a multiple of 128 (lane-dense loads & stores).
    Cp = ((C + 127) // 128) * 128
    if Cp != C:
        x = jnp.pad(x, ((0, 0), (0, 0), (0, Cp - C)))
        w_eff = jnp.pad(w_eff, ((0, 0), (0, Cp - C)))
        b_eff = jnp.pad(b_eff, ((0, 0), (0, Cp - C)))

    out = _ppeg_pallas(x, w_eff, b_eff, H=H, W=W, N=N, M=M)
    if Cp != C:
        out = out[:, :, :C]
    return out


def _ref_forward(x, params):
    """Pure-JAX reference (lax.conv) mirroring the PyTorch module."""
    B, N, C = x.shape
    H = W = int(np.ceil(np.sqrt(N)))
    add_length = H * W - N
    x = jnp.concatenate([x, x[:, :add_length, :]], axis=1)
    if H < 7:
        H = W = 7
        zero_pad = H * W - x.shape[1]
        x = jnp.concatenate([x, jnp.zeros((B, zero_pad, C), x.dtype)], axis=1)
        add_length += zero_pad
    feat = x.reshape(B, H, W, C)

    def dwconv(f, w, b):
        k = w.shape[-1]
        rhs = jnp.transpose(w, (1, 2, 0)).reshape(k, k, 1, C)   # HWIO, I=1
        y = jax.lax.conv_general_dilated(
            f, rhs, window_strides=(1, 1), padding="SAME",
            dimension_numbers=("NHWC", "HWIO", "NHWC"),
            feature_group_count=C)
        return y + b

    w7, b7, w5, b5, w3, b3 = params
    y = dwconv(feat, w7, b7) + feat + dwconv(feat, w5, b5) + dwconv(feat, w3, b3)
    y = y.reshape(B, H * W, C)
    if add_length > 0:
        y = y[:, :-add_length]
    return y


def _make_params(key, C):
    ks = jax.random.split(key, 6)
    w7 = 0.05 * jax.random.normal(ks[0], (C, 7, 7), jnp.float32)
    b7 = 0.05 * jax.random.normal(ks[1], (C,), jnp.float32)
    w5 = 0.05 * jax.random.normal(ks[2], (C, 5, 5), jnp.float32)
    b5 = 0.05 * jax.random.normal(ks[3], (C,), jnp.float32)
    w3 = 0.05 * jax.random.normal(ks[4], (C, 3, 3), jnp.float32)
    b3 = 0.05 * jax.random.normal(ks[5], (C,), jnp.float32)
    return (w7, b7, w5, b5, w3, b3)


if __name__ == "__main__":
    key = jax.random.PRNGKey(0)
    fwd = jax.jit(ppeg_forward)

    # Case 1: B=2, N=60, C=128 -> H=W=8 grid, 4 wrapped tokens, no zero-pad.
    k1, k2, k3, k4 = jax.random.split(key, 4)
    B1, N1, C1 = 2, 60, 128
    x1 = jax.random.normal(k1, (B1, N1, C1), jnp.float32)
    p1 = _make_params(k2, C1)
    out1 = jax.block_until_ready(fwd(x1, p1))
    assert out1.shape == (B1, N1, C1), out1.shape
    ref1 = jax.block_until_ready(_ref_forward(x1, p1))
    np.testing.assert_allclose(np.asarray(out1), np.asarray(ref1),
                               rtol=1e-4, atol=1e-4)

    # Case 2: B=3, N=20, C=192 -> bumped to 7x7 grid with zero padding,
    # non-128-multiple channels (padded to 256 inside the wrapper).
    B2, N2, C2 = 3, 20, 192
    x2 = jax.random.normal(k3, (B2, N2, C2), jnp.float32)
    p2 = _make_params(k4, C2)
    out2 = jax.block_until_ready(fwd(x2, p2))
    assert out2.shape == (B2, N2, C2), out2.shape
    ref2 = jax.block_until_ready(_ref_forward(x2, p2))
    np.testing.assert_allclose(np.asarray(out2), np.asarray(ref2),
                               rtol=1e-4, atol=1e-4)

    print("KERNEL_OK")
</pallas_src>

<mosaic_0001>
module attributes {stable_mosaic.version = 11 : i64} {
  func.func @_ppeg_conv_kernel(%arg0: i32, %arg1: i32, %arg2: memref<1x60x128xf32, #tpu.memory_space<vmem>>, %arg3: memref<49x128xf32, #tpu.memory_space<vmem>>, %arg4: memref<1x128xf32, #tpu.memory_space<vmem>>, %arg5: memref<1x60x128xf32, #tpu.memory_space<vmem>>, %arg6: memref<14x14x128xf32, #tpu.memory_space<vmem>>, %arg7: memref<2x7x14x8x128xf32, #tpu.memory_space<vmem>>) attributes {dimension_semantics = [#tpu.dimension_semantics<parallel>, #tpu.dimension_semantics<parallel>], iteration_bounds = array<i64: 2, 1>, scalar_prefetch = 0 : i64, scratch_operands = 2 : i64, tpu.core_type = #tpu.core_type<tc>, window_params = [{transform_indices = @transform_0, window_bounds = array<i64: 1, 60, 128>}, {transform_indices = @transform_1, window_bounds = array<i64: 49, 128>}, {transform_indices = @transform_2, window_bounds = array<i64: 1, 128>}, {transform_indices = @transform_3, window_bounds = array<i64: 1, 60, 128>}]} {
    %cst = arith.constant 0.000000e+00 : f32
    %0 = vector.broadcast %cst : f32 to vector<3x14x128xf32>
    %c0 = arith.constant 0 : index
    %c0_0 = arith.constant 0 : index
    %c0_1 = arith.constant 0 : index
    %1 = vector.load %arg6[%c0, %c0_0, %c0_1] : memref<14x14x128xf32, #tpu.memory_space<vmem>>, vector<3x14x128xf32>
    tpu.vector_store %arg6[%c0, %c0_0, %c0_1], %0 {strides = array<i32>} : memref<14x14x128xf32, #tpu.memory_space<vmem>>, vector<3x14x128xf32>,
    %cst_2 = arith.constant 0.000000e+00 : f32
    %2 = vector.broadcast %cst_2 : f32 to vector<3x14x128xf32>
    %c11 = arith.constant 11 : index
    %c0_3 = arith.constant 0 : index
    %c0_4 = arith.constant 0 : index
    %3 = vector.load %arg6[%c11, %c0_3, %c0_4] : memref<14x14x128xf32, #tpu.memory_space<vmem>>, vector<3x14x128xf32>
    tpu.vector_store %arg6[%c11, %c0_3, %c0_4], %2 {strides = array<i32>} : memref<14x14x128xf32, #tpu.memory_space<vmem>>, vector<3x14x128xf32>,
    %cst_5 = arith.constant 0.000000e+00 : f32
    %4 = vector.broadcast %cst_5 : f32 to vector<8x3x128xf32>
    %c3 = arith.constant 3 : index
    %c0_6 = arith.constant 0 : index
    %c0_7 = arith.constant 0 : index
    %5 = vector.load %arg6[%c3, %c0_6, %c0_7] : memref<14x14x128xf32, #tpu.memory_space<vmem>>, vector<8x3x128xf32>
    tpu.vector_store %arg6[%c3, %c0_6, %c0_7], %4 {strides = array<i32>} : memref<14x14x128xf32, #tpu.memory_space<vmem>>, vector<8x3x128xf32>,
    %cst_8 = arith.constant 0.000000e+00 : f32
    %6 = vector.broadcast %cst_8 : f32 to vector<8x3x128xf32>
    %c3_9 = arith.constant 3 : index
    %c11_10 = arith.constant 11 : index
    %c0_11 = arith.constant 0 : index
    %7 = vector.load %arg6[%c3_9, %c11_10, %c0_11] : memref<14x14x128xf32, #tpu.memory_space<vmem>>, vector<8x3x128xf32>
    tpu.vector_store %arg6[%c3_9, %c11_10, %c0_11], %6 {strides = array<i32>} : memref<14x14x128xf32, #tpu.memory_space<vmem>>, vector<8x3x128xf32>,
    %c0_12 = arith.constant 0 : index
    %c0_13 = arith.constant 0 : index
    %8 = vector.load %arg3[%c0_12, %c0_13] : memref<49x128xf32, #tpu.memory_space<vmem>>, vector<49x128xf32>
    %9 = vector.extract_strided_slice %8 {offsets = [0, 0], sizes = [1, 128], strides = [1, 1]} : vector<49x128xf32> to vector<1x128xf32>
    %10 = vector.shape_cast %9 : vector<1x128xf32> to vector<128xf32>
    %11 = vector.shape_cast %10 : vector<128xf32> to vector<1x1x128xf32>
    %12 = vector.extract_strided_slice %8 {offsets = [1, 0], sizes = [1, 128], strides = [1, 1]} : vector<49x128xf32> to vector<1x128xf32>
    %13 = vector.shape_cast %12 : vector<1x128xf32> to vector<128xf32>
    %14 = vector.shape_cast %13 : vector<128xf32> to vector<1x1x128xf32>
    %15 = vector.extract_strided_slice %8 {offsets = [2, 0], sizes = [1, 128], strides = [1, 1]} : vector<49x128xf32> to vector<1x128xf32>
    %16 = vector.shape_cast %15 : vector<1x128xf32> to vector<128xf32>
    %17 = vector.shape_cast %16 : vector<128xf32> to vector<1x1x128xf32>
    %18 = vector.extract_strided_slice %8 {offsets = [3, 0], sizes = [1, 128], strides = [1, 1]} : vector<49x128xf32> to vector<1x128xf32>
    %19 = vector.shape_cast %18 : vector<1x128xf32> to vector<128xf32>
    %20 = vector.shape_cast %19 : vector<128xf32> to vector<1x1x128xf32>
    %21 = vector.extract_strided_slice %8 {offsets = [4, 0], sizes = [1, 128], strides = [1, 1]} : vector<49x128xf32> to vector<1x128xf32>
    %22 = vector.shape_cast %21 : vector<1x128xf32> to vector<128xf32>
    %23 = vector.shape_cast %22 : vector<128xf32> to vector<1x1x128xf32>
    %24 = vector.extract_strided_slice %8 {offsets = [5, 0], sizes = [1, 128], strides = [1, 1]} : vector<49x128xf32> to vector<1x128xf32>
    %25 = vector.shape_cast %24 : vector<1x128xf32> to vector<128xf32>
    %26 = vector.shape_cast %25 : vector<128xf32> to vector<1x1x128xf32>
    %27 = vector.extract_strided_slice %8 {offsets = [6, 0], sizes = [1, 128], strides = [1, 1]} : vector<49x128xf32> to vector<1x128xf32>
    %28 = vector.shape_cast %27 : vector<1x128xf32> to vector<128xf32>
    %29 = vector.shape_cast %28 : vector<128xf32> to vector<1x1x128xf32>
    %30 = vector.extract_strided_slice %8 {offsets = [7, 0], sizes = [1, 128], strides = [1, 1]} : vector<49x128xf32> to vector<1x128xf32>
    %31 = vector.shape_cast %30 : vector<1x128xf32> to vector<128xf32>
    %32 = vector.shape_cast %31 : vector<128xf32> to vector<1x1x128xf32>
    %33 = vector.extract_strided_slice %8 {offsets = [8, 0], sizes = [1, 128], strides = [1, 1]} : vector<49x128xf32> to vector<1x128xf32>
    %34 = vector.shape_cast %33 : vector<1x128xf32> to vector<128xf32>
    %35 = vector.shape_cast %34 : vector<128xf32> to vector<1x1x128xf32>
    %36 = vector.extract_strided_slice %8 {offsets = [9, 0], sizes = [1, 128], strides = [1, 1]} : vector<49x128xf32> to vector<1x128xf32>
    %37 = vector.shape_cast %36 : vector<1x128xf32> to vector<128xf32>
    %38 = vector.shape_cast %37 : vector<128xf32> to vector<1x1x128xf32>
    %39 = vector.extract_strided_slice %8 {offsets = [10, 0], sizes = [1, 128], strides = [1, 1]} : vector<49x128xf32> to vector<1x128xf32>
    %40 = vector.shape_cast %39 : vector<1x128xf32> to vector<128xf32>
    %41 = vector.shape_cast %40 : vector<128xf32> to vector<1x1x128xf32>
    %42 = vector.extract_strided_slice %8 {offsets = [11, 0], sizes = [1, 128], strides = [1, 1]} : vector<49x128xf32> to vector<1x128xf32>
    %43 = vector.shape_cast %42 : vector<1x128xf32> to vector<128xf32>
    %44 = vector.shape_cast %43 : vector<128xf32> to vector<1x1x128xf32>
    %45 = vector.extract_strided_slice %8 {offsets = [12, 0], sizes = [1, 128], strides = [1, 1]} : vector<49x128xf32> to vector<1x128xf32>
    %46 = vector.shape_cast %45 : vector<1x128xf32> to vector<128xf32>
    %47 = vector.shape_cast %46 : vector<128xf32> to vector<1x1x128xf32>
    %48 = vector.extract_strided_slice %8 {offsets = [13, 0], sizes = [1, 128], strides = [1, 1]} : vector<49x128xf32> to vector<1x128xf32>
    %49 = vector.shape_cast %48 : vector<1x128xf32> to vector<128xf32>
    %50 = vector.shape_cast %49 : vector<128xf32> to vector<1x1x128xf32>
    %51 = vector.extract_strided_slice %8 {offsets = [14, 0], sizes = [1, 128], strides = [1, 1]} : vector<49x128xf32> to vector<1x128xf32>
    %52 = vector.shape_cast %51 : vector<1x128xf32> to vector<128xf32>
    %53 = vector.shape_cast %52 : vector<128xf32> to vector<1x1x128xf32>
    %54 = vector.extract_strided_slice %8 {offsets = [15, 0], sizes = [1, 128], strides = [1, 1]} : vector<49x128xf32> to vector<1x128xf32>
    %55 = vector.shape_cast %54 : vector<1x128xf32> to vector<128xf32>
    %56 = vector.shape_cast %55 : vector<128xf32> to vector<1x1x128xf32>
    %57 = vector.extract_strided_slice %8 {offsets = [16, 0], sizes = [1, 128], strides = [1, 1]} : vector<49x128xf32> to vector<1x128xf32>
    %58 = vector.shape_cast %57 : vector<1x128xf32> to vector<128xf32>
    %59 = vector.shape_cast %58 : vector<128xf32> to vector<1x1x128xf32>
    %60 = vector.extract_strided_slice %8 {offsets = [17, 0], sizes = [1, 128], strides = [1, 1]} : vector<49x128xf32> to vector<1x128xf32>
    %61 = vector.shape_cast %60 : vector<1x128xf32> to vector<128xf32>
    %62 = vector.shape_cast %61 : vector<128xf32> to vector<1x1x128xf32>
    %63 = vector.extract_strided_slice %8 {offsets = [18, 0], sizes = [1, 128], strides = [1, 1]} : vector<49x128xf32> to vector<1x128xf32>
    %64 = vector.shape_cast %63 : vector<1x128xf32> to vector<128xf32>
    %65 = vector.shape_cast %64 : vector<128xf32> to vector<1x1x128xf32>
    %66 = vector.extract_strided_slice %8 {offsets = [19, 0], sizes = [1, 128], strides = [1, 1]} : vector<49x128xf32> to vector<1x128xf32>
    %67 = vector.shape_cast %66 : vector<1x128xf32> to vector<128xf32>
    %68 = vector.shape_cast %67 : vector<128xf32> to vector<1x1x128xf32>
    %69 = vector.extract_strided_slice %8 {offsets = [20, 0], sizes = [1, 128], strides = [1, 1]} : vector<49x128xf32> to vector<1x128xf32>
    %70 = vector.shape_cast %69 : vector<1x128xf32> to vector<128xf32>
    %71 = vector.shape_cast %70 : vector<128xf32> to vector<1x1x128xf32>
    %72 = vector.extract_strided_slice %8 {offsets = [21, 0], sizes = [1, 128], strides = [1, 1]} : vector<49x128xf32> to vector<1x128xf32>
    %73 = vector.shape_cast %72 : vector<1x128xf32> to vector<128xf32>
    %74 = vector.shape_cast %73 : vector<128xf32> to vector<1x1x128xf32>
    %75 = vector.extract_strided_slice %8 {offsets = [22, 0], sizes = [1, 128], strides = [1, 1]} : vector<49x128xf32> to vector<1x128xf32>
    %76 = vector.shape_cast %75 : vector<1x128xf32> to vector<128xf32>
    %77 = vector.shape_cast %76 : vector<128xf32> to vector<1x1x128xf32>
    %78 = vector.extract_strided_slice %8 {offsets = [23, 0], sizes = [1, 128], strides = [1, 1]} : vector<49x128xf32> to vector<1x128xf32>
    %79 = vector.shape_cast %78 : vector<1x128xf32> to vector<128xf32>
    %80 = vector.shape_cast %79 : vector<128xf32> to vector<1x1x128xf32>
    %81 = vector.extract_strided_slice %8 {offsets = [24, 0], sizes = [1, 128], strides = [1, 1]} : vector<49x128xf32> to vector<1x128xf32>
    %82 = vector.shape_cast %81 : vector<1x128xf32> to vector<128xf32>
    %83 = vector.shape_cast %82 : vector<128xf32> to vector<1x1x128xf32>
    %84 = vector.extract_strided_slice %8 {offsets = [25, 0], sizes = [1, 128], strides = [1, 1]} : vector<49x128xf32> to vector<1x128xf32>
    %85 = vector.shape_cast %84 : vector<1x128xf32> to vector<128xf32>
    %86 = vector.shape_cast %85 : vector<128xf32> to vector<1x1x128xf32>
    %87 = vector.extract_strided_slice %8 {offsets = [26, 0], sizes = [1, 128], strides = [1, 1]} : vector<49x128xf32> to vector<1x128xf32>
    %88 = vector.shape_cast %87 : vector<1x128xf32> to vector<128xf32>
    %89 = vector.shape_cast %88 : vector<128xf32> to vector<1x1x128xf32>
    %90 = vector.extract_strided_slice %8 {offsets = [27, 0], sizes = [1, 128], strides = [1, 1]} : vector<49x128xf32> to vector<1x128xf32>
    %91 = vector.shape_cast %90 : vector<1x128xf32> to vector<128xf32>
    %92 = vector.shape_cast %91 : vector<128xf32> to vector<1x1x128xf32>
    %93 = vector.extract_strided_slice %8 {offsets = [28, 0], sizes = [1, 128], strides = [1, 1]} : vector<49x128xf32> to vector<1x128xf32>
    %94 = vector.shape_cast %93 : vector<1x128xf32> to vector<128xf32>
    %95 = vector.shape_cast %94 : vector<128xf32> to vector<1x1x128xf32>
    %96 = vector.extract_strided_slice %8 {offsets = [29, 0], sizes = [1, 128], strides = [1, 1]} : vector<49x128xf32> to vector<1x128xf32>
    %97 = vector.shape_cast %96 : vector<1x128xf32> to vector<128xf32>
    %98 = vector.shape_cast %97 : vector<128xf32> to vector<1x1x128xf32>
    %99 = vector.extract_strided_slice %8 {offsets = [30, 0], sizes = [1, 128], strides = [1, 1]} : vector<49x128xf32> to vector<1x128xf32>
    %100 = vector.shape_cast %99 : vector<1x128xf32> to vector<128xf32>
    %101 = vector.shape_cast %100 : vector<128xf32> to vector<1x1x128xf32>
    %102 = vector.extract_strided_slice %8 {offsets = [31, 0], sizes = [1, 128], strides = [1, 1]} : vector<49x128xf32> to vector<1x128xf32>
    %103 = vector.shape_cast %102 : vector<1x128xf32> to vector<128xf32>
    %104 = vector.shape_cast %103 : vector<128xf32> to vector<1x1x128xf32>
    %105 = vector.extract_strided_slice %8 {offsets = [32, 0], sizes = [1, 128], strides = [1, 1]} : vector<49x128xf32> to vector<1x128xf32>
    %106 = vector.shape_cast %105 : vector<1x128xf32> to vector<128xf32>
    %107 = vector.shape_cast %106 : vector<128xf32> to vector<1x1x128xf32>
    %108 = vector.extract_strided_slice %8 {offsets = [33, 0], sizes = [1, 128], strides = [1, 1]} : vector<49x128xf32> to vector<1x128xf32>
    %109 = vector.shape_cast %108 : vector<1x128xf32> to vector<128xf32>
    %110 = vector.shape_cast %109 : vector<128xf32> to vector<1x1x128xf32>
    %111 = vector.extract_strided_slice %8 {offsets = [34, 0], sizes = [1, 128], strides = [1, 1]} : vector<49x128xf32> to vector<1x128xf32>
    %112 = vector.shape_cast %111 : vector<1x128xf32> to vector<128xf32>
    %113 = vector.shape_cast %112 : vector<128xf32> to vector<1x1x128xf32>
    %114 = vector.extract_strided_slice %8 {offsets = [35, 0], sizes = [1, 128], strides = [1, 1]} : vector<49x128xf32> to vector<1x128xf32>
    %115 = vector.shape_cast %114 : vector<1x128xf32> to vector<128xf32>
    %116 = vector.shape_cast %115 : vector<128xf32> to vector<1x1x128xf32>
    %117 = vector.extract_strided_slice %8 {offsets = [36, 0], sizes = [1, 128], strides = [1, 1]} : vector<49x128xf32> to vector<1x128xf32>
    %118 = vector.shape_cast %117 : vector<1x128xf32> to vector<128xf32>
    %119 = vector.shape_cast %118 : vector<128xf32> to vector<1x1x128xf32>
    %120 = vector.extract_strided_slice %8 {offsets = [37, 0], sizes = [1, 128], strides = [1, 1]} : vector<49x128xf32> to vector<1x128xf32>
    %121 = vector.shape_cast %120 : vector<1x128xf32> to vector<128xf32>
    %122 = vector.shape_cast %121 : vector<128xf32> to vector<1x1x128xf32>
    %123 = vector.extract_strided_slice %8 {offsets = [38, 0], sizes = [1, 128], strides = [1, 1]} : vector<49x128xf32> to vector<1x128xf32>
    %124 = vector.shape_cast %123 : vector<1x128xf32> to vector<128xf32>
    %125 = vector.shape_cast %124 : vector<128xf32> to vector<1x1x128xf32>
    %126 = vector.extract_strided_slice %8 {offsets = [39, 0], sizes = [1, 128], strides = [1, 1]} : vector<49x128xf32> to vector<1x128xf32>
    %127 = vector.shape_cast %126 : vector<1x128xf32> to vector<128xf32>
    %128 = vector.shape_cast %127 : vector<128xf32> to vector<1x1x128xf32>
    %129 = vector.extract_strided_slice %8 {offsets = [40, 0], sizes = [1, 128], strides = [1, 1]} : vector<49x128xf32> to vector<1x128xf32>
    %130 = vector.shape_cast %129 : vector<1x128xf32> to vector<128xf32>
    %131 = vector.shape_cast %130 : vector<128xf32> to vector<1x1x128xf32>
    %132 = vector.extract_strided_slice %8 {offsets = [41, 0], sizes = [1, 128], strides = [1, 1]} : vector<49x128xf32> to vector<1x128xf32>
    %133 = vector.shape_cast %132 : vector<1x128xf32> to vector<128xf32>
    %134 = vector.shape_cast %133 : vector<128xf32> to vector<1x1x128xf32>
    %135 = vector.extract_strided_slice %8 {offsets = [42, 0], sizes = [1, 128], strides = [1, 1]} : vector<49x128xf32> to vector<1x128xf32>
    %136 = vector.shape_cast %135 : vector<1x128xf32> to vector<128xf32>
    %137 = vector.shape_cast %136 : vector<128xf32> to vector<1x1x128xf32>
    %138 = vector.extract_strided_slice %8 {offsets = [43, 0], sizes = [1, 128], strides = [1, 1]} : vector<49x128xf32> to vector<1x128xf32>
    %139 = vector.shape_cast %138 : vector<1x128xf32> to vector<128xf32>
    %140 = vector.shape_cast %139 : vector<128xf32> to vector<1x1x128xf32>
    %141 = vector.extract_strided_slice %8 {offsets = [44, 0], sizes = [1, 128], strides = [1, 1]} : vector<49x128xf32> to vector<1x128xf32>
    %142 = vector.shape_cast %141 : vector<1x128xf32> to vector<128xf32>
    %143 = vector.shape_cast %142 : vector<128xf32> to vector<1x1x128xf32>
    %144 = vector.extract_strided_slice %8 {offsets = [45, 0], sizes = [1, 128], strides = [1, 1]} : vector<49x128xf32> to vector<1x128xf32>
    %145 = vector.shape_cast %144 : vector<1x128xf32> to vector<128xf32>
    %146 = vector.shape_cast %145 : vector<128xf32> to vector<1x1x128xf32>
    %147 = vector.extract_strided_slice %8 {offsets = [46, 0], sizes = [1, 128], strides = [1, 1]} : vector<49x128xf32> to vector<1x128xf32>
    %148 = vector.shape_cast %147 : vector<1x128xf32> to vector<128xf32>
    %149 = vector.shape_cast %148 : vector<128xf32> to vector<1x1x128xf32>
    %150 = vector.extract_strided_slice %8 {offsets = [47, 0], sizes = [1, 128], strides = [1, 1]} : vector<49x128xf32> to vector<1x128xf32>
    %151 = vector.shape_cast %150 : vector<1x128xf32> to vector<128xf32>
    %152 = vector.shape_cast %151 : vector<128xf32> to vector<1x1x128xf32>
    %153 = vector.extract_strided_slice %8 {offsets = [48, 0], sizes = [1, 128], strides = [1, 1]} : vector<49x128xf32> to vector<1x128xf32>
    %154 = vector.shape_cast %153 : vector<1x128xf32> to vector<128xf32>
    %155 = vector.shape_cast %154 : vector<128xf32> to vector<1x1x128xf32>
    %c0_14 = arith.constant 0 : index
    %c0_15 = arith.constant 0 : index
    %156 = vector.load %arg4[%c0_14, %c0_15] : memref<1x128xf32, #tpu.memory_space<vmem>>, vector<1x128xf32>
    %157 = vector.shape_cast %156 : vector<1x128xf32> to vector<1x1x128xf32>
    %c0_16 = arith.constant 0 : index
    %c0_17 = arith.constant 0 : index
    %c0_18 = arith.constant 0 : index
    %158 = vector.load %arg2[%c0_16, %c0_17, %c0_18] : memref<1x60x128xf32, #tpu.memory_space<vmem>>, vector<1x8x128xf32>
    %159 = vector.shape_cast %158 : vector<1x8x128xf32> to vector<8x128xf32>
    %c3_19 = arith.constant 3 : index
    %c3_20 = arith.constant 3 : index
    %c0_21 = arith.constant 0 : index
    %160 = vector.load %arg6[%c3_19, %c3_20, %c0_21] : memref<14x14x128xf32, #tpu.memory_space<vmem>>, vector<1x8x128xf32>
    %161 = vector.shape_cast %160 : vector<1x8x128xf32> to vector<8x128xf32>
    %162 = vector.shape_cast %159 : vector<8x128xf32> to vector<1x8x128xf32>
    tpu.vector_store %arg6[%c3_19, %c3_20, %c0_21], %162 {strides = array<i32>} : memref<14x14x128xf32, #tpu.memory_space<vmem>>, vector<1x8x128xf32>,
    %c0_22 = arith.constant 0 : index
    %c8 = arith.constant 8 : index
    %c0_23 = arith.constant 0 : index
    %163 = vector.load %arg2[%c0_22, %c8, %c0_23] : memref<1x60x128xf32, #tpu.memory_space<vmem>>, vector<1x8x128xf32>
    %164 = vector.shape_cast %163 : vector<1x8x128xf32> to vector<8x128xf32>
    %c4 = arith.constant 4 : index
    %c3_24 = arith.constant 3 : index
    %c0_25 = arith.constant 0 : index
    %165 = vector.load %arg6[%c4, %c3_24, %c0_25] : memref<14x14x128xf32, #tpu.memory_space<vmem>>, vector<1x8x128xf32>
    %166 = vector.shape_cast %165 : vector<1x8x128xf32> to vector<8x128xf32>
    %167 = vector.shape_cast %164 : vector<8x128xf32> to vector<1x8x128xf32>
    tpu.vector_store %arg6[%c4, %c3_24, %c0_25], %167 {strides = array<i32>} : memref<14x14x128xf32, #tpu.memory_space<vmem>>, vector<1x8x128xf32>,
    %c0_26 = arith.constant 0 : index
    %c16 = arith.constant 16 : index
    %c0_27 = arith.constant 0 : index
    %168 = vector.load %arg2[%c0_26, %c16, %c0_27] : memref<1x60x128xf32, #tpu.memory_space<vmem>>, vector<1x8x128xf32>
    %169 = vector.shape_cast %168 : vector<1x8x128xf32> to vector<8x128xf32>
    %c5 = arith.constant 5 : index
    %c3_28 = arith.constant 3 : index
    %c0_29 = arith.constant 0 : index
    %170 = vector.load %arg6[%c5, %c3_28, %c0_29] : memref<14x14x128xf32, #tpu.memory_space<vmem>>, vector<1x8x128xf32>
    %171 = vector.shape_cast %170 : vector<1x8x128xf32> to vector<8x128xf32>
    %172 = vector.shape_cast %169 : vector<8x128xf32> to vector<1x8x128xf32>
    tpu.vector_store %arg6[%c5, %c3_28, %c0_29], %172 {strides = array<i32>} : memref<14x14x128xf32, #tpu.memory_space<vmem>>, vector<1x8x128xf32>,
    %c0_30 = arith.constant 0 : index
    %c24 = arith.constant 24 : index
    %c0_31 = arith.constant 0 : index
    %173 = vector.load %arg2[%c0_30, %c24, %c0_31] : memref<1x60x128xf32, #tpu.memory_space<vmem>>, vector<1x8x128xf32>
    %174 = vector.shape_cast %173 : vector<1x8x128xf32> to vector<8x128xf32>
    %c6 = arith.constant 6 : index
    %c3_32 = arith.constant 3 : index
    %c0_33 = arith.constant 0 : index
    %175 = vector.load %arg6[%c6, %c3_32, %c0_33] : memref<14x14x128xf32, #tpu.memory_space<vmem>>, vector<1x8x128xf32>
    %176 = vector.shape_cast %175 : vector<1x8x128xf32> to vector<8x128xf32>
    %177 = vector.shape_cast %174 : vector<8x128xf32> to vector<1x8x128xf32>
    tpu.vector_store %arg6[%c6, %c3_32, %c0_33], %177 {strides = array<i32>} : memref<14x14x128xf32, #tpu.memory_space<vmem>>, vector<1x8x128xf32>,
    %c0_34 = arith.constant 0 : index
    %c32 = arith.constant 32 : index
    %c0_35 = arith.constant 0 : index
    %178 = vector.load %arg2[%c0_34, %c32, %c0_35] : memref<1x60x128xf32, #tpu.memory_space<vmem>>, vector<1x8x128xf32>
    %179 = vector.shape_cast %178 : vector<1x8x128xf32> to vector<8x128xf32>
    %c7 = arith.constant 7 : index
    %c3_36 = arith.constant 3 : index
    %c0_37 = arith.constant 0 : index
    %180 = vector.load %arg6[%c7, %c3_36, %c0_37] : memref<14x14x128xf32, #tpu.memory_space<vmem>>, vector<1x8x128xf32>
    %181 = vector.shape_cast %180 : vector<1x8x128xf32> to vector<8x128xf32>
    %182 = vector.shape_cast %179 : vector<8x128xf32> to vector<1x8x128xf32>
    tpu.vector_store %arg6[%c7, %c3_36, %c0_37], %182 {strides = array<i32>} : memref<14x14x128xf32, #tpu.memory_space<vmem>>, vector<1x8x128xf32>,
    %c0_38 = arith.constant 0 : index
    %c40 = arith.constant 40 : index
    %c0_39 = arith.constant 0 : index
    %183 = vector.load %arg2[%c0_38, %c40, %c0_39] : memref<1x60x128xf32, #tpu.memory_space<vmem>>, vector<1x8x128xf32>
    %184 = vector.shape_cast %183 : vector<1x8x128xf32> to vector<8x128xf32>
    %c8_40 = arith.constant 8 : index
    %c3_41 = arith.constant 3 : index
    %c0_42 = arith.constant 0 : index
    %185 = vector.load %arg6[%c8_40, %c3_41, %c0_42] : memref<14x14x128xf32, #tpu.memory_space<vmem>>, vector<1x8x128xf32>
    %186 = vector.shape_cast %185 : vector<1x8x128xf32> to vector<8x128xf32>
    %187 = vector.shape_cast %184 : vector<8x128xf32> to vector<1x8x128xf32>
    tpu.vector_store %arg6[%c8_40, %c3_41, %c0_42], %187 {strides = array<i32>} : memref<14x14x128xf32, #tpu.memory_space<vmem>>, vector<1x8x128xf32>,
    %c0_43 = arith.constant 0 : index
    %c48 = arith.constant 48 : index
    %c0_44 = arith.constant 0 : index
    %188 = vector.load %arg2[%c0_43, %c48, %c0_44] : memref<1x60x128xf32, #tpu.memory_space<vmem>>, vector<1x8x128xf32>
    %189 = vector.shape_cast %188 : vector<1x8x128xf32> to vector<8x128xf32>
    %c9 = arith.constant 9 : index
    %c3_45 = arith.constant 3 : index
    %c0_46 = arith.constant 0 : index
    %190 = vector.load %arg6[%c9, %c3_45, %c0_46] : memref<14x14x128xf32, #tpu.memory_space<vmem>>, vector<1x8x128xf32>
    %191 = vector.shape_cast %190 : vector<1x8x128xf32> to vector<8x128xf32>
    %192 = vector.shape_cast %189 : vector<8x128xf32> to vector<1x8x128xf32>
    tpu.vector_store %arg6[%c9, %c3_45, %c0_46], %192 {strides = array<i32>} : memref<14x14x128xf32, #tpu.memory_space<vmem>>, vector<1x8x128xf32>,
    %c0_47 = arith.constant 0 : index
    %c56 = arith.constant 56 : index
    %c0_48 = arith.constant 0 : index
    %193 = vector.load %arg2[%c0_47, %c56, %c0_48] : memref<1x60x128xf32, #tpu.memory_space<vmem>>, vector<1x4x128xf32>
    %194 = vector.shape_cast %193 : vector<1x4x128xf32> to vector<4x128xf32>
    %c10 = arith.constant 10 : index
    %c3_49 = arith.constant 3 : index
    %c0_50 = arith.constant 0 : index
    %195 = vector.load %arg6[%c10, %c3_49, %c0_50] : memref<14x14x128xf32, #tpu.memory_space<vmem>>, vector<1x4x128xf32>
    %196 = vector.shape_cast %195 : vector<1x4x128xf32> to vector<4x128xf32>
    %197 = vector.shape_cast %194 : vector<4x128xf32> to vector<1x4x128xf32>
    tpu.vector_store %arg6[%c10, %c3_49, %c0_50], %197 {strides = array<i32>} : memref<14x14x128xf32, #tpu.memory_space<vmem>>, vector<1x4x128xf32>,
    %c0_51 = arith.constant 0 : index
    %c0_52 = arith.constant 0 : index
    %c0_53 = arith.constant 0 : index
    %198 = vector.load %arg2[%c0_51, %c0_52, %c0_53] : memref<1x60x128xf32, #tpu.memory_space<vmem>>, vector<1x4x128xf32>
    %199 = vector.shape_cast %198 : vector<1x4x128xf32> to vector<4x128xf32>
    %c10_54 = arith.constant 10 : index
    %c7_55 = arith.constant 7 : index
    %c0_56 = arith.constant 0 : index
    %200 = vector.load %arg6[%c10_54, %c7_55, %c0_56] : memref<14x14x128xf32, #tpu.memory_space<vmem>>, vector<1x4x128xf32>
    %201 = vector.shape_cast %200 : vector<1x4x128xf32> to vector<4x128xf32>
    %202 = vector.shape_cast %199 : vector<4x128xf32> to vector<1x4x128xf32>
    tpu.vector_store %arg6[%c10_54, %c7_55, %c0_56], %202 {strides = array<i32>} : memref<14x14x128xf32, #tpu.memory_space<vmem>>, vector<1x4x128xf32>,
    %c0_57 = arith.constant 0 : index
    %c0_58 = arith.constant 0 : index
    %c0_59 = arith.constant 0 : index
    %203 = vector.load %arg6[%c0_57, %c0_58, %c0_59] : memref<14x14x128xf32, #tpu.memory_space<vmem>>, vector<14x8x128xf32>
    %c0_60 = arith.constant 0 : index
    %c0_61 = arith.constant 0 : index
    %c0_62 = arith.constant 0 : index
    %c0_63 = arith.constant 0 : index
    %c0_64 = arith.constant 0 : index
    %204 = vector.load %arg7[%c0_60, %c0_61, %c0_62, %c0_63, %c0_64] : memref<2x7x14x8x128xf32, #tpu.memory_space<vmem>>, vector<1x1x14x8x128xf32>
    %205 = vector.shape_cast %204 : vector<1x1x14x8x128xf32> to vector<14x8x128xf32>
    %206 = vector.shape_cast %203 : vector<14x8x128xf32> to vector<1x1x14x8x128xf32>
    tpu.vector_store %arg7[%c0_60, %c0_61, %c0_62, %c0_63, %c0_64], %206 {strides = array<i32>} : memref<2x7x14x8x128xf32, #tpu.memory_space<vmem>>, vector<1x1x14x8x128xf32>,
    %c0_65 = arith.constant 0 : index
    %c1 = arith.constant 1 : index
    %c0_66 = arith.constant 0 : index
    %207 = vector.load %arg6[%c0_65, %c1, %c0_66] : memref<14x14x128xf32, #tpu.memory_space<vmem>>, vector<14x8x128xf32>
    %c0_67 = arith.constant 0 : index
    %c1_68 = arith.constant 1 : index
    %c0_69 = arith.constant 0 : index
    %c0_70 = arith.constant 0 : index
    %c0_71 = arith.constant 0 : index
    %208 = vector.load %arg7[%c0_67, %c1_68, %c0_69, %c0_70, %c0_71] : memref<2x7x14x8x128xf32, #tpu.memory_space<vmem>>, vector<1x1x14x8x128xf32>
    %209 = vector.shape_cast %208 : vector<1x1x14x8x128xf32> to vector<14x8x128xf32>
    %210 = vector.shape_cast %207 : vector<14x8x128xf32> to vector<1x1x14x8x128xf32>
    tpu.vector_store %arg7[%c0_67, %c1_68, %c0_69, %c0_70, %c0_71], %210 {strides = array<i32>} : memref<2x7x14x8x128xf32, #tpu.memory_space<vmem>>, vector<1x1x14x8x128xf32>,
    %c0_72 = arith.constant 0 : index
    %c2 = arith.constant 2 : index
    %c0_73 = arith.constant 0 : index
    %211 = vector.load %arg6[%c0_72, %c2, %c0_73] : memref<14x14x128xf32, #tpu.memory_space<vmem>>, vector<14x8x128xf32>
    %c0_74 = arith.constant 0 : index
    %c2_75 = arith.constant 2 : index
    %c0_76 = arith.constant 0 : index
    %c0_77 = arith.constant 0 : index
    %c0_78 = arith.constant 0 : index
    %212 = vector.load %arg7[%c0_74, %c2_75, %c0_76, %c0_77, %c0_78] : memref<2x7x14x8x128xf32, #tpu.memory_space<vmem>>, vector<1x1x14x8x128xf32>
    %213 = vector.shape_cast %212 : vector<1x1x14x8x128xf32> to vector<14x8x128xf32>
    %214 = vector.shape_cast %211 : vector<14x8x128xf32> to vector<1x1x14x8x128xf32>
    tpu.vector_store %arg7[%c0_74, %c2_75, %c0_76, %c0_77, %c0_78], %214 {strides = array<i32>} : memref<2x7x14x8x128xf32, #tpu.memory_space<vmem>>, vector<1x1x14x8x128xf32>,
    %c0_79 = arith.constant 0 : index
    %c3_80 = arith.constant 3 : index
    %c0_81 = arith.constant 0 : index
    %215 = vector.load %arg6[%c0_79, %c3_80, %c0_81] : memref<14x14x128xf32, #tpu.memory_space<vmem>>, vector<14x8x128xf32>
    %c0_82 = arith.constant 0 : index
    %c3_83 = arith.constant 3 : index
    %c0_84 = arith.constant 0 : index
    %c0_85 = arith.constant 0 : index
    %c0_86 = arith.constant 0 : index
    %216 = vector.load %arg7[%c0_82, %c3_83, %c0_84, %c0_85, %c0_86] : memref<2x7x14x8x128xf32, #tpu.memory_space<vmem>>, vector<1x1x14x8x128xf32>
    %217 = vector.shape_cast %216 : vector<1x1x14x8x128xf32> to vector<14x8x128xf32>
    %218 = vector.shape_cast %215 : vector<14x8x128xf32> to vector<1x1x14x8x128xf32>
    tpu.vector_store %arg7[%c0_82, %c3_83, %c0_84, %c0_85, %c0_86], %218 {strides = array<i32>} : memref<2x7x14x8x128xf32, #tpu.memory_space<vmem>>, vector<1x1x14x8x128xf32>,
    %c0_87 = arith.constant 0 : index
    %c4_88 = arith.constant 4 : index
    %c0_89 = arith.constant 0 : index
    %219 = vector.load %arg6[%c0_87, %c4_88, %c0_89] : memref<14x14x128xf32, #tpu.memory_space<vmem>>, vector<14x8x128xf32>
    %c0_90 = arith.constant 0 : index
    %c4_91 = arith.constant 4 : index
    %c0_92 = arith.constant 0 : index
    %c0_93 = arith.constant 0 : index
    %c0_94 = arith.constant 0 : index
    %220 = vector.load %arg7[%c0_90, %c4_91, %c0_92, %c0_93, %c0_94] : memref<2x7x14x8x128xf32, #tpu.memory_space<vmem>>, vector<1x1x14x8x128xf32>
    %221 = vector.shape_cast %220 : vector<1x1x14x8x128xf32> to vector<14x8x128xf32>
    %222 = vector.shape_cast %219 : vector<14x8x128xf32> to vector<1x1x14x8x128xf32>
    tpu.vector_store %arg7[%c0_90, %c4_91, %c0_92, %c0_93, %c0_94], %222 {strides = array<i32>} : memref<2x7x14x8x128xf32, #tpu.memory_space<vmem>>, vector<1x1x14x8x128xf32>,
    %c0_95 = arith.constant 0 : index
    %c5_96 = arith.constant 5 : index
    %c0_97 = arith.constant 0 : index
    %223 = vector.load %arg6[%c0_95, %c5_96, %c0_97] : memref<14x14x128xf32, #tpu.memory_space<vmem>>, vector<14x8x128xf32>
    %c0_98 = arith.constant 0 : index
    %c5_99 = arith.constant 5 : index
    %c0_100 = arith.constant 0 : index
    %c0_101 = arith.constant 0 : index
    %c0_102 = arith.constant 0 : index
    %224 = vector.load %arg7[%c0_98, %c5_99, %c0_100, %c0_101, %c0_102] : memref<2x7x14x8x128xf32, #tpu.memory_space<vmem>>, vector<1x1x14x8x128xf32>
    %225 = vector.shape_cast %224 : vector<1x1x14x8x128xf32> to vector<14x8x128xf32>
    %226 = vector.shape_cast %223 : vector<14x8x128xf32> to vector<1x1x14x8x128xf32>
    tpu.vector_store %arg7[%c0_98, %c5_99, %c0_100, %c0_101, %c0_102], %226 {strides = array<i32>} : memref<2x7x14x8x128xf32, #tpu.memory_space<vmem>>, vector<1x1x14x8x128xf32>,
    %c0_103 = arith.constant 0 : index
    %c6_104 = arith.constant 6 : index
    %c0_105 = arith.constant 0 : index
    %227 = vector.load %arg6[%c0_103, %c6_104, %c0_105] : memref<14x14x128xf32, #tpu.memory_space<vmem>>, vector<14x8x128xf32>
    %c0_106 = arith.constant 0 : index
    %c6_107 = arith.constant 6 : index
    %c0_108 = arith.constant 0 : index
    %c0_109 = arith.constant 0 : index
    %c0_110 = arith.constant 0 : index
    %228 = vector.load %arg7[%c0_106, %c6_107, %c0_108, %c0_109, %c0_110] : memref<2x7x14x8x128xf32, #tpu.memory_space<vmem>>, vector<1x1x14x8x128xf32>
    %229 = vector.shape_cast %228 : vector<1x1x14x8x128xf32> to vector<14x8x128xf32>
    %230 = vector.shape_cast %227 : vector<14x8x128xf32> to vector<1x1x14x8x128xf32>
    tpu.vector_store %arg7[%c0_106, %c6_107, %c0_108, %c0_109, %c0_110], %230 {strides = array<i32>} : memref<2x7x14x8x128xf32, #tpu.memory_space<vmem>>, vector<1x1x14x8x128xf32>,
    %c0_111 = arith.constant 0 : index
    %c0_112 = arith.constant 0 : index
    %c0_113 = arith.constant 0 : index
    %c0_114 = arith.constant 0 : index
    %c0_115 = arith.constant 0 : index
    %231 = vector.load %arg7[%c0_111, %c0_112, %c0_113, %c0_114, %c0_115] : memref<2x7x14x8x128xf32, #tpu.memory_space<vmem>>, vector<1x1x8x8x128xf32>
    %232 = vector.shape_cast %231 : vector<1x1x8x8x128xf32> to vector<8x8x128xf32>
    %233 = vector.broadcast %11 : vector<1x1x128xf32> to vector<8x8x128xf32>
    %234 = arith.mulf %232, %233 : vector<8x8x128xf32>
    %c0_116 = arith.constant 0 : index
    %c1_117 = arith.constant 1 : index
    %c0_118 = arith.constant 0 : index
    %c0_119 = arith.constant 0 : index
    %c0_120 = arith.constant 0 : index
    %235 = vector.load %arg7[%c0_116, %c1_117, %c0_118, %c0_119, %c0_120] : memref<2x7x14x8x128xf32, #tpu.memory_space<vmem>>, vector<1x1x8x8x128xf32>
    %236 = vector.shape_cast %235 : vector<1x1x8x8x128xf32> to vector<8x8x128xf32>
    %237 = vector.broadcast %14 : vector<1x1x128xf32> to vector<8x8x128xf32>
    %238 = arith.mulf %236, %237 : vector<8x8x128xf32>
    %239 = arith.addf %234, %238 : vector<8x8x128xf32>
    %c0_121 = arith.constant 0 : index
    %c2_122 = arith.constant 2 : index
    %c0_123 = arith.constant 0 : index
    %c0_124 = arith.constant 0 : index
    %c0_125 = arith.constant 0 : index
    %240 = vector.load %arg7[%c0_121, %c2_122, %c0_123, %c0_124, %c0_125] : memref<2x7x14x8x128xf32, #tpu.memory_space<vmem>>, vector<1x1x8x8x128xf32>
    %241 = vector.shape_cast %240 : vector<1x1x8x8x128xf32> to vector<8x8x128xf32>
    %242 = vector.broadcast %17 : vector<1x1x128xf32> to vector<8x8x128xf32>
    %243 = arith.mulf %241, %242 : vector<8x8x128xf32>
    %244 = arith.addf %239, %243 : vector<8x8x128xf32>
    %c0_126 = arith.constant 0 : index
    %c3_127 = arith.constant 3 : index
    %c0_128 = arith.constant 0 : index
    %c0_129 = arith.constant 0 : index
    %c0_130 = arith.constant 0 : index
    %245 = vector.load %arg7[%c0_126, %c3_127, %c0_128, %c0_129, %c0_130] : memref<2x7x14x8x128xf32, #tpu.memory_space<vmem>>, vector<1x1x8x8x128xf32>
    %246 = vector.shape_cast %245 : vector<1x1x8x8x128xf32> to vector<8x8x128xf32>
    %247 = vector.broadcast %20 : vector<1x1x128xf32> to vector<8x8x128xf32>
    %248 = arith.mulf %246, %247 : vector<8x8x128xf32>
    %249 = arith.addf %244, %248 : vector<8x8x128xf32>
    %c0_131 = arith.constant 0 : index
    %c4_132 = arith.constant 4 : index
    %c0_133 = arith.constant 0 : index
    %c0_134 = arith.constant 0 : index
    %c0_135 = arith.constant 0 : index
    %250 = vector.load %arg7[%c0_131, %c4_132, %c0_133, %c0_134, %c0_135] : memref<2x7x14x8x128xf32, #tpu.memory_space<vmem>>, vector<1x1x8x8x128xf32>
    %251 = vector.shape_cast %250 : vector<1x1x8x8x128xf32> to vector<8x8x128xf32>
    %252 = vector.broadcast %23 : vector<1x1x128xf32> to vector<8x8x128xf32>
    %253 = arith.mulf %251, %252 : vector<8x8x128xf32>
    %254 = arith.addf %249, %253 : vector<8x8x128xf32>
    %c0_136 = arith.constant 0 : index
    %c5_137 = arith.constant 5 : index
    %c0_138 = arith.constant 0 : index
    %c0_139 = arith.constant 0 : index
    %c0_140 = arith.constant 0 : index
    %255 = vector.load %arg7[%c0_136, %c5_137, %c0_138, %c0_139, %c0_140] : memref<2x7x14x8x128xf32, #tpu.memory_space<vmem>>, vector<1x1x8x8x128xf32>
    %256 = vector.shape_cast %255 : vector<1x1x8x8x128xf32> to vector<8x8x128xf32>
    %257 = vector.broadcast %26 : vector<1x1x128xf32> to vector<8x8x128xf32>
    %258 = arith.mulf %256, %257 : vector<8x8x128xf32>
    %259 = arith.addf %254, %258 : vector<8x8x128xf32>
    %c0_141 = arith.constant 0 : index
    %c6_142 = arith.constant 6 : index
    %c0_143 = arith.constant 0 : index
    %c0_144 = arith.constant 0 : index
    %c0_145 = arith.constant 0 : index
    %260 = vector.load %arg7[%c0_141, %c6_142, %c0_143, %c0_144, %c0_145] : memref<2x7x14x8x128xf32, #tpu.memory_space<vmem>>, vector<1x1x8x8x128xf32>
    %261 = vector.shape_cast %260 : vector<1x1x8x8x128xf32> to vector<8x8x128xf32>
    %262 = vector.broadcast %29 : vector<1x1x128xf32> to vector<8x8x128xf32>
    %263 = arith.mulf %261, %262 : vector<8x8x128xf32>
    %264 = arith.addf %259, %263 : vector<8x8x128xf32>
    %c0_146 = arith.constant 0 : index
    %c0_147 = arith.constant 0 : index
    %c1_148 = arith.constant 1 : index
    %c0_149 = arith.constant 0 : index
    %c0_150 = arith.constant 0 : index
    %265 = vector.load %arg7[%c0_146, %c0_147, %c1_148, %c0_149, %c0_150] : memref<2x7x14x8x128xf32, #tpu.memory_space<vmem>>, vector<1x1x8x8x128xf32>
    %266 = vector.shape_cast %265 : vector<1x1x8x8x128xf32> to vector<8x8x128xf32>
    %267 = vector.broadcast %32 : vector<1x1x128xf32> to vector<8x8x128xf32>
    %268 = arith.mulf %266, %267 : vector<8x8x128xf32>
    %269 = arith.addf %264, %268 : vector<8x8x128xf32>
    %c0_151 = arith.constant 0 : index
    %c1_152 = arith.constant 1 : index
    %c1_153 = arith.constant 1 : index
    %c0_154 = arith.constant 0 : index
    %c0_155 = arith.constant 0 : index
    %270 = vector.load %arg7[%c0_151, %c1_152, %c1_153, %c0_154, %c0_155] : memref<2x7x14x8x128xf32, #tpu.memory_space<vmem>>, vector<1x1x8x8x128xf32>
    %271 = vector.shape_cast %270 : vector<1x1x8x8x128xf32> to vector<8x8x128xf32>
    %272 = vector.broadcast %35 : vector<1x1x128xf32> to vector<8x8x128xf32>
    %273 = arith.mulf %271, %272 : vector<8x8x128xf32>
    %274 = arith.addf %269, %273 : vector<8x8x128xf32>
    %c0_156 = arith.constant 0 : index
    %c2_157 = arith.constant 2 : index
    %c1_158 = arith.constant 1 : index
    %c0_159 = arith.constant 0 : index
    %c0_160 = arith.constant 0 : index
    %275 = vector.load %arg7[%c0_156, %c2_157, %c1_158, %c0_159, %c0_160] : memref<2x7x14x8x128xf32, #tpu.memory_space<vmem>>, vector<1x1x8x8x128xf32>
    %276 = vector.shape_cast %275 : vector<1x1x8x8x128xf32> to vector<8x8x128xf32>
    %277 = vector.broadcast %38 : vector<1x1x128xf32> to vector<8x8x128xf32>
    %278 = arith.mulf %276, %277 : vector<8x8x128xf32>
    %279 = arith.addf %274, %278 : vector<8x8x128xf32>
    %c0_161 = arith.constant 0 : index
    %c3_162 = arith.constant 3 : index
    %c1_163 = arith.constant 1 : index
    %c0_164 = arith.constant 0 : index
    %c0_165 = arith.constant 0 : index
    %280 = vector.load %arg7[%c0_161, %c3_162, %c1_163, %c0_164, %c0_165] : memref<2x7x14x8x128xf32, #tpu.memory_space<vmem>>, vector<1x1x8x8x128xf32>
    %281 = vector.shape_cast %280 : vector<1x1x8x8x128xf32> to vector<8x8x128xf32>
    %282 = vector.broadcast %41 : vector<1x1x128xf32> to vector<8x8x128xf32>
    %283 = arith.mulf %281, %282 : vector<8x8x128xf32>
    %284 = arith.addf %279, %283 : vector<8x8x128xf32>
    %c0_166 = arith.constant 0 : index
    %c4_167 = arith.constant 4 : index
    %c1_168 = arith.constant 1 : index
    %c0_169 = arith.constant 0 : index
    %c0_170 = arith.constant 0 : index
    %285 = vector.load %arg7[%c0_166, %c4_167, %c1_168, %c0_169, %c0_170] : memref<2x7x14x8x128xf32, #tpu.memory_space<vmem>>, vector<1x1x8x8x128xf32>
    %286 = vector.shape_cast %285 : vector<1x1x8x8x128xf32> to vector<8x8x128xf32>
    %287 = vector.broadcast %44 : vector<1x1x128xf32> to vector<8x8x128xf32>
    %288 = arith.mulf %286, %287 : vector<8x8x128xf32>
    %289 = arith.addf %284, %288 : vector<8x8x128xf32>
    %c0_171 = arith.constant 0 : index
    %c5_172 = arith.constant 5 : index
    %c1_173 = arith.constant 1 : index
    %c0_174 = arith.constant 0 : index
    %c0_175 = arith.constant 0 : index
    %290 = vector.load %arg7[%c0_171, %c5_172, %c1_173, %c0_174, %c0_175] : memref<2x7x14x8x128xf32, #tpu.memory_space<vmem>>, vector<1x1x8x8x128xf32>
    %291 = vector.shape_cast %290 : vector<1x1x8x8x128xf32> to vector<8x8x128xf32>
    %292 = vector.broadcast %47 : vector<1x1x128xf32> to vector<8x8x128xf32>
    %293 = arith.mulf %291, %292 : vector<8x8x128xf32>
    %294 = arith.addf %289, %293 : vector<8x8x128xf32>
    %c0_176 = arith.constant 0 : index
    %c6_177 = arith.constant 6 : index
    %c1_178 = arith.constant 1 : index
    %c0_179 = arith.constant 0 : index
    %c0_180 = arith.constant 0 : index
    %295 = vector.load %arg7[%c0_176, %c6_177, %c1_178, %c0_179, %c0_180] : memref<2x7x14x8x128xf32, #tpu.memory_space<vmem>>, vector<1x1x8x8x128xf32>
    %296 = vector.shape_cast %295 : vector<1x1x8x8x128xf32> to vector<8x8x128xf32>
    %297 = vector.broadcast %50 : vector<1x1x128xf32> to vector<8x8x128xf32>
    %298 = arith.mulf %296, %297 : vector<8x8x128xf32>
    %299 = arith.addf %294, %298 : vector<8x8x128xf32>
    %c0_181 = arith.constant 0 : index
    %c0_182 = arith.constant 0 : index
    %c2_183 = arith.constant 2 : index
    %c0_184 = arith.constant 0 : index
    %c0_185 = arith.constant 0 : index
    %300 = vector.load %arg7[%c0_181, %c0_182, %c2_183, %c0_184, %c0_185] : memref<2x7x14x8x128xf32, #tpu.memory_space<vmem>>, vector<1x1x8x8x128xf32>
    %301 = vector.shape_cast %300 : vector<1x1x8x8x128xf32> to vector<8x8x128xf32>
    %302 = vector.broadcast %53 : vector<1x1x128xf32> to vector<8x8x128xf32>
    %303 = arith.mulf %301, %302 : vector<8x8x128xf32>
    %304 = arith.addf %299, %303 : vector<8x8x128xf32>
    %c0_186 = arith.constant 0 : index
    %c1_187 = arith.constant 1 : index
    %c2_188 = arith.constant 2 : index
    %c0_189 = arith.constant 0 : index
    %c0_190 = arith.constant 0 : index
    %305 = vector.load %arg7[%c0_186, %c1_187, %c2_188, %c0_189, %c0_190] : memref<2x7x14x8x128xf32, #tpu.memory_space<vmem>>, vector<1x1x8x8x128xf32>
    %306 = vector.shape_cast %305 : vector<1x1x8x8x128xf32> to vector<8x8x128xf32>
    %307 = vector.broadcast %56 : vector<1x1x128xf32> to vector<8x8x128xf32>
    %308 = arith.mulf %306, %307 : vector<8x8x128xf32>
    %309 = arith.addf %304, %308 : vector<8x8x128xf32>
    %c0_191 = arith.constant 0 : index
    %c2_192 = arith.constant 2 : index
    %c2_193 = arith.constant 2 : index
    %c0_194 = arith.constant 0 : index
    %c0_195 = arith.constant 0 : index
    %310 = vector.load %arg7[%c0_191, %c2_192, %c2_193, %c0_194, %c0_195] : memref<2x7x14x8x128xf32, #tpu.memory_space<vmem>>, vector<1x1x8x8x128xf32>
    %311 = vector.shape_cast %310 : vector<1x1x8x8x128xf32> to vector<8x8x128xf32>
    %312 = vector.broadcast %59 : vector<1x1x128xf32> to vector<8x8x128xf32>
    %313 = arith.mulf %311, %312 : vector<8x8x128xf32>
    %314 = arith.addf %309, %313 : vector<8x8x128xf32>
    %c0_196 = arith.constant 0 : index
    %c3_197 = arith.constant 3 : index
    %c2_198 = arith.constant 2 : index
    %c0_199 = arith.constant 0 : index
    %c0_200 = arith.constant 0 : index
    %315 = vector.load %arg7[%c0_196, %c3_197, %c2_198, %c0_199, %c0_200] : memref<2x7x14x8x128xf32, #tpu.memory_space<vmem>>, vector<1x1x8x8x128xf32>
    %316 = vector.shape_cast %315 : vector<1x1x8x8x128xf32> to vector<8x8x128xf32>
    %317 = vector.broadcast %62 : vector<1x1x128xf32> to vector<8x8x128xf32>
    %318 = arith.mulf %316, %317 : vector<8x8x128xf32>
    %319 = arith.addf %314, %318 : vector<8x8x128xf32>
    %c0_201 = arith.constant 0 : index
    %c4_202 = arith.constant 4 : index
    %c2_203 = arith.constant 2 : index
    %c0_204 = arith.constant 0 : index
    %c0_205 = arith.constant 0 : index
    %320 = vector.load %arg7[%c0_201, %c4_202, %c2_203, %c0_204, %c0_205] : memref<2x7x14x8x128xf32, #tpu.memory_space<vmem>>, vector<1x1x8x8x128xf32>
    %321 = vector.shape_cast %320 : vector<1x1x8x8x128xf32> to vector<8x8x128xf32>
    %322 = vector.broadcast %65 : vector<1x1x128xf32> to vector<8x8x128xf32>
    %323 = arith.mulf %321, %322 : vector<8x8x128xf32>
    %324 = arith.addf %319, %323 : vector<8x8x128xf32>
    %c0_206 = arith.constant 0 : index
    %c5_207 = arith.constant 5 : index
    %c2_208 = arith.constant 2 : index
    %c0_209 = arith.constant 0 : index
    %c0_210 = arith.constant 0 : index
    %325 = vector.load %arg7[%c0_206, %c5_207, %c2_208, %c0_209, %c0_210] : memref<2x7x14x8x128xf32, #tpu.memory_space<vmem>>, vector<1x1x8x8x128xf32>
    %326 = vector.shape_cast %325 : vector<1x1x8x8x128xf32> to vector<8x8x128xf32>
    %327 = vector.broadcast %68 : vector<1x1x128xf32> to vector<8x8x128xf32>
    %328 = arith.mulf %326, %327 : vector<8x8x128xf32>
    %329 = arith.addf %324, %328 : vector<8x8x128xf32>
    %c0_211 = arith.constant 0 : index
    %c6_212 = arith.constant 6 : index
    %c2_213 = arith.constant 2 : index
    %c0_214 = arith.constant 0 : index
    %c0_215 = arith.constant 0 : index
    %330 = vector.load %arg7[%c0_211, %c6_212, %c2_213, %c0_214, %c0_215] : memref<2x7x14x8x128xf32, #tpu.memory_space<vmem>>, vector<1x1x8x8x128xf32>
    %331 = vector.shape_cast %330 : vector<1x1x8x8x128xf32> to vector<8x8x128xf32>
    %332 = vector.broadcast %71 : vector<1x1x128xf32> to vector<8x8x128xf32>
    %333 = arith.mulf %331, %332 : vector<8x8x128xf32>
    %334 = arith.addf %329, %333 : vector<8x8x128xf32>
    %c0_216 = arith.constant 0 : index
    %c0_217 = arith.constant 0 : index
    %c3_218 = arith.constant 3 : index
    %c0_219 = arith.constant 0 : index
    %c0_220 = arith.constant 0 : index
    %335 = vector.load %arg7[%c0_216, %c0_217, %c3_218, %c0_219, %c0_220] : memref<2x7x14x8x128xf32, #tpu.memory_space<vmem>>, vector<1x1x8x8x128xf32>
    %336 = vector.shape_cast %335 : vector<1x1x8x8x128xf32> to vector<8x8x128xf32>
    %337 = vector.broadcast %74 : vector<1x1x128xf32> to vector<8x8x128xf32>
    %338 = arith.mulf %336, %337 : vector<8x8x128xf32>
    %339 = arith.addf %334, %338 : vector<8x8x128xf32>
    %c0_221 = arith.constant 0 : index
    %c1_222 = arith.constant 1 : index
    %c3_223 = arith.constant 3 : index
    %c0_224 = arith.constant 0 : index
    %c0_225 = arith.constant 0 : index
    %340 = vector.load %arg7[%c0_221, %c1_222, %c3_223, %c0_224, %c0_225] : memref<2x7x14x8x128xf32, #tpu.memory_space<vmem>>, vector<1x1x8x8x128xf32>
    %341 = vector.shape_cast %340 : vector<1x1x8x8x128xf32> to vector<8x8x128xf32>
    %342 = vector.broadcast %77 : vector<1x1x128xf32> to vector<8x8x128xf32>
    %343 = arith.mulf %341, %342 : vector<8x8x128xf32>
    %344 = arith.addf %339, %343 : vector<8x8x128xf32>
    %c0_226 = arith.constant 0 : index
    %c2_227 = arith.constant 2 : index
    %c3_228 = arith.constant 3 : index
    %c0_229 = arith.constant 0 : index
    %c0_230 = arith.constant 0 : index
    %345 = vector.load %arg7[%c0_226, %c2_227, %c3_228, %c0_229, %c0_230] : memref<2x7x14x8x128xf32, #tpu.memory_space<vmem>>, vector<1x1x8x8x128xf32>
    %346 = vector.shape_cast %345 : vector<1x1x8x8x128xf32> to vector<8x8x128xf32>
    %347 = vector.broadcast %80 : vector<1x1x128xf32> to vector<8x8x128xf32>
    %348 = arith.mulf %346, %347 : vector<8x8x128xf32>
    %349 = arith.addf %344, %348 : vector<8x8x128xf32>
    %c0_231 = arith.constant 0 : index
    %c3_232 = arith.constant 3 : index
    %c3_233 = arith.constant 3 : index
    %c0_234 = arith.constant 0 : index
    %c0_235 = arith.constant 0 : index
    %350 = vector.load %arg7[%c0_231, %c3_232, %c3_233, %c0_234, %c0_235] : memref<2x7x14x8x128xf32, #tpu.memory_space<vmem>>, vector<1x1x8x8x128xf32>
    %351 = vector.shape_cast %350 : vector<1x1x8x8x128xf32> to vector<8x8x128xf32>
    %352 = vector.broadcast %83 : vector<1x1x128xf32> to vector<8x8x128xf32>
    %353 = arith.mulf %351, %352 : vector<8x8x128xf32>
    %354 = arith.addf %349, %353 : vector<8x8x128xf32>
    %c0_236 = arith.constant 0 : index
    %c4_237 = arith.constant 4 : index
    %c3_238 = arith.constant 3 : index
    %c0_239 = arith.constant 0 : index
    %c0_240 = arith.constant 0 : index
    %355 = vector.load %arg7[%c0_236, %c4_237, %c3_238, %c0_239, %c0_240] : memref<2x7x14x8x128xf32, #tpu.memory_space<vmem>>, vector<1x1x8x8x128xf32>
    %356 = vector.shape_cast %355 : vector<1x1x8x8x128xf32> to vector<8x8x128xf32>
    %357 = vector.broadcast %86 : vector<1x1x128xf32> to vector<8x8x128xf32>
    %358 = arith.mulf %356, %357 : vector<8x8x128xf32>
    %359 = arith.addf %354, %358 : vector<8x8x128xf32>
    %c0_241 = arith.constant 0 : index
    %c5_242 = arith.constant 5 : index
    %c3_243 = arith.constant 3 : index
    %c0_244 = arith.constant 0 : index
    %c0_245 = arith.constant 0 : index
    %360 = vector.load %arg7[%c0_241, %c5_242, %c3_243, %c0_244, %c0_245] : memref<2x7x14x8x128xf32, #tpu.memory_space<vmem>>, vector<1x1x8x8x128xf32>
    %361 = vector.shape_cast %360 : vector<1x1x8x8x128xf32> to vector<8x8x128xf32>
    %362 = vector.broadcast %89 : vector<1x1x128xf32> to vector<8x8x128xf32>
    %363 = arith.mulf %361, %362 : vector<8x8x128xf32>
    %364 = arith.addf %359, %363 : vector<8x8x128xf32>
    %c0_246 = arith.constant 0 : index
    %c6_247 = arith.constant 6 : index
    %c3_248 = arith.constant 3 : index
    %c0_249 = arith.constant 0 : index
    %c0_250 = arith.constant 0 : index
    %365 = vector.load %arg7[%c0_246, %c6_247, %c3_248, %c0_249, %c0_250] : memref<2x7x14x8x128xf32, #tpu.memory_space<vmem>>, vector<1x1x8x8x128xf32>
    %366 = vector.shape_cast %365 : vector<1x1x8x8x128xf32> to vector<8x8x128xf32>
    %367 = vector.broadcast %92 : vector<1x1x128xf32> to vector<8x8x128xf32>
    %368 = arith.mulf %366, %367 : vector<8x8x128xf32>
    %369 = arith.addf %364, %368 : vector<8x8x128xf32>
    %c0_251 = arith.constant 0 : index
    %c0_252 = arith.constant 0 : index
    %c4_253 = arith.constant 4 : index
    %c0_254 = arith.constant 0 : index
    %c0_255 = arith.constant 0 : index
    %370 = vector.load %arg7[%c0_251, %c0_252, %c4_253, %c0_254, %c0_255] : memref<2x7x14x8x128xf32, #tpu.memory_space<vmem>>, vector<1x1x8x8x128xf32>
    %371 = vector.shape_cast %370 : vector<1x1x8x8x128xf32> to vector<8x8x128xf32>
    %372 = vector.broadcast %95 : vector<1x1x128xf32> to vector<8x8x128xf32>
    %373 = arith.mulf %371, %372 : vector<8x8x128xf32>
    %374 = arith.addf %369, %373 : vector<8x8x128xf32>
    %c0_256 = arith.constant 0 : index
    %c1_257 = arith.constant 1 : index
    %c4_258 = arith.constant 4 : index
    %c0_259 = arith.constant 0 : index
    %c0_260 = arith.constant 0 : index
    %375 = vector.load %arg7[%c0_256, %c1_257, %c4_258, %c0_259, %c0_260] : memref<2x7x14x8x128xf32, #tpu.memory_space<vmem>>, vector<1x1x8x8x128xf32>
    %376 = vector.shape_cast %375 : vector<1x1x8x8x128xf32> to vector<8x8x128xf32>
    %377 = vector.broadcast %98 : vector<1x1x128xf32> to vector<8x8x128xf32>
    %378 = arith.mulf %376, %377 : vector<8x8x128xf32>
    %379 = arith.addf %374, %378 : vector<8x8x128xf32>
    %c0_261 = arith.constant 0 : index
    %c2_262 = arith.constant 2 : index
    %c4_263 = arith.constant 4 : index
    %c0_264 = arith.constant 0 : index
    %c0_265 = arith.constant 0 : index
    %380 = vector.load %arg7[%c0_261, %c2_262, %c4_263, %c0_264, %c0_265] : memref<2x7x14x8x128xf32, #tpu.memory_space<vmem>>, vector<1x1x8x8x128xf32>
    %381 = vector.shape_cast %380 : vector<1x1x8x8x128xf32> to vector<8x8x128xf32>
    %382 = vector.broadcast %101 : vector<1x1x128xf32> to vector<8x8x128xf32>
    %383 = arith.mulf %381, %382 : vector<8x8x128xf32>
    %384 = arith.addf %379, %383 : vector<8x8x128xf32>
    %c0_266 = arith.constant 0 : index
    %c3_267 = arith.constant 3 : index
    %c4_268 = arith.constant 4 : index
    %c0_269 = arith.constant 0 : index
    %c0_270 = arith.constant 0 : index
    %385 = vector.load %arg7[%c0_266, %c3_267, %c4_268, %c0_269, %c0_270] : memref<2x7x14x8x128xf32, #tpu.memory_space<vmem>>, vector<1x1x8x8x128xf32>
    %386 = vector.shape_cast %385 : vector<1x1x8x8x128xf32> to vector<8x8x128xf32>
    %387 = vector.broadcast %104 : vector<1x1x128xf32> to vector<8x8x128xf32>
    %388 = arith.mulf %386, %387 : vector<8x8x128xf32>
    %389 = arith.addf %384, %388 : vector<8x8x128xf32>
    %c0_271 = arith.constant 0 : index
    %c4_272 = arith.constant 4 : index
    %c4_273 = arith.constant 4 : index
    %c0_274 = arith.constant 0 : index
    %c0_275 = arith.constant 0 : index
    %390 = vector.load %arg7[%c0_271, %c4_272, %c4_273, %c0_274, %c0_275] : memref<2x7x14x8x128xf32, #tpu.memory_space<vmem>>, vector<1x1x8x8x128xf32>
    %391 = vector.shape_cast %390 : vector<1x1x8x8x128xf32> to vector<8x8x128xf32>
    %392 = vector.broadcast %107 : vector<1x1x128xf32> to vector<8x8x128xf32>
    %393 = arith.mulf %391, %392 : vector<8x8x128xf32>
    %394 = arith.addf %389, %393 : vector<8x8x128xf32>
    %c0_276 = arith.constant 0 : index
    %c5_277 = arith.constant 5 : index
    %c4_278 = arith.constant 4 : index
    %c0_279 = arith.constant 0 : index
    %c0_280 = arith.constant 0 : index
    %395 = vector.load %arg7[%c0_276, %c5_277, %c4_278, %c0_279, %c0_280] : memref<2x7x14x8x128xf32, #tpu.memory_space<vmem>>, vector<1x1x8x8x128xf32>
    %396 = vector.shape_cast %395 : vector<1x1x8x8x128xf32> to vector<8x8x128xf32>
    %397 = vector.broadcast %110 : vector<1x1x128xf32> to vector<8x8x128xf32>
    %398 = arith.mulf %396, %397 : vector<8x8x128xf32>
    %399 = arith.addf %394, %398 : vector<8x8x128xf32>
    %c0_281 = arith.constant 0 : index
    %c6_282 = arith.constant 6 : index
    %c4_283 = arith.constant 4 : index
    %c0_284 = arith.constant 0 : index
    %c0_285 = arith.constant 0 : index
    %400 = vector.load %arg7[%c0_281, %c6_282, %c4_283, %c0_284, %c0_285] : memref<2x7x14x8x128xf32, #tpu.memory_space<vmem>>, vector<1x1x8x8x128xf32>
    %401 = vector.shape_cast %400 : vector<1x1x8x8x128xf32> to vector<8x8x128xf32>
    %402 = vector.broadcast %113 : vector<1x1x128xf32> to vector<8x8x128xf32>
    %403 = arith.mulf %401, %402 : vector<8x8x128xf32>
    %404 = arith.addf %399, %403 : vector<8x8x128xf32>
    %c0_286 = arith.constant 0 : index
    %c0_287 = arith.constant 0 : index
    %c5_288 = arith.constant 5 : index
    %c0_289 = arith.constant 0 : index
    %c0_290 = arith.constant 0 : index
    %405 = vector.load %arg7[%c0_286, %c0_287, %c5_288, %c0_289, %c0_290] : memref<2x7x14x8x128xf32, #tpu.memory_space<vmem>>, vector<1x1x8x8x128xf32>
    %406 = vector.shape_cast %405 : vector<1x1x8x8x128xf32> to vector<8x8x128xf32>
    %407 = vector.broadcast %116 : vector<1x1x128xf32> to vector<8x8x128xf32>
    %408 = arith.mulf %406, %407 : vector<8x8x128xf32>
    %409 = arith.addf %404, %408 : vector<8x8x128xf32>
    %c0_291 = arith.constant 0 : index
    %c1_292 = arith.constant 1 : index
    %c5_293 = arith.constant 5 : index
    %c0_294 = arith.constant 0 : index
    %c0_295 = arith.constant 0 : index
    %410 = vector.load %arg7[%c0_291, %c1_292, %c5_293, %c0_294, %c0_295] : memref<2x7x14x8x128xf32, #tpu.memory_space<vmem>>, vector<1x1x8x8x128xf32>
    %411 = vector.shape_cast %410 : vector<1x1x8x8x128xf32> to vector<8x8x128xf32>
    %412 = vector.broadcast %119 : vector<1x1x128xf32> to vector<8x8x128xf32>
    %413 = arith.mulf %411, %412 : vector<8x8x128xf32>
    %414 = arith.addf %409, %413 : vector<8x8x128xf32>
    %c0_296 = arith.constant 0 : index
    %c2_297 = arith.constant 2 : index
    %c5_298 = arith.constant 5 : index
    %c0_299 = arith.constant 0 : index
    %c0_300 = arith.constant 0 : index
    %415 = vector.load %arg7[%c0_296, %c2_297, %c5_298, %c0_299, %c0_300] : memref<2x7x14x8x128xf32, #tpu.memory_space<vmem>>, vector<1x1x8x8x128xf32>
    %416 = vector.shape_cast %415 : vector<1x1x8x8x128xf32> to vector<8x8x128xf32>
    %417 = vector.broadcast %122 : vector<1x1x128xf32> to vector<8x8x128xf32>
    %418 = arith.mulf %416, %417 : vector<8x8x128xf32>
    %419 = arith.addf %414, %418 : vector<8x8x128xf32>
    %c0_301 = arith.constant 0 : index
    %c3_302 = arith.constant 3 : index
    %c5_303 = arith.constant 5 : index
    %c0_304 = arith.constant 0 : index
    %c0_305 = arith.constant 0 : index
    %420 = vector.load %arg7[%c0_301, %c3_302, %c5_303, %c0_304, %c0_305] : memref<2x7x14x8x128xf32, #tpu.memory_space<vmem>>, vector<1x1x8x8x128xf32>
    %421 = vector.shape_cast %420 : vector<1x1x8x8x128xf32> to vector<8x8x128xf32>
    %422 = vector.broadcast %125 : vector<1x1x128xf32> to vector<8x8x128xf32>
    %423 = arith.mulf %421, %422 : vector<8x8x128xf32>
    %424 = arith.addf %419, %423 : vector<8x8x128xf32>
    %c0_306 = arith.constant 0 : index
    %c4_307 = arith.constant 4 : index
    %c5_308 = arith.constant 5 : index
    %c0_309 = arith.constant 0 : index
    %c0_310 = arith.constant 0 : index
    %425 = vector.load %arg7[%c0_306, %c4_307, %c5_308, %c0_309, %c0_310] : memref<2x7x14x8x128xf32, #tpu.memory_space<vmem>>, vector<1x1x8x8x128xf32>
    %426 = vector.shape_cast %425 : vector<1x1x8x8x128xf32> to vector<8x8x128xf32>
    %427 = vector.broadcast %128 : vector<1x1x128xf32> to vector<8x8x128xf32>
    %428 = arith.mulf %426, %427 : vector<8x8x128xf32>
    %429 = arith.addf %424, %428 : vector<8x8x128xf32>
    %c0_311 = arith.constant 0 : index
    %c5_312 = arith.constant 5 : index
    %c5_313 = arith.constant 5 : index
    %c0_314 = arith.constant 0 : index
    %c0_315 = arith.constant 0 : index
    %430 = vector.load %arg7[%c0_311, %c5_312, %c5_313, %c0_314, %c0_315] : memref<2x7x14x8x128xf32, #tpu.memory_space<vmem>>, vector<1x1x8x8x128xf32>
    %431 = vector.shape_cast %430 : vector<1x1x8x8x128xf32> to vector<8x8x128xf32>
    %432 = vector.broadcast %131 : vector<1x1x128xf32> to vector<8x8x128xf32>
    %433 = arith.mulf %431, %432 : vector<8x8x128xf32>
    %434 = arith.addf %429, %433 : vector<8x8x128xf32>
    %c0_316 = arith.constant 0 : index
    %c6_317 = arith.constant 6 : index
    %c5_318 = arith.constant 5 : index
    %c0_319 = arith.constant 0 : index
    %c0_320 = arith.constant 0 : index
    %435 = vector.load %arg7[%c0_316, %c6_317, %c5_318, %c0_319, %c0_320] : memref<2x7x14x8x128xf32, #tpu.memory_space<vmem>>, vector<1x1x8x8x128xf32>
    %436 = vector.shape_cast %435 : vector<1x1x8x8x128xf32> to vector<8x8x128xf32>
    %437 = vector.broadcast %134 : vector<1x1x128xf32> to vector<8x8x128xf32>
    %438 = arith.mulf %436, %437 : vector<8x8x128xf32>
    %439 = arith.addf %434, %438 : vector<8x8x128xf32>
    %c0_321 = arith.constant 0 : index
    %c0_322 = arith.constant 0 : index
    %c6_323 = arith.constant 6 : index
    %c0_324 = arith.constant 0 : index
    %c0_325 = arith.constant 0 : index
    %440 = vector.load %arg7[%c0_321, %c0_322, %c6_323, %c0_324, %c0_325] : memref<2x7x14x8x128xf32, #tpu.memory_space<vmem>>, vector<1x1x8x8x128xf32>
    %441 = vector.shape_cast %440 : vector<1x1x8x8x128xf32> to vector<8x8x128xf32>
    %442 = vector.broadcast %137 : vector<1x1x128xf32> to vector<8x8x128xf32>
    %443 = arith.mulf %441, %442 : vector<8x8x128xf32>
    %444 = arith.addf %439, %443 : vector<8x8x128xf32>
    %c0_326 = arith.constant 0 : index
    %c1_327 = arith.constant 1 : index
    %c6_328 = arith.constant 6 : index
    %c0_329 = arith.constant 0 : index
    %c0_330 = arith.constant 0 : index
    %445 = vector.load %arg7[%c0_326, %c1_327, %c6_328, %c0_329, %c0_330] : memref<2x7x14x8x128xf32, #tpu.memory_space<vmem>>, vector<1x1x8x8x128xf32>
    %446 = vector.shape_cast %445 : vector<1x1x8x8x128xf32> to vector<8x8x128xf32>
    %447 = vector.broadcast %140 : vector<1x1x128xf32> to vector<8x8x128xf32>
    %448 = arith.mulf %446, %447 : vector<8x8x128xf32>
    %449 = arith.addf %444, %448 : vector<8x8x128xf32>
    %c0_331 = arith.constant 0 : index
    %c2_332 = arith.constant 2 : index
    %c6_333 = arith.constant 6 : index
    %c0_334 = arith.constant 0 : index
    %c0_335 = arith.constant 0 : index
    %450 = vector.load %arg7[%c0_331, %c2_332, %c6_333, %c0_334, %c0_335] : memref<2x7x14x8x128xf32, #tpu.memory_space<vmem>>, vector<1x1x8x8x128xf32>
    %451 = vector.shape_cast %450 : vector<1x1x8x8x128xf32> to vector<8x8x128xf32>
    %452 = vector.broadcast %143 : vector<1x1x128xf32> to vector<8x8x128xf32>
    %453 = arith.mulf %451, %452 : vector<8x8x128xf32>
    %454 = arith.addf %449, %453 : vector<8x8x128xf32>
    %c0_336 = arith.constant 0 : index
    %c3_337 = arith.constant 3 : index
    %c6_338 = arith.constant 6 : index
    %c0_339 = arith.constant 0 : index
    %c0_340 = arith.constant 0 : index
    %455 = vector.load %arg7[%c0_336, %c3_337, %c6_338, %c0_339, %c0_340] : memref<2x7x14x8x128xf32, #tpu.memory_space<vmem>>, vector<1x1x8x8x128xf32>
    %456 = vector.shape_cast %455 : vector<1x1x8x8x128xf32> to vector<8x8x128xf32>
    %457 = vector.broadcast %146 : vector<1x1x128xf32> to vector<8x8x128xf32>
    %458 = arith.mulf %456, %457 : vector<8x8x128xf32>
    %459 = arith.addf %454, %458 : vector<8x8x128xf32>
    %c0_341 = arith.constant 0 : index
    %c4_342 = arith.constant 4 : index
    %c6_343 = arith.constant 6 : index
    %c0_344 = arith.constant 0 : index
    %c0_345 = arith.constant 0 : index
    %460 = vector.load %arg7[%c0_341, %c4_342, %c6_343, %c0_344, %c0_345] : memref<2x7x14x8x128xf32, #tpu.memory_space<vmem>>, vector<1x1x8x8x128xf32>
    %461 = vector.shape_cast %460 : vector<1x1x8x8x128xf32> to vector<8x8x128xf32>
    %462 = vector.broadcast %149 : vector<1x1x128xf32> to vector<8x8x128xf32>
    %463 = arith.mulf %461, %462 : vector<8x8x128xf32>
    %464 = arith.addf %459, %463 : vector<8x8x128xf32>
    %c0_346 = arith.constant 0 : index
    %c5_347 = arith.constant 5 : index
    %c6_348 = arith.constant 6 : index
    %c0_349 = arith.constant 0 : index
    %c0_350 = arith.constant 0 : index
    %465 = vector.load %arg7[%c0_346, %c5_347, %c6_348, %c0_349, %c0_350] : memref<2x7x14x8x128xf32, #tpu.memory_space<vmem>>, vector<1x1x8x8x128xf32>
    %466 = vector.shape_cast %465 : vector<1x1x8x8x128xf32> to vector<8x8x128xf32>
    %467 = vector.broadcast %152 : vector<1x1x128xf32> to vector<8x8x128xf32>
    %468 = arith.mulf %466, %467 : vector<8x8x128xf32>
    %469 = arith.addf %464, %468 : vector<8x8x128xf32>
    %c0_351 = arith.constant 0 : index
    %c6_352 = arith.constant 6 : index
    %c6_353 = arith.constant 6 : index
    %c0_354 = arith.constant 0 : index
    %c0_355 = arith.constant 0 : index
    %470 = vector.load %arg7[%c0_351, %c6_352, %c6_353, %c0_354, %c0_355] : memref<2x7x14x8x128xf32, #tpu.memory_space<vmem>>, vector<1x1x8x8x128xf32>
    %471 = vector.shape_cast %470 : vector<1x1x8x8x128xf32> to vector<8x8x128xf32>
    %472 = vector.broadcast %155 : vector<1x1x128xf32> to vector<8x8x128xf32>
    %473 = arith.mulf %471, %472 : vector<8x8x128xf32>
    %474 = arith.addf %469, %473 : vector<8x8x128xf32>
    %475 = vector.broadcast %157 : vector<1x1x128xf32> to vector<8x8x128xf32>
    %476 = arith.addf %474, %475 : vector<8x8x128xf32>
    %477 = vector.extract_strided_slice %476 {offsets = [0, 0, 0], sizes = [1, 8, 128], strides = [1, 1, 1]} : vector<8x8x128xf32> to vector<1x8x128xf32>
    %478 = vector.shape_cast %477 : vector<1x8x128xf32> to vector<8x128xf32>
    %c0_356 = arith.constant 0 : index
    %c0_357 = arith.constant 0 : index
    %c0_358 = arith.constant 0 : index
    %479 = vector.load %arg5[%c0_356, %c0_357, %c0_358] : memref<1x60x128xf32, #tpu.memory_space<vmem>>, vector<1x8x128xf32>
    %480 = vector.shape_cast %479 : vector<1x8x128xf32> to vector<8x128xf32>
    %481 = vector.shape_cast %478 : vector<8x128xf32> to vector<1x8x128xf32>
    tpu.vector_store %arg5[%c0_356, %c0_357, %c0_358], %481 {strides = array<i32>} : memref<1x60x128xf32, #tpu.memory_space<vmem>>, vector<1x8x128xf32>,
    %482 = vector.extract_strided_slice %476 {offsets = [1, 0, 0], sizes = [1, 8, 128], strides = [1, 1, 1]} : vector<8x8x128xf32> to vector<1x8x128xf32>
    %483 = vector.shape_cast %482 : vector<1x8x128xf32> to vector<8x128xf32>
    %c0_359 = arith.constant 0 : index
    %c8_360 = arith.constant 8 : index
    %c0_361 = arith.constant 0 : index
    %484 = vector.load %arg5[%c0_359, %c8_360, %c0_361] : memref<1x60x128xf32, #tpu.memory_space<vmem>>, vector<1x8x128xf32>
    %485 = vector.shape_cast %484 : vector<1x8x128xf32> to vector<8x128xf32>
    %486 = vector.shape_cast %483 : vector<8x128xf32> to vector<1x8x128xf32>
    tpu.vector_store %arg5[%c0_359, %c8_360, %c0_361], %486 {strides = array<i32>} : memref<1x60x128xf32, #tpu.memory_space<vmem>>, vector<1x8x128xf32>,
    %487 = vector.extract_strided_slice %476 {offsets = [2, 0, 0], sizes = [1, 8, 128], strides = [1, 1, 1]} : vector<8x8x128xf32> to vector<1x8x128xf32>
    %488 = vector.shape_cast %487 : vector<1x8x128xf32> to vector<8x128xf32>
    %c0_362 = arith.constant 0 : index
    %c16_363 = arith.constant 16 : index
    %c0_364 = arith.constant 0 : index
    %489 = vector.load %arg5[%c0_362, %c16_363, %c0_364] : memref<1x60x128xf32, #tpu.memory_space<vmem>>, vector<1x8x128xf32>
    %490 = vector.shape_cast %489 : vector<1x8x128xf32> to vector<8x128xf32>
    %491 = vector.shape_cast %488 : vector<8x128xf32> to vector<1x8x128xf32>
    tpu.vector_store %arg5[%c0_362, %c16_363, %c0_364], %491 {strides = array<i32>} : memref<1x60x128xf32, #tpu.memory_space<vmem>>, vector<1x8x128xf32>,
    %492 = vector.extract_strided_slice %476 {offsets = [3, 0, 0], sizes = [1, 8, 128], strides = [1, 1, 1]} : vector<8x8x128xf32> to vector<1x8x128xf32>
    %493 = vector.shape_cast %492 : vector<1x8x128xf32> to vector<8x128xf32>
    %c0_365 = arith.constant 0 : index
    %c24_366 = arith.constant 24 : index
    %c0_367 = arith.constant 0 : index
    %494 = vector.load %arg5[%c0_365, %c24_366, %c0_367] : memref<1x60x128xf32, #tpu.memory_space<vmem>>, vector<1x8x128xf32>
    %495 = vector.shape_cast %494 : vector<1x8x128xf32> to vector<8x128xf32>
    %496 = vector.shape_cast %493 : vector<8x128xf32> to vector<1x8x128xf32>
    tpu.vector_store %arg5[%c0_365, %c24_366, %c0_367], %496 {strides = array<i32>} : memref<1x60x128xf32, #tpu.memory_space<vmem>>, vector<1x8x128xf32>,
    %497 = vector.extract_strided_slice %476 {offsets = [4, 0, 0], sizes = [1, 8, 128], strides = [1, 1, 1]} : vector<8x8x128xf32> to vector<1x8x128xf32>
    %498 = vector.shape_cast %497 : vector<1x8x128xf32> to vector<8x128xf32>
    %c0_368 = arith.constant 0 : index
    %c32_369 = arith.constant 32 : index
    %c0_370 = arith.constant 0 : index
    %499 = vector.load %arg5[%c0_368, %c32_369, %c0_370] : memref<1x60x128xf32, #tpu.memory_space<vmem>>, vector<1x8x128xf32>
    %500 = vector.shape_cast %499 : vector<1x8x128xf32> to vector<8x128xf32>
    %501 = vector.shape_cast %498 : vector<8x128xf32> to vector<1x8x128xf32>
    tpu.vector_store %arg5[%c0_368, %c32_369, %c0_370], %501 {strides = array<i32>} : memref<1x60x128xf32, #tpu.memory_space<vmem>>, vector<1x8x128xf32>,
    %502 = vector.extract_strided_slice %476 {offsets = [5, 0, 0], sizes = [1, 8, 128], strides = [1, 1, 1]} : vector<8x8x128xf32> to vector<1x8x128xf32>
    %503 = vector.shape_cast %502 : vector<1x8x128xf32> to vector<8x128xf32>
    %c0_371 = arith.constant 0 : index
    %c40_372 = arith.constant 40 : index
    %c0_373 = arith.constant 0 : index
    %504 = vector.load %arg5[%c0_371, %c40_372, %c0_373] : memref<1x60x128xf32, #tpu.memory_space<vmem>>, vector<1x8x128xf32>
    %505 = vector.shape_cast %504 : vector<1x8x128xf32> to vector<8x128xf32>
    %506 = vector.shape_cast %503 : vector<8x128xf32> to vector<1x8x128xf32>
    tpu.vector_store %arg5[%c0_371, %c40_372, %c0_373], %506 {strides = array<i32>} : memref<1x60x128xf32, #tpu.memory_space<vmem>>, vector<1x8x128xf32>,
    %507 = vector.extract_strided_slice %476 {offsets = [6, 0, 0], sizes = [1, 8, 128], strides = [1, 1, 1]} : vector<8x8x128xf32> to vector<1x8x128xf32>
    %508 = vector.shape_cast %507 : vector<1x8x128xf32> to vector<8x128xf32>
    %c0_374 = arith.constant 0 : index
    %c48_375 = arith.constant 48 : index
    %c0_376 = arith.constant 0 : index
    %509 = vector.load %arg5[%c0_374, %c48_375, %c0_376] : memref<1x60x128xf32, #tpu.memory_space<vmem>>, vector<1x8x128xf32>
    %510 = vector.shape_cast %509 : vector<1x8x128xf32> to vector<8x128xf32>
    %511 = vector.shape_cast %508 : vector<8x128xf32> to vector<1x8x128xf32>
    tpu.vector_store %arg5[%c0_374, %c48_375, %c0_376], %511 {strides = array<i32>} : memref<1x60x128xf32, #tpu.memory_space<vmem>>, vector<1x8x128xf32>,
    %512 = vector.extract_strided_slice %476 {offsets = [7, 0, 0], sizes = [1, 4, 128], strides = [1, 1, 1]} : vector<8x8x128xf32> to vector<1x4x128xf32>
    %513 = vector.shape_cast %512 : vector<1x4x128xf32> to vector<4x128xf32>
    %c0_377 = arith.constant 0 : index
    %c56_378 = arith.constant 56 : index
    %c0_379 = arith.constant 0 : index
    %514 = vector.load %arg5[%c0_377, %c56_378, %c0_379] : memref<1x60x128xf32, #tpu.memory_space<vmem>>, vector<1x4x128xf32>
    %515 = vector.shape_cast %514 : vector<1x4x128xf32> to vector<4x128xf32>
    %516 = vector.shape_cast %513 : vector<4x128xf32> to vector<1x4x128xf32>
    tpu.vector_store %arg5[%c0_377, %c56_378, %c0_379], %516 {strides = array<i32>} : memref<1x60x128xf32, #tpu.memory_space<vmem>>, vector<1x4x128xf32>,
    return
  }
  func.func @transform_0(%arg0: i32, %arg1: i32) -> (i32, i32, i32) {
    %c0_i32 = arith.constant 0 : i32
    %c0_i32_0 = arith.constant 0 : i32
    return %arg0, %c0_i32, %arg1 : i32, i32, i32
  }
  func.func @transform_1(%arg0: i32, %arg1: i32) -> (i32, i32) {
    %c0_i32 = arith.constant 0 : i32
    %c0_i32_0 = arith.constant 0 : i32
    return %c0_i32, %arg1 : i32, i32
  }
  func.func @transform_2(%arg0: i32, %arg1: i32) -> (i32, i32) {
    %c0_i32 = arith.constant 0 : i32
    %c0_i32_0 = arith.constant 0 : i32
    return %c0_i32, %arg1 : i32, i32
  }
  func.func @transform_3(%arg0: i32, %arg1: i32) -> (i32, i32, i32) {
    %c0_i32 = arith.constant 0 : i32
    %c0_i32_0 = arith.constant 0 : i32
    return %arg0, %c0_i32, %arg1 : i32, i32, i32
  }
}

</mosaic_0001>

<bundles_post_ra>
// kernel: ppeg_forward.1
= control target key start
LH: loop header
LB: loop body
LE: loop exit
PB: predicated region body
PF: predicated region fallthrough
CT: control target
= control target key end

     0   :  { %s1978_s12 = smov 0   ;;  %s1980_s13 = smov 0   ;;  %s3284_s0 = inlined_call_operand.vmem [shape: f32[2,60,128], index: 0, kind: input, shape index: {}]   ;;  %s3285_s1 = inlined_call_operand.vmem [shape: f32[49,128], index: 1, kind: input, shape index: {}]   ;;  %s3286_s2 = inlined_call_operand.vmem [shape: f32[1,128], index: 2, kind: input, shape index: {}]   ;;  %s3287_s3 = inlined_call_operand.vmem [shape: f32[2,60,128], index: 3, kind: output, shape index: {}]  }
   0x1   :  { %s1982_s14 = smov 0  }
   0x2 LB: > { %s25_s15 = sadd.s32 1, %s1951_s13  ;;  %p1893_p0 = scmp.ge.s32.totalorder %s1955_s14, 1  ;;  %s1955_s14 = sphi %s1982_s14, %s13_s14   ;;  %s1951_s13 = sphi %s1980_s13, %s3597_s13   ;;  %s1947_s12 = sphi %s1978_s12, %s3596_s12  }
   0x3   : > { %p27_p1 = scmp.ge.s32.totalorder %s25_s15, 2  ;;  %p173_p2 = scmp.lt.s32.totalorder %s1955_s14, 3 }
   0x5   : > { %s3599_s15 = smov (%p27_p1, %s25_s15), 0  ;;  %p174_p3 = pnand %p1893_p0, %p173_p2 }
   0x7   : > { %177 = sbr.rel (%p174_p3) target bundleno = 274 (0x112), region = 32 }
   0xc   : > { %v1957_v0 = vmov 0.0   ;;  %v263_v1 = vld [vmem:[%s3285_s1] sm:$0xff]  ;;  %p210_p4 = scmp.lt.s32.totalorder %s1947_s12, 1  ;;  %v264_v26 = vld [vmem:[%s3285_s1 + $0x8] sm:$0xff]  ;;  %v2089_v48 = vld [vmem:[%s3285_s1 + $0x10] sm:$0xff] }
   0xd   : > { %233 = vst [vmem:[#allocation2] sm:$0xff] %v1957_v0  ;;  %v2004_v2 = vperm.slane %v263_v1, 0  ;;  %v2009_v3 = vperm.slane %v263_v1, 1  ;;  %v2011_v4 = vperm.slane %v263_v1, 2  ;;  %v2016_v6 = vperm.slane %v263_v1, 3 }
   0xe   : > { %234 = vst [vmem:[#allocation2 + $0x8] sm:$0x3f] %v1957_v0  ;;  %v2019_v10 = vperm.slane %v263_v1, 4  ;;  %v2046_v25 = vperm.slane %v263_v1, 5  ;;  %s3601_s12 = smov (!%p210_p4, %s1947_s12), 1  ;;  %v2064_v33 = vperm.slane %v263_v1, 6 }
   0xf   : > { %235 = vst [vmem:[#allocation2 + $0x10] sm:$0xff] %v1957_v0  ;;  %v507_v5 = vmul.f32 0.0, %v2004_v2  ;;  %v2066_v34 = vperm.slane %v263_v1, 7  ;;  %v2076_v42 = vperm.slane %v264_v26, 0  ;;  %v2078_v43 = vperm.slane %v264_v26, 1  ;;  %s1900_s20 = sshll.u32 %s3601_s12, 6 }
  0x10   : > { %3391 = vst [vmem:[#allocation4_spill] sm:$0xff] %v2004_v2  ;;  %v2082_v47 = vperm.slane %v264_v26, 2  ;;  %v2096_v53 = vperm.slane %v264_v26, 3  ;;  %v2105_v59 = vperm.slane %v264_v26, 4  ;;  %v2107_v60 = vperm.slane %v264_v26, 5  ;;  %s2118_s25 = scalar_lea.vmem %s3284_s0, %s1900_s20  ;;  %s2834_s11 = scalar_lea.vmem %s3287_s3, %s1900_s20 }
  0x11   : > { %236 = vst [vmem:[#allocation2 + $0x18] sm:$0x3f] %v1957_v0  ;;  %v675_v52 = vmul.f32 0.0, %v2066_v34  ;;  %v2109_v61 = vperm.slane %v264_v26, 6  ;;  %v2111_v62 = vperm.slane %v264_v26, 7  ;;  %v2142_v26 = vld [vmem:[%s2118_s25] sm:$0xff] }
  0x12   : > { %237 = vst [vmem:[#allocation2 + $0x20] sm:$0xff] %v1957_v0 }
  0x13   : > { %238 = vst [vmem:[#allocation2 + $0x28] sm:$0x3f] %v1957_v0 }
  0x14   : > { %3392 = vst [vmem:[#allocation5_spill] sm:$0xff] %v2009_v3 }
  0x15   : > { %3393 = vst [vmem:[#allocation6_spill] sm:$0xff] %v2011_v4  ;;  %v324_v7 = vld [vmem:[#allocation2 + $0x1] sm:$0xff] }
  0x16   : > { %240 = vst [vmem:[#allocation2 + $0xb0] sm:$0xff] %v1957_v0  ;;  %v353_v8 = vld [vmem:[#allocation2 + $0x2] sm:$0xff]  ;;  %v524_v12 = vmul.f32 %v2009_v3, %v324_v7  ;;  %v2124_v7 = vperm.slane %v2089_v48, 0 }
  0x17   : > { %241 = vst [vmem:[#allocation2 + $0xb8] sm:$0x3f] %v1957_v0  ;;  %v382_v9 = vld [vmem:[#allocation2 + $0x3] sm:$0xff]  ;;  %v549_v13 = vmul.f32 %v2011_v4, %v353_v8 }
  0x18   : > { %3394 = vst [vmem:[#allocation7_spill] sm:$0xff] %v2016_v6  ;;  %v411_v11 = vld [vmem:[#allocation2 + $0x4] sm:$0xff]  ;;  %v2026_v14 = vld [vmem:[#allocation2 + $0x11] sm:$0xff]  ;;  %v532_v18 = vadd.f32 %v524_v12, %v507_v5  ;;  %v574_v20 = vmul.f32 %v2016_v6, %v382_v9  ;;  %v2133_v12 = vperm.slane %v2089_v48, 2 }
  0x19   : > { %242 = vst [vmem:[#allocation2 + $0xc0] sm:$0xff] %v1957_v0  ;;  %v2028_v15 = vld [vmem:[#allocation2 + $0x12] sm:$0xff]  ;;  %v525_v17 = vmul.f32 %v2009_v3, %v2026_v14  ;;  %v599_v24 = vmul.f32 %v2019_v10, %v411_v11  ;;  %v440_v31 = vld [vmem:[#allocation2 + $0x5] sm:$0xff]  ;;  %v2130_v11 = vperm.slane %v2089_v48, 1 }
  0x1a   : > { %243 = vst [vmem:[#allocation2 + $0xc8] sm:$0x3f] %v1957_v0  ;;  %v2030_v16 = vld [vmem:[#allocation2 + $0x13] sm:$0xff]  ;;  %v550_v19 = vmul.f32 %v2011_v4, %v2028_v15  ;;  %v2039_v21 = vld [vmem:[#allocation2 + $0x21] sm:$0xff]  ;;  %v557_v29 = vadd.f32 %v549_v13, %v532_v18  ;;  %v624_v46 = vmul.f32 %v2046_v25, %v440_v31 }
  0x1b   : > { %244 = vst [vmem:[#allocation2 + $0xd0] sm:$0xff] %v1957_v0  ;;  %v2041_v22 = vld [vmem:[#allocation2 + $0x22] sm:$0xff]  ;;  %v2043_v23 = vld [vmem:[#allocation2 + $0x14] sm:$0xff]  ;;  %v526_v27 = vmul.f32 %v2009_v3, %v2039_v21  ;;  %v533_v28 = vadd.f32 %v525_v17, %v507_v5  ;;  %v575_v30 = vmul.f32 %v2016_v6, %v2030_v16  ;;  %v702_v31 = vmul.f32 %v2076_v42, %v2039_v21 }
  0x1c   : > { %245 = vst [vmem:[#allocation2 + $0xd8] sm:$0x3f] %v1957_v0  ;;  %v551_v32 = vmul.f32 %v2011_v4, %v2041_v22  ;;  %v2069_v35 = vld [vmem:[#allocation2 + $0x23] sm:$0xff]  ;;  %v582_v38 = vadd.f32 %v574_v20, %v557_v29  ;;  %v600_v39 = vmul.f32 %v2019_v10, %v2043_v23  ;;  %v2074_v40 = vld [vmem:[#allocation2 + $0x15] sm:$0xff]  ;;  %v701_v20 = vmul.f32 %v2076_v42, %v2026_v14 }
  0x1d   : > { %247 = vst [vmem:[#allocation2 + $0x30] sm:$0x7] %v1957_v0  ;;  %v534_v36 = vadd.f32 %v526_v27, %v507_v5  ;;  %v558_v37 = vadd.f32 %v550_v19, %v533_v28  ;;  %v469_v41 = vld [vmem:[#allocation2 + $0x6] sm:$0xff]  ;;  %v2091_v49 = vld [vmem:[#allocation2 + $0x16] sm:$0xff]  ;;  %v576_v51 = vmul.f32 %v2016_v6, %v2069_v35  ;;  %v625_v56 = vmul.f32 %v2046_v25, %v2074_v40 }
  0x1e   : > { %248 = vst [vmem:[#allocation2 + $0x40] sm:$0x7] %v1957_v0  ;;  %v607_v45 = vadd.f32 %v599_v24, %v582_v38  ;;  %v2099_v54 = vld [vmem:[#allocation2 + $0x24] sm:$0xff]  ;;  %v649_v58 = vmul.f32 %v2064_v33, %v469_v41  ;;  %v650_v1 = vmul.f32 %v2064_v33, %v2091_v49  ;;  %v2139_v24 = vperm.slane %v2089_v48, 3 }
  0x1f   : > { %249 = vst [vmem:[#allocation2 + $0x50] sm:$0x7] %v1957_v0  ;;  %v583_v44 = vadd.f32 %v575_v30, %v558_v37  ;;  %v559_v50 = vadd.f32 %v551_v32, %v534_v36  ;;  %v601_v9 = vmul.f32 %v2019_v10, %v2099_v54  ;;  %v442_v13 = vld [vmem:[#allocation2 + $0x25] sm:$0xff]  ;;  %v2146_v27 = vmul.f32 0.0, %v2109_v61 }
  0x20   : > { %3395 = vst [vmem:[#allocation8_spill] sm:$0xff] %v2064_v33  ;;  %v632_v57 = vadd.f32 %v624_v46, %v607_v45  ;;  %v471_v17 = vld [vmem:[#allocation2 + $0x26] sm:$0xff]  ;;  %v2149_v28 = vperm.slane %v2089_v48, 4  ;;  %v2153_v29 = vmul.f32 %v2016_v6, %v2142_v26  ;;  %v2156_v14 = vperm.slane %v2089_v48, 5 }
  0x21   : > { %3396 = vst [vmem:[#allocation9_spill] sm:$0xff] %v2066_v34  ;;  %v608_v55 = vadd.f32 %v600_v39, %v583_v44  ;;  %v584_v8 = vadd.f32 %v576_v51, %v559_v50  ;;  %v727_v36 = vmul.f32 %v2078_v43, %v2028_v15  ;;  %v626_v38 = vmul.f32 %v2046_v25, %v442_v13  ;;  %v2169_v44 = vld [vmem:[%s2118_s25 + $0x8] sm:$0xff]  ;;  %v2177_v51 = vld [vmem:[%s2118_s25 + $0x10] sm:$0xff] }
  0x22   : > { %250 = vst [vmem:[#allocation2 + $0x60] sm:$0x7] %v1957_v0  ;;  %v657_v5 = vadd.f32 %v649_v58, %v632_v57  ;;  %v651_v39 = vmul.f32 %v2064_v33, %v471_v17  ;;  %v728_v41 = vmul.f32 %v2078_v43, %v2041_v22  ;;  %v753_v50 = vmul.f32 %v2082_v47, %v2030_v16 }
  0x23   : > { %251 = vst [vmem:[#allocation2 + $0x70] sm:$0x7] %v1957_v0  ;;  %v633_v63 = vadd.f32 %v625_v56, %v608_v55  ;;  %v609_v37 = vadd.f32 %v601_v9, %v584_v8  ;;  %v754_v15 = vmul.f32 %v2082_v47, %v2069_v35  ;;  %v780_v55 = vmul.f32 %v2096_v53, %v2099_v54 }
  0x24   : > { %3397 = vst [vmem:[#allocation10_spill] sm:$0xff] %v2076_v42  ;;  %v683_v19 = vadd.f32 %v675_v52, %v657_v5  ;;  %v805_v56 = vmul.f32 %v2105_v59, %v2074_v40  ;;  %v831_v58 = vmul.f32 %v2107_v60, %v2091_v49  ;;  %v909_v40 = vmul.f32 %v2124_v7, %v2041_v22  ;;  %v2200_v49 = vld [vmem:[%s3285_s1 + $0x18] sm:$0xff] }
  0x25   : > { %3398 = vst [vmem:[#allocation11_spill] sm:$0xff] %v2078_v43  ;;  %v658_v18 = vadd.f32 %v650_v1, %v633_v63  ;;  %v832_v63 = vmul.f32 %v2107_v60, %v471_v17  ;;  %v883_v1 = vmul.f32 %v2111_v62, %v2039_v21  ;;  %v935_v5 = vmul.f32 %v2130_v11, %v2069_v35 }
  0x26   : > { %252 = vst [vmem:[#allocation2 + $0x80] sm:$0x7] %v1957_v0  ;;  %v709_v32 = vadd.f32 %v701_v20, %v683_v19  ;;  %v2208_v21 = vperm.slane %v2200_v49, 0  ;;  %v2211_v22 = vmul.f32 %v2139_v24, %v442_v13  ;;  %v2214_v35 = vmul.f32 %v2149_v28, %v471_v17 }
  0x27   : > { %3399 = vst [vmem:[#allocation12_spill] sm:$0xff] %v2082_v47  ;;  %v684_v30 = vadd.f32 %v675_v52, %v658_v18  ;;  %v779_v52 = vmul.f32 %v2096_v53, %v2043_v23  ;;  %v634_v23 = vadd.f32 %v626_v38, %v609_v37  ;;  %v2205_v18 = vmul.f32 %v2133_v12, %v2099_v54  ;;  %v2226_v54 = vld [vmem:[%s2118_s25 + $0x20] sm:$0xff] }
  0x28   : > { %253 = vst [vmem:[#allocation2 + $0x90] sm:$0x7] %v1957_v0  ;;  %v735_v46 = vadd.f32 %v727_v36, %v709_v32  ;;  %v755_v19 = vmul.f32 %v2082_v47, %v2142_v26  ;;  %v2220_v20 = vmul.f32 %v2130_v11, %v2142_v26  ;;  %v2229_v36 = vperm.slane %v2089_v48, 6 }
  0x29   : > { %3400 = vst [vmem:[#allocation13_spill] sm:$0xff] %v2096_v53  ;;  %v710_v45 = vadd.f32 %v702_v31, %v684_v30  ;;  %v2223_v30 = vld [vmem:[%s2118_s25 + $0x18] sm:$0xff]  ;;  %v659_v17 = vadd.f32 %v651_v39, %v634_v23  ;;  %v2236_v37 = vperm.slane %v2200_v49, 1  ;;  %v2239_v38 = vperm.slane %v2200_v49, 2 }
  0x2a   : > { %254 = vst [vmem:[#allocation2 + $0xa0] sm:$0x7] %v1957_v0  ;;  %v761_v16 = vadd.f32 %v753_v50, %v735_v46  ;;  %v2251_v39 = vmul.f32 %v2208_v21, %v2142_v26  ;;  %v2271_v23 = vperm.slane %v2200_v49, 6 }
  0x2b   : > { %255 = vst [vmem:[#allocation2 + $0x3b] sm:$0x7] %v1957_v0  ;;  %v736_v57 = vadd.f32 %v728_v41, %v710_v45  ;;  %v2242_v41 = vperm.slane %v2200_v49, 3 }
  0x2c   : > { %3401 = vst [vmem:[#allocation14_spill] sm:$0xff] %v2107_v60  ;;  %v787_v9 = vadd.f32 %v779_v52, %v761_v16  ;;  %v2255_v52 = vmul.f32 %v2016_v6, %v2169_v44 }
  0x2d   : > { %3402 = vst [vmem:[#allocation15_spill] sm:$0xff] %v2109_v61  ;;  %v762_v8 = vadd.f32 %v754_v15, %v736_v57  ;;  %v2262_v57 = vperm.slane %v2200_v49, 4 }
  0x2e   : > { %3403 = vst [vmem:[#allocation16_spill] sm:$0xff] %v2111_v62  ;;  %v813_v32 = vadd.f32 %v805_v56, %v787_v9 }
  0x2f   : > { %256 = vst [vmem:[#allocation2 + $0x4b] sm:$0x7] %v1957_v0  ;;  %v788_v31 = vadd.f32 %v780_v55, %v762_v8 }
  0x30   : > { %3404 = vst [vmem:[#allocation17_spill] sm:$0xff] %v2124_v7  ;;  %v839_v46 = vadd.f32 %v831_v58, %v813_v32  ;;  %v2268_v58 = vperm.slane %v2200_v49, 5 }
  0x31   : > { %257 = vst [vmem:[#allocation2 + $0x5b] sm:$0x7] %v1957_v0 }
  0x32   : > { %3405 = vst [vmem:[#allocation18_spill] sm:$0xff] %v2130_v11  ;;  %v865_v16 = vadd.f32 %v2146_v27, %v839_v46  ;;  %v2281_v46 = vmul.f32 %v2082_v47, %v2169_v44 }
  0x33   : > { %3406 = vst [vmem:[#allocation19_spill] sm:$0xff] %v2133_v12 }
  0x34   : > { %258 = vst [vmem:[#allocation2 + $0x6b] sm:$0x7] %v1957_v0  ;;  %v891_v27 = vadd.f32 %v883_v1, %v865_v16 }
  0x35   : > { %3407 = vst [vmem:[#allocation20_spill] sm:$0xff] %v2139_v24 }
  0x36   : > { %259 = vst [vmem:[#allocation2 + $0x7b] sm:$0x7] %v1957_v0 }
  0x37   : > { %3408 = vst [vmem:[#allocation21_spill] sm:$0xff] %v2149_v28 }
  0x38   : > { %3409 = vst [vmem:[#allocation22_spill] sm:$0xff] %v2156_v14 }
  0x39   : > { %260 = vst [vmem:[#allocation2 + $0x8b] sm:$0x7] %v1957_v0 }
  0x3a   : > { %261 = vst [vmem:[#allocation2 + $0x9b] sm:$0x7] %v1957_v0 }
  0x3b   : > { %3410 = vst [vmem:[#allocation23_spill] sm:$0xff] %v2169_v44 }
  0x3c   : > { %262 = vst [vmem:[#allocation2 + $0xab] sm:$0x7] %v1957_v0  ;;  %v806_v0 = vmul.f32 %v2105_v59, %v442_v13  ;;  %v2232_v13 = vperm.slane %v2089_v48, 7 }
  0x3d   : > { %3411 = vst [vmem:[#allocation24_spill] sm:$0xff] %v2177_v51 }
  0x3e   : > { %272 = vst [vmem:[#allocation2 + $0x33] sm:$0xff] %v2142_v26  ;;  %v814_v45 = vadd.f32 %v806_v0, %v788_v31 }
  0x3f   : > { %275 = vst [vmem:[#allocation2 + $0x43] sm:$0xff] %v2169_v44 }
  0x40   : > { %3412 = vst [vmem:[#allocation25_spill] sm:$0xff] %v2200_v49  ;;  %v840_v8 = vadd.f32 %v832_v63, %v814_v45  ;;  %v2289_v63 = vmul.f32 %v2208_v21, %v2169_v44 }
  0x41   : > { %278 = vst [vmem:[#allocation2 + $0x53] sm:$0xff] %v2177_v51 }
  0x42   : > { %3413 = vst [vmem:[#allocation26_spill] sm:$0xff] %v2208_v21  ;;  %v2302_v21 = vmul.f32 %v2016_v6, %v2177_v51 }
  0x43   : > { %3414 = vst [vmem:[#allocation27_spill] sm:$0xff] %v2223_v30 }
  0x44   : > { %3415 = vst [vmem:[#allocation28_spill] sm:$0xff] %v2226_v54 }
  0x45   : > { %3416 = vst [vmem:[#allocation29_spill] sm:$0xff] %v2229_v36  ;;  %v299_v50 = vld [vmem:[#allocation2 + $0x30] sm:$0xff] }
  0x46   : > { %3417 = vst [vmem:[#allocation30_spill] sm:$0xff] %v2232_v13  ;;  %v2245_v15 = vld [vmem:[#allocation2 + $0x31] sm:$0xff]  ;;  %v510_v55 = vmul.f32 %v2004_v2, %v299_v50  ;;  %v677_v0 = vmul.f32 %v2066_v34, %v299_v50  ;;  %v858_v1 = vmul.f32 %v2109_v61, %v299_v50 }
  0x47   : > { %281 = vst [vmem:[#allocation2 + $0x63] sm:$0xff] %v2223_v30  ;;  %v2247_v48 = vld [vmem:[#allocation2 + $0x32] sm:$0xff]  ;;  %v527_v56 = vmul.f32 %v2009_v3, %v2245_v15  ;;  %v703_v30 = vmul.f32 %v2076_v42, %v2245_v15 }
  0x48   : > { %3418 = vst [vmem:[#allocation31_spill] sm:$0xff] %v2236_v37  ;;  %v552_v26 = vmul.f32 %v2011_v4, %v2247_v48  ;;  %v2273_v9 = vld [vmem:[#allocation2 + $0x34] sm:$0xff] }
  0x49   : > { %3419 = vst [vmem:[#allocation32_spill] sm:$0xff] %v2239_v38  ;;  %v2275_v31 = vld [vmem:[#allocation2 + $0x35] sm:$0xff]  ;;  %v535_v32 = vadd.f32 %v527_v56, %v510_v55  ;;  %v729_v56 = vmul.f32 %v2078_v43, %v2247_v48  ;;  %v602_v16 = vmul.f32 %v2019_v10, %v2273_v9 }
  0x4a   : > { %284 = vst [vmem:[#allocation2 + $0x73] sm:$0xff] %v2226_v54  ;;  %v685_v54 = vadd.f32 %v677_v0, %v659_v17  ;;  %v2291_v45 = vld [vmem:[#allocation2 + $0x36] sm:$0xff]  ;;  %v917_v0 = vadd.f32 %v909_v40, %v891_v27  ;;  %v781_v27 = vmul.f32 %v2096_v53, %v2273_v9 }
  0x4b   : > { %3420 = vst [vmem:[#allocation33_spill] sm:$0xff] %v2262_v57  ;;  %v560_v55 = vadd.f32 %v552_v26, %v535_v32  ;;  %v884_v32 = vmul.f32 %v2111_v62, %v2245_v15  ;;  %v652_v40 = vmul.f32 %v2064_v33, %v2291_v45 }
  0x4c   : > { %3421 = vst [vmem:[#allocation34_spill] sm:$0xff] %v2268_v58  ;;  %v2285_v58 = vmul.f32 %v2130_v11, %v2169_v44  ;;  %v711_v17 = vadd.f32 %v703_v30, %v685_v54  ;;  %v627_v11 = vmul.f32 %v2046_v25, %v2275_v31  ;;  %v866_v54 = vadd.f32 %v858_v1, %v840_v8 }
  0x4d   : > { %3422 = vst [vmem:[#allocation35_spill] sm:$0xff] %v2271_v23  ;;  %v585_v26 = vadd.f32 %v2153_v29, %v560_v55  ;;  %v943_v47 = vadd.f32 %v935_v5, %v917_v0  ;;  %v807_v44 = vmul.f32 %v2105_v59, %v2275_v31  ;;  %v2313_v23 = vld [vmem:[#allocation2 + $0x40] sm:$0xff]  ;;  %v910_v8 = vmul.f32 %v2124_v7, %v2247_v48  ;;  %v2320_v5 = vld [vmem:[%s2118_s25 + $0x28] sm:$0xff] }
  0x4e   : > { %3423 = vst [vmem:[#allocation36_spill] sm:$0xff] %v2302_v21  ;;  %v737_v30 = vadd.f32 %v729_v56, %v711_v17  ;;  %v892_v29 = vadd.f32 %v884_v32, %v866_v54  ;;  %v2317_v55 = vld [vmem:[#allocation2 + $0x41] sm:$0xff]  ;;  %v833_v56 = vmul.f32 %v2107_v60, %v2291_v45  ;;  %v962_v1 = vmul.f32 %v2133_v12, %v2273_v9 }
  0x4f   : > { %v610_v6 = vadd.f32 %v602_v16, %v585_v26  ;;  %3424 = vst [vmem:[#allocation37_spill] sm:$0xff] %v2320_v5  ;;  %v969_v17 = vadd.f32 %v2205_v18, %v943_v47  ;;  %v511_v47 = vmul.f32 %v2004_v2, %v2313_v23  ;;  %v1014_v54 = vmul.f32 %v2149_v28, %v2291_v45 }
  0x50   : > { %v763_v21 = vadd.f32 %v755_v19, %v737_v30  ;;  %v988_v19 = vmul.f32 %v2139_v24, %v2275_v31  ;;  %287 = vst [vmem:[#allocation2 + $0x83] sm:$0xff] %v2320_v5  ;;  %v918_v26 = vadd.f32 %v910_v8, %v892_v29  ;;  %v2330_v30 = vld [vmem:[#allocation2 + $0x42] sm:$0xff]  ;;  %v1039_v32 = vmul.f32 %v2156_v14, %v299_v50 }
  0x51   : > { %v635_v0 = vadd.f32 %v627_v11, %v610_v6  ;;  %v995_v18 = vadd.f32 %v2211_v22, %v969_v17  ;;  %v528_v51 = vmul.f32 %v2009_v3, %v2317_v55  ;;  %v1065_v11 = vmul.f32 %v2229_v36, %v2245_v15  ;;  %v294_v29 = vld [vmem:[%s2118_s25] sm:$0xf]  ;;  %v2349_v8 = vld [vmem:[#allocation2 + $0x44] sm:$0xff] }
  0x52   : > { %v789_v16 = vadd.f32 %v781_v27, %v763_v21  ;;  %v944_v6 = vadd.f32 %v2220_v20, %v918_v26  ;;  %v2344_v21 = vld [vmem:[%s2118_s25 + $0x30] sm:$0xff]  ;;  %v291_v27 = vld [vmem:[%s2118_s25 + $0x38] sm:$0xf]  ;;  %3426 = vst [vmem:[#allocation39_spill] sm:$0xff] %v2349_v8  ;;  %v553_v50 = vmul.f32 %v2011_v4, %v2330_v30  ;;  %v1091_v15 = vmul.f32 %v2232_v13, %v2247_v48 }
  0x53   : > { %v660_v5 = vadd.f32 %v652_v40, %v635_v0  ;;  %3425 = vst [vmem:[#allocation38_spill] sm:$0xff] %v2344_v21  ;;  %v1021_v22 = vadd.f32 %v2214_v35, %v995_v18  ;;  %v536_v17 = vadd.f32 %v528_v51, %v511_v47  ;;  %v1143_v0 = vmul.f32 %v2236_v37, %v2273_v9 }
  0x54   : > { %v815_v49 = vadd.f32 %v807_v44, %v789_v16  ;;  %v678_v44 = vmul.f32 %v2066_v34, %v2313_v23  ;;  %290 = vst [vmem:[#allocation2 + $0x93] sm:$0xff] %v2344_v21  ;;  %v970_v40 = vadd.f32 %v962_v1, %v944_v6  ;;  %v704_v26 = vmul.f32 %v2076_v42, %v2317_v55  ;;  %v2370_v1 = vld [vmem:[#allocation2 + $0x46] sm:$0xff] }
  0x55   : > { %293 = vst [vmem:[#allocation2 + $0xa3] sm:$0xf] %v291_v27  ;;  %v1047_v35 = vadd.f32 %v1039_v32, %v1021_v22  ;;  %v561_v16 = vadd.f32 %v553_v50, %v536_v17  ;;  %v1169_v18 = vmul.f32 %v2239_v38, %v2275_v31  ;;  %v603_v48 = vmul.f32 %v2019_v10, %v2349_v8 }
  0x56   : > { %v841_v20 = vadd.f32 %v833_v56, %v815_v49  ;;  %v686_v51 = vadd.f32 %v678_v44, %v660_v5  ;;  %295 = vst [vmem:[#allocation2 + $0xa7] sm:$0xf] %v294_v29  ;;  %v996_v47 = vadd.f32 %v988_v19, %v970_v40  ;;  %v2364_v49 = vld [vmem:[#allocation2 + $0x45] sm:$0xff]  ;;  %v859_v9 = vmul.f32 %v2109_v61, %v2313_v23 }
  0x57   : > { %3427 = vst [vmem:[#allocation40_spill] sm:$0xff] %v2364_v49  ;;  %v1073_v56 = vadd.f32 %v1065_v11, %v1047_v35  ;;  %v586_v5 = vadd.f32 %v2255_v52, %v561_v16  ;;  %v730_v19 = vmul.f32 %v2078_v43, %v2330_v30  ;;  %v1195_v31 = vmul.f32 %v2242_v41, %v2291_v45 }
  0x58   : > { %3428 = vst [vmem:[#allocation41_spill] sm:$0xff] %v2370_v1  ;;  %v712_v32 = vadd.f32 %v704_v26, %v686_v51  ;;  %v1022_v6 = vadd.f32 %v1014_v54, %v996_v47  ;;  %v867_v27 = vadd.f32 %v859_v9, %v841_v20  ;;  %v885_v29 = vmul.f32 %v2111_v62, %v2317_v55 }
  0x59   : > { %v1099_v22 = vadd.f32 %v1091_v15, %v1073_v56  ;;  %v611_v17 = vadd.f32 %v603_v48, %v586_v5  ;;  %v628_v11 = vmul.f32 %v2046_v25, %v2364_v49  ;;  %v653_v52 = vmul.f32 %v2064_v33, %v2370_v1  ;;  %v2401_v5 = vld [vmem:[#allocation2 + $0x51] sm:$0xff] }
  0x5a   : > { %v738_v50 = vadd.f32 %v730_v19, %v712_v32  ;;  %v893_v44 = vadd.f32 %v885_v29, %v867_v27  ;;  %v911_v54 = vmul.f32 %v2124_v7, %v2330_v30  ;;  %v1040_v45 = vmul.f32 %v2156_v14, %v2313_v23 }
  0x5b   : > { %v1125_v20 = vadd.f32 %v2251_v39, %v1099_v22  ;;  %v782_v15 = vmul.f32 %v2096_v53, %v2349_v8  ;;  %v808_v35 = vmul.f32 %v2105_v59, %v2364_v49  ;;  %v834_v16 = vmul.f32 %v2107_v60, %v2370_v1 }
  0x5c   : > { %v764_v40 = vadd.f32 %v2281_v46, %v738_v50  ;;  %v919_v51 = vadd.f32 %v911_v54, %v893_v44  ;;  %v1048_v26 = vadd.f32 %v1040_v45, %v1022_v6  ;;  %v1066_v47 = vmul.f32 %v2229_v36, %v2317_v55  ;;  %v2399_v46 = vld [vmem:[#allocation2 + $0x50] sm:$0xff] }
  0x5d   : > { %v1151_v48 = vadd.f32 %v1143_v0, %v1125_v20  ;;  %v636_v9 = vadd.f32 %v628_v11, %v611_v17  ;;  %v963_v39 = vmul.f32 %v2133_v12, %v2349_v8  ;;  %v989_v19 = vmul.f32 %v2139_v24, %v2364_v49  ;;  %v2412_v11 = vld [vmem:[#allocation2 + $0x52] sm:$0xff] }
  0x5e   : > { %v790_v56 = vadd.f32 %v782_v15, %v764_v40  ;;  %v945_v32 = vadd.f32 %v2285_v58, %v919_v51  ;;  %v1074_v27 = vadd.f32 %v1066_v47, %v1048_v26  ;;  %v1092_v6 = vmul.f32 %v2232_v13, %v2330_v30 }
  0x5f   : > { %v1177_v29 = vadd.f32 %v1169_v18, %v1151_v48  ;;  %v1015_v22 = vmul.f32 %v2149_v28, %v2370_v1  ;;  %v1144_v17 = vmul.f32 %v2236_v37, %v2349_v8  ;;  %v512_v58 = vmul.f32 %v2004_v2, %v2399_v46  ;;  %v3440_v8 = vld [vmem:[#allocation26_spill] sm:$0xff] }
  0x60   : > { %v816_v0 = vadd.f32 %v808_v35, %v790_v56  ;;  %v971_v50 = vadd.f32 %v963_v39, %v945_v32  ;;  %v1100_v44 = vadd.f32 %v1092_v6, %v1074_v27  ;;  %v529_v54 = vmul.f32 %v2009_v3, %v2401_v5 }
  0x61   : > { %v1203_v45 = vadd.f32 %v1195_v31, %v1177_v29  ;;  %v661_v20 = vadd.f32 %v653_v52, %v636_v9  ;;  %v1170_v18 = vmul.f32 %v2239_v38, %v2364_v49  ;;  %v1221_v40 = vmul.f32 %v2262_v57, %v2313_v23  ;;  %v3429_v31 = vld [vmem:[#allocation34_spill] sm:$0xff]  ;;  %v3430_v23 = vld [vmem:[#allocation25_spill] sm:$0xff] }
  0x62   : > { %v997_v15 = vadd.f32 %v989_v19, %v971_v50  ;;  %v1126_v35 = vadd.f32 %v2289_v63, %v1100_v44  ;;  %v537_v51 = vadd.f32 %v529_v54, %v512_v58  ;;  %v554_v26 = vmul.f32 %v2011_v4, %v2412_v11  ;;  %v3432_v19 = vld [vmem:[#allocation35_spill] sm:$0xff]  ;;  %v3436_v58 = vld [vmem:[#allocation24_spill] sm:$0xff] }
  0x63   : > { %v842_v47 = vadd.f32 %v834_v16, %v816_v0  ;;  %v1196_v48 = vmul.f32 %v2242_v41, %v2370_v1  ;;  %v1247_v52 = vmul.f32 %v3429_v31, %v2317_v55  ;;  %v679_v9 = vmul.f32 %v2066_v34, %v2399_v46  ;;  %v2438_v16 = vld [vmem:[#allocation2 + $0x54] sm:$0xff] }
  0x64   : > { %v1152_v56 = vadd.f32 %v1144_v17, %v1126_v35  ;;  %v1229_v39 = vadd.f32 %v1221_v40, %v1203_v45  ;;  %v2432_v32 = vperm.slane %v3430_v23, 7  ;;  %v562_v63 = vadd.f32 %v554_v26, %v537_v51  ;;  %3433 = vst [vmem:[#allocation42_spill] sm:$0xff] %v2438_v16  ;;  %v3434_v17 = vld [vmem:[#allocation23_spill] sm:$0xff]  ;;  %v3438_v26 = vld [vmem:[#allocation36_spill] sm:$0xff] }
  0x65   : > { %v2436_v27 = vmul.f32 %v3432_v19, %v2330_v30  ;;  %v687_v6 = vadd.f32 %v679_v9, %v661_v20  ;;  %v705_v29 = vmul.f32 %v2076_v42, %v2401_v5  ;;  %v860_v55 = vmul.f32 %v2109_v61, %v2399_v46  ;;  %v3437_v30 = vld [vmem:[#allocation12_spill] sm:$0xff] }
  0x66   : > { %3431 = vst [vmem:[#allocation25_spill] sm:$0xff] %v2432_v32  ;;  %v1023_v0 = vadd.f32 %v1015_v22, %v997_v15  ;;  %v2446_v50 = vmul.f32 %v2432_v32, %v3434_v17  ;;  %v731_v44 = vmul.f32 %v2078_v43, %v2412_v11  ;;  %v757_v54 = vmul.f32 %v3437_v30, %v3436_v58  ;;  %v2461_v23 = vld [vmem:[#allocation2 + $0x60] sm:$0xff] }
  0x67   : > { %v1178_v45 = vadd.f32 %v1170_v18, %v1152_v56  ;;  %v713_v40 = vadd.f32 %v705_v29, %v687_v6  ;;  %v868_v20 = vadd.f32 %v860_v55, %v842_v47  ;;  %v886_v35 = vmul.f32 %v2111_v62, %v2401_v5  ;;  %v3439_v47 = vld [vmem:[#allocation18_spill] sm:$0xff]  ;;  %v2475_v55 = vld [vmem:[#allocation2 + $0x62] sm:$0xff] }
  0x68   : > { %3435 = vst [vmem:[#allocation23_spill] sm:$0xff] %v2446_v50  ;;  %v2454_v51 = vadd.f32 %v1247_v52, %v1229_v39  ;;  %v587_v22 = vadd.f32 %v3438_v26, %v562_v63  ;;  %v604_v15 = vmul.f32 %v2019_v10, %v2438_v16  ;;  %v1041_v9 = vmul.f32 %v2156_v14, %v2399_v46  ;;  %v2467_v52 = vld [vmem:[#allocation2 + $0x61] sm:$0xff] }
  0x69   : > { %v739_v17 = vadd.f32 %v731_v44, %v713_v40  ;;  %v894_v21 = vadd.f32 %v886_v35, %v868_v20  ;;  %v912_v18 = vmul.f32 %v2124_v7, %v2412_v11  ;;  %v938_v56 = vmul.f32 %v3439_v47, %v3436_v58  ;;  %v2477_v35 = vld [vmem:[#allocation2 + $0x55] sm:$0xff] }
  0x6a   : > { %v783_v39 = vmul.f32 %v2096_v53, %v2438_v16  ;;  %v964_v63 = vmul.f32 %v2133_v12, %v2438_v16  ;;  %v1049_v6 = vadd.f32 %v1041_v9, %v1023_v0  ;;  %v1067_v29 = vmul.f32 %v2229_v36, %v2401_v5 }
  0x6b   : > { %v1204_v44 = vadd.f32 %v1196_v48, %v1178_v45  ;;  %v765_v40 = vadd.f32 %v757_v54, %v739_v17  ;;  %v920_v20 = vadd.f32 %v912_v18, %v894_v21  ;;  %v513_v26 = vmul.f32 %v2004_v2, %v2461_v23  ;;  %v2489_v48 = vld [vmem:[#allocation2 + $0x56] sm:$0xff] }
  0x6c   : > { %v612_v1 = vadd.f32 %v604_v15, %v587_v22  ;;  %v1075_v49 = vadd.f32 %v1067_v29, %v1049_v6  ;;  %v1093_v32 = vmul.f32 %v2232_v13, %v2412_v11  ;;  %v530_v0 = vmul.f32 %v2009_v3, %v2467_v52  ;;  %3441 = vst [vmem:[#allocation24_spill] sm:$0xff] %v2489_v48  ;;  %v2493_v22 = vld [vmem:[#allocation2 + $0x64] sm:$0xff]  ;;  %v3442_v18 = vld [vmem:[#allocation27_spill] sm:$0xff] }
  0x6d   : > { %v946_v9 = vadd.f32 %v938_v56, %v920_v20  ;;  %v1119_v50 = vmul.f32 %v3440_v8, %v3436_v58  ;;  %v1222_v21 = vmul.f32 %v2262_v57, %v2399_v46  ;;  %v555_v54 = vmul.f32 %v2011_v4, %v2475_v55  ;;  %v2495_v15 = vld [vmem:[#allocation2 + $0x65] sm:$0xff]  ;;  %v3443_v6 = vld [vmem:[#allocation7_spill] sm:$0xff] }
  0x6e   : > { %v1101_v45 = vadd.f32 %v1093_v32, %v1075_v49  ;;  %v538_v17 = vadd.f32 %v530_v0, %v513_v26  ;;  %v580_v56 = vmul.f32 %v3443_v6, %v3442_v18  ;;  %v629_v29 = vmul.f32 %v2046_v25, %v2477_v35  ;;  %v2513_v26 = vld [vmem:[#allocation2 + $0x66] sm:$0xff] }
  0x6f   : > { %v791_v20 = vadd.f32 %v783_v39, %v765_v40  ;;  %v1145_v3 = vmul.f32 %v2236_v37, %v2438_v16  ;;  %v2505_v2 = vmul.f32 %v3429_v31, %v2401_v5  ;;  %v2509_v49 = vmul.f32 %v3432_v19, %v2412_v11  ;;  %3447 = vst [vmem:[#allocation43_spill] sm:$0xff] %v2513_v26 }
  0x70   : > { %v2511_v32 = vadd.f32 %v1222_v21, %v1204_v44  ;;  %v563_v0 = vadd.f32 %v555_v54, %v538_v17  ;;  %v637_v6 = vadd.f32 %v629_v29, %v612_v1  ;;  %v654_v39 = vmul.f32 %v2064_v33, %v2489_v48 }
  0x71   : > { %3444 = vst [vmem:[#allocation12_spill] sm:$0xff] %v2505_v2  ;;  %v972_v40 = vadd.f32 %v964_v63, %v946_v9  ;;  %v605_v4 = vmul.f32 %v2019_v10, %v2493_v22  ;;  %v630_v2 = vmul.f32 %v2046_v25, %v2495_v15  ;;  %v809_v16 = vmul.f32 %v2105_v59, %v2477_v35 }
  0x72   : > { %3445 = vst [vmem:[#allocation36_spill] sm:$0xff] %v2509_v49  ;;  %v1127_v49 = vadd.f32 %v1119_v50, %v1101_v45  ;;  %v588_v44 = vadd.f32 %v580_v56, %v563_v0  ;;  %v662_v21 = vadd.f32 %v654_v39, %v637_v6  ;;  %v680_v54 = vmul.f32 %v2066_v34, %v2461_v23 }
  0x73   : > { %3446 = vst [vmem:[#allocation27_spill] sm:$0xff] %v2511_v32  ;;  %v655_v1 = vmul.f32 %v2064_v33, %v2513_v26  ;;  %v706_v63 = vmul.f32 %v2076_v42, %v2467_v52  ;;  %v817_v9 = vadd.f32 %v809_v16, %v791_v20  ;;  %v835_v17 = vmul.f32 %v2107_v60, %v2489_v48 }
  0x74   : > { %v613_v29 = vadd.f32 %v605_v4, %v588_v44  ;;  %v688_v32 = vadd.f32 %v680_v54, %v662_v21  ;;  %v732_v50 = vmul.f32 %v2078_v43, %v2475_v55  ;;  %v758_v45 = vmul.f32 %v3437_v30, %v3442_v18 }
  0x75   : > { %v784_v6 = vmul.f32 %v2096_v53, %v2493_v22  ;;  %v843_v56 = vadd.f32 %v835_v17, %v817_v9  ;;  %v861_v0 = vmul.f32 %v2109_v61, %v2461_v23  ;;  %v990_v16 = vmul.f32 %v2139_v24, %v2477_v35 }
  0x76   : > { %v1153_v20 = vadd.f32 %v1145_v3, %v1127_v49  ;;  %v714_v39 = vadd.f32 %v706_v63, %v688_v32  ;;  %v810_v4 = vmul.f32 %v2105_v59, %v2495_v15  ;;  %v887_v44 = vmul.f32 %v2111_v62, %v2467_v52 }
  0x77   : > { %v638_v21 = vadd.f32 %v630_v2, %v613_v29  ;;  %v869_v54 = vadd.f32 %v861_v0, %v843_v56  ;;  %v998_v33 = vadd.f32 %v990_v16, %v972_v40  ;;  %v1016_v9 = vmul.f32 %v2149_v28, %v2489_v48  ;;  %v267_v16 = vld [vmem:[%s3285_s1 + $0x20] sm:$0xff] }
  0x78   : > { %v740_v17 = vadd.f32 %v732_v50, %v714_v39  ;;  %v836_v53 = vmul.f32 %v2107_v60, %v2513_v26  ;;  %v913_v3 = vmul.f32 %v2124_v7, %v2475_v55  ;;  %v939_v49 = vmul.f32 %v3439_v47, %v3442_v18 }
  0x79   : > { %v895_v32 = vadd.f32 %v887_v44, %v869_v54  ;;  %v965_v63 = vmul.f32 %v2133_v12, %v2493_v22  ;;  %v1024_v2 = vadd.f32 %v1016_v9, %v998_v33  ;;  %v1042_v40 = vmul.f32 %v2156_v14, %v2461_v23 }
  0x7a   : > { %v766_v29 = vadd.f32 %v758_v45, %v740_v17  ;;  %v991_v50 = vmul.f32 %v2139_v24, %v2495_v15  ;;  %v1017_v56 = vmul.f32 %v2149_v28, %v2513_v26  ;;  %v1171_v0 = vmul.f32 %v2239_v38, %v2477_v35 }
  0x7b   : > { %v2566_v39 = vadd.f32 %v655_v1, %v638_v21  ;;  %v921_v33 = vadd.f32 %v913_v3, %v895_v32  ;;  %v1050_v44 = vadd.f32 %v1042_v40, %v1024_v2  ;;  %v1068_v45 = vmul.f32 %v2229_v36, %v2467_v52  ;;  %v3448_v40 = vld [vmem:[#allocation23_spill] sm:$0xff] }
  0x7c   : > { %v792_v54 = vadd.f32 %v784_v6, %v766_v29  ;;  %v1094_v9 = vmul.f32 %v2232_v13, %v2475_v55  ;;  %v1120_v17 = vmul.f32 %v3440_v8, %v3442_v18  ;;  %v1179_v28 = vadd.f32 %v1171_v0, %v1153_v20 }
  0x7d   : > { %v947_v24 = vadd.f32 %v939_v49, %v921_v33  ;;  %v1076_v12 = vadd.f32 %v1068_v45, %v1050_v44  ;;  %v1146_v60 = vmul.f32 %v2236_v37, %v2493_v22  ;;  %v1281_v1 = vadd.f32 %v2436_v27, %v2454_v51  ;;  %v3449_v27 = vld [vmem:[#allocation39_spill] sm:$0xff] }
  0x7e   : > { %v1172_v21 = vmul.f32 %v2239_v38, %v2495_v15  ;;  %v1197_v6 = vmul.f32 %v2242_v41, %v2489_v48  ;;  %v2582_v3 = vperm.slane %v267_v16, 0  ;;  %v2584_v32 = vperm.slane %v267_v16, 1 }
  0x7f   : > { %v818_v2 = vadd.f32 %v810_v4, %v792_v54  ;;  %v973_v20 = vadd.f32 %v965_v63, %v947_v24  ;;  %v1102_v49 = vadd.f32 %v1094_v9, %v1076_v12  ;;  %v1307_v29 = vadd.f32 %v3448_v40, %v1281_v1  ;;  %v3453_v24 = vld [vmem:[#allocation25_spill] sm:$0xff]  ;;  %v3455_v54 = vld [vmem:[#allocation40_spill] sm:$0xff] }
  0x80   : > { %v1198_v0 = vmul.f32 %v2242_v41, %v2513_v26  ;;  %v1205_v33 = vadd.f32 %v1197_v6, %v1179_v28  ;;  %v1325_v51 = vmul.f32 %v2582_v3, %v3449_v27  ;;  %v2591_v44 = vperm.slane %v267_v16, 2  ;;  %v268_v1 = vld [vmem:[%s3285_s1 + $0x28] sm:$0xff] }
  0x81   : > { %v1128_v45 = vadd.f32 %v1120_v17, %v1102_v49  ;;  %v1223_v38 = vmul.f32 %v2262_v57, %v2461_v23  ;;  %v2597_v4 = vmul.f32 %v3429_v31, %v2467_v52  ;;  %v2601_v12 = vmul.f32 %v3432_v19, %v2475_v55 }
  0x82   : > { %3450 = vst [vmem:[#allocation23_spill] sm:$0xff] %v2591_v44  ;;  %v2605_v28 = vmul.f32 %v3453_v24, %v3442_v18  ;;  %v1333_v63 = vadd.f32 %v1325_v51, %v1307_v29  ;;  %v1351_v9 = vmul.f32 %v2584_v32, %v3455_v54  ;;  %v2609_v17 = vperm.slane %v267_v16, 3  ;;  %v3460_v54 = vld [vmem:[#allocation41_spill] sm:$0xff] }
  0x83   : > { %3451 = vst [vmem:[#allocation39_spill] sm:$0xff] %v2597_v4  ;;  %v2614_v6 = vadd.f32 %v836_v53, %v818_v2  ;;  %v999_v49 = vadd.f32 %v991_v50, %v973_v20  ;;  %v1154_v40 = vadd.f32 %v1146_v60, %v1128_v45  ;;  %v2616_v27 = vperm.slane %v267_v16, 4 }
  0x84   : > { %3452 = vst [vmem:[#allocation44_spill] sm:$0xff] %v2601_v12  ;;  %v2618_v12 = vadd.f32 %v1223_v38, %v1205_v33  ;;  %v2622_v29 = vmul.f32 %v2582_v3, %v2493_v22  ;;  %v1359_v51 = vadd.f32 %v1351_v9, %v1333_v63  ;;  %v2628_v19 = vmul.f32 %v2584_v32, %v2495_v15 }
  0x85   : > { %3454 = vst [vmem:[#allocation25_spill] sm:$0xff] %v2605_v28  ;;  %v1377_v28 = vmul.f32 %v2591_v44, %v3460_v54  ;;  %v1180_v4 = vadd.f32 %v1172_v21, %v1154_v40  ;;  %v2630_v53 = vperm.slane %v267_v16, 5  ;;  %v2632_v60 = vperm.slane %v267_v16, 7 }
  0x86   : > { %3456 = vst [vmem:[#allocation40_spill] sm:$0xff] %v2609_v17  ;;  %v1403_v38 = vmul.f32 %v2609_v17, %v2399_v46  ;;  %v2636_v2 = vperm.slane %v268_v1, 0  ;;  %v2638_v20 = vperm.slane %v268_v1, 1  ;;  %v2640_v33 = vadd.f32 %v1017_v56, %v999_v49  ;;  %v2658_v56 = vld [vmem:[#allocation2 + $0x71] sm:$0xff] }
  0x87   : > { %3457 = vst [vmem:[#allocation45_spill] sm:$0xff] %v2616_v27  ;;  %v1385_v50 = vadd.f32 %v1377_v28, %v1359_v51  ;;  %v2644_v21 = vmul.f32 %v2591_v44, %v2513_v26  ;;  %v1429_v45 = vmul.f32 %v2616_v27, %v2401_v5  ;;  %v2648_v63 = vperm.slane %v267_v16, 6  ;;  %v2656_v51 = vld [vmem:[#allocation2 + $0x70] sm:$0xff] }
  0x88   : > { %3458 = vst [vmem:[#allocation46_spill] sm:$0xff] %v2618_v12  ;;  %v2650_v28 = vperm.slane %v268_v1, 2  ;;  %v2652_v40 = vperm.slane %v268_v1, 3  ;;  %v2654_v46 = vperm.slane %v268_v1, 4  ;;  %v2660_v49 = vadd.f32 %v1198_v0, %v1180_v4  ;;  %v3472_v16 = vld [vmem:[#allocation42_spill] sm:$0xff]  ;;  %v3478_v12 = vld [vmem:[#allocation5_spill] sm:$0xff] }
  0x89   : > { %3459 = vst [vmem:[#allocation47_spill] sm:$0xff] %v2622_v29  ;;  %v1411_v9 = vadd.f32 %v1403_v38, %v1385_v50  ;;  %v1455_v54 = vmul.f32 %v2630_v53, %v2412_v11  ;;  %v1481_v5 = vmul.f32 %v2648_v63, %v3436_v58  ;;  %v1507_v50 = vmul.f32 %v2632_v60, %v3472_v16  ;;  %v2677_v0 = vld [vmem:[%s3285_s1 + $0x30] ss:$0 sm:$0xff]  ;;  %v2679_v11 = vld [vmem:[#allocation2 + $0x72] sm:$0xff] }
  0x8a   : > { %3461 = vst [vmem:[#allocation41_spill] sm:$0xff] %v2628_v19  ;;  %v1559_v19 = vmul.f32 %v2638_v20, %v2489_v48  ;;  %v2672_v29 = vperm.slane %v268_v1, 6  ;;  %v2681_v4 = vperm.slane %v268_v1, 5  ;;  %v2695_v27 = vld [vmem:[#allocation2 + $0x74] sm:$0xff]  ;;  %v3480_v48 = vld [vmem:[#allocation28_spill] sm:$0xff] }
  0x8b   : > { %3462 = vst [vmem:[#allocation48_spill] sm:$0xff] %v2630_v53  ;;  %v1437_v38 = vadd.f32 %v1429_v45, %v1411_v9  ;;  %v3477_v45 = vld [vmem:[#allocation4_spill] sm:$0xff]  ;;  %v1637_v53 = vmul.f32 %v2654_v46, %v2475_v55 }
  0x8c   : > { %3463 = vst [vmem:[#allocation49_spill] sm:$0xff] %v2632_v60  ;;  %v514_v9 = vmul.f32 %v3477_v45, %v2656_v51  ;;  %v1585_v60 = vmul.f32 %v2650_v28, %v2461_v23  ;;  %v3479_v45 = vld [vmem:[#allocation6_spill] sm:$0xff] }
  0x8d   : > { %3464 = vst [vmem:[#allocation50_spill] sm:$0xff] %v2636_v2  ;;  %v556_v44 = vmul.f32 %v3479_v45, %v2679_v11  ;;  %v2719_v45 = vld [vmem:[#allocation2 + $0x76] sm:$0xff] }
  0x8e   : > { %3465 = vst [vmem:[#allocation51_spill] sm:$0xff] %v2638_v20  ;;  %v1463_v20 = vadd.f32 %v1455_v54, %v1437_v38  ;;  %v681_v38 = vmul.f32 %v2066_v34, %v2656_v51  ;;  %v862_v34 = vmul.f32 %v2109_v61, %v2656_v51 }
  0x8f   : > { %3466 = vst [vmem:[#allocation52_spill] sm:$0xff] %v2644_v21  ;;  %v1533_v21 = vmul.f32 %v2636_v2, %v2477_v35  ;;  %v531_v2 = vmul.f32 %v3478_v12, %v2658_v56  ;;  %v3481_v12 = vld [vmem:[#allocation7_spill] sm:$0xff] }
  0x90   : > { %3467 = vst [vmem:[#allocation53_spill] sm:$0xff] %v2648_v63  ;;  %v1611_v63 = vmul.f32 %v2652_v40, %v2467_v52  ;;  %v581_v54 = vmul.f32 %v3481_v12, %v3480_v48 }
  0x91   : > { %3468 = vst [vmem:[#allocation54_spill] sm:$0xff] %v2650_v28  ;;  %v539_v17 = vadd.f32 %v531_v2, %v514_v9  ;;  %v1489_v28 = vadd.f32 %v1481_v5, %v1463_v20  ;;  %v2713_v2 = vmul.f32 %v2677_v0, %v2513_v26  ;;  %v689_v20 = vadd.f32 %v681_v38, %v2566_v39 }
  0x92   : > { %3469 = vst [vmem:[#allocation55_spill] sm:$0xff] %v2652_v40  ;;  %v1663_v40 = vmul.f32 %v2681_v4, %v3442_v18  ;;  %v707_v5 = vmul.f32 %v2076_v42, %v2658_v56  ;;  %v759_v39 = vmul.f32 %v3437_v30, %v3480_v48 }
  0x93   : > { %3470 = vst [vmem:[#allocation56_spill] sm:$0xff] %v2654_v46  ;;  %v2709_v46 = vmul.f32 %v2672_v29, %v2493_v22  ;;  %v564_v12 = vadd.f32 %v556_v44, %v539_v17  ;;  %v733_v44 = vmul.f32 %v2078_v43, %v2679_v11 }
  0x94   : > { %3471 = vst [vmem:[#allocation57_spill] sm:$0xff] %v2660_v49  ;;  %v2683_v49 = vperm.slane %v268_v1, 7  ;;  %v2697_v1 = vld [vmem:[#allocation2 + $0x75] sm:$0xff]  ;;  %v715_v26 = vadd.f32 %v707_v5, %v689_v20  ;;  %v1043_v20 = vmul.f32 %v2156_v14, %v2656_v51 }
  0x95   : > { %3473 = vst [vmem:[#allocation42_spill] sm:$0xff] %v2672_v29  ;;  %v606_v29 = vmul.f32 %v2019_v10, %v2695_v27  ;;  %v870_v10 = vadd.f32 %v862_v34, %v2614_v6  ;;  %v811_v6 = vmul.f32 %v2105_v59, %v2697_v1 }
  0x96   : > { %3474 = vst [vmem:[#allocation58_spill] sm:$0xff] %v2677_v0  ;;  %v2717_v9 = vmul.f32 %v2683_v49, %v2495_v15  ;;  %v631_v0 = vmul.f32 %v2046_v25, %v2697_v1  ;;  %v888_v25 = vmul.f32 %v2111_v62, %v2658_v56  ;;  %v741_v42 = vadd.f32 %v733_v44, %v715_v26  ;;  %v3484_v44 = vld [vmem:[#allocation14_spill] sm:$0xff] }
  0x97   : > { %3475 = vst [vmem:[#allocation59_spill] sm:$0xff] %v2681_v4  ;;  %v1515_v4 = vadd.f32 %v1507_v50, %v1489_v28  ;;  %v3482_v28 = vld [vmem:[#allocation8_spill] sm:$0xff]  ;;  %v1051_v26 = vadd.f32 %v1043_v20, %v2640_v33  ;;  %v3485_v33 = vld [vmem:[#allocation19_spill] sm:$0xff] }
  0x98   : > { %3476 = vst [vmem:[#allocation60_spill] sm:$0xff] %v2683_v49  ;;  %v589_v49 = vadd.f32 %v581_v54, %v564_v12  ;;  %v656_v50 = vmul.f32 %v3482_v28, %v2719_v45  ;;  %v3483_v54 = vld [vmem:[#allocation13_spill] sm:$0xff]  ;;  %v896_v43 = vadd.f32 %v888_v25, %v870_v10  ;;  %v767_v34 = vadd.f32 %v759_v39, %v741_v42 }
  0x99   : > { %v1541_v17 = vadd.f32 %v1533_v21, %v1515_v4  ;;  %v785_v12 = vmul.f32 %v3483_v54, %v2695_v27  ;;  %v914_v21 = vmul.f32 %v2124_v7, %v2679_v11  ;;  %v940_v4 = vmul.f32 %v3439_v47, %v3480_v48 }
  0x9a   : > { %v614_v38 = vadd.f32 %v606_v29, %v589_v49  ;;  %v1069_v29 = vmul.f32 %v2229_v36, %v2658_v56  ;;  %v1095_v28 = vmul.f32 %v2232_v13, %v2679_v11  ;;  %v1121_v42 = vmul.f32 %v3440_v8, %v3480_v48  ;;  %v3487_v36 = vld [vmem:[#allocation21_spill] sm:$0xff]  ;;  %v3491_v13 = vld [vmem:[#allocation36_spill] sm:$0xff] }
  0x9b   : > { %v1567_v5 = vadd.f32 %v1559_v19, %v1541_v17  ;;  %v837_v19 = vmul.f32 %v3484_v44, %v2719_v45  ;;  %v922_v17 = vadd.f32 %v914_v21, %v896_v43  ;;  %v793_v25 = vadd.f32 %v785_v12, %v767_v34  ;;  %v3489_v12 = vld [vmem:[#allocation12_spill] sm:$0xff] }
  0x9c   : > { %v639_v10 = vadd.f32 %v631_v0, %v614_v38  ;;  %v1077_v47 = vadd.f32 %v1069_v29, %v1051_v26  ;;  %v966_v20 = vmul.f32 %v3485_v33, %v2695_v27  ;;  %v1018_v43 = vmul.f32 %v3487_v36, %v2719_v45  ;;  %v3488_v38 = vld [vmem:[#allocation27_spill] sm:$0xff] }
  0x9d   : > { %v1593_v49 = vadd.f32 %v1585_v60, %v1567_v5  ;;  %v948_v7 = vadd.f32 %v940_v4, %v922_v17  ;;  %v3486_v60 = vld [vmem:[#allocation20_spill] sm:$0xff]  ;;  %v1147_v0 = vmul.f32 %v2236_v37, %v2695_v27  ;;  %v1256_v34 = vadd.f32 %v3489_v12, %v3488_v38 }
  0x9e   : > { %v992_v5 = vmul.f32 %v3486_v60, %v2697_v1  ;;  %v1103_v21 = vadd.f32 %v1095_v28, %v1077_v47  ;;  %v819_v29 = vadd.f32 %v811_v6, %v793_v25  ;;  %v1300_v4 = vmul.f32 %v3453_v24, %v3436_v58  ;;  %v3490_v60 = vld [vmem:[#allocation32_spill] sm:$0xff] }
  0x9f   : > { %v1619_v39 = vadd.f32 %v1611_v63, %v1593_v49  ;;  %v974_v63 = vadd.f32 %v966_v20, %v948_v7  ;;  %v664_v49 = vadd.f32 %v656_v50, %v639_v10  ;;  %v1173_v8 = vmul.f32 %v3490_v60, %v2697_v1  ;;  %v3494_v10 = vld [vmem:[#allocation35_spill] sm:$0xff] }
  0xa0   : > { %v1129_v17 = vadd.f32 %v1121_v42, %v1103_v21  ;;  %v1282_v36 = vadd.f32 %v3491_v13, %v1256_v34  ;;  %v1199_v37 = vmul.f32 %v2242_v41, %v2719_v45  ;;  %v2781_v58 = vmul.f32 %v3429_v31, %v2658_v56  ;;  %v3500_v21 = vld [vmem:[#allocation24_spill] sm:$0xff] }
  0xa1   : > { %v1645_v26 = vadd.f32 %v1637_v53, %v1619_v39  ;;  %v1000_v28 = vadd.f32 %v992_v5, %v974_v63  ;;  %v2777_v53 = vmul.f32 %v2262_v57, %v2656_v51  ;;  %v1326_v6 = vmul.f32 %v2582_v3, %v3472_v16  ;;  %v2820_v63 = vld [vmem:[#allocation2 + $0x80] sm:$0xff] }
  0xa2   : > { %v1155_v7 = vadd.f32 %v1147_v0, %v1129_v17  ;;  %3493 = vst [vmem:[#allocation5_spill] sm:$0xff] %v2781_v58  ;;  %v1308_v50 = vadd.f32 %v1300_v4, %v1282_v36  ;;  %v2788_v25 = vmul.f32 %v3494_v10, %v2679_v11  ;;  %v2792_v42 = vmul.f32 %v3453_v24, %v3480_v48  ;;  %v3501_v0 = vld [vmem:[#allocation23_spill] sm:$0xff]  ;;  %v3505_v4 = vld [vmem:[#allocation48_spill] sm:$0xff] }
  0xa3   : > { %v1671_v47 = vadd.f32 %v1663_v40, %v1645_v26  ;;  %3492 = vst [vmem:[#allocation4_spill] sm:$0xff] %v2777_v53  ;;  %v845_v40 = vadd.f32 %v837_v19, %v819_v29  ;;  %v2796_v20 = vmul.f32 %v2582_v3, %v2695_v27  ;;  %v1352_v16 = vmul.f32 %v2584_v32, %v2477_v35  ;;  %v2804_v19 = vld [vmem:[%s3286_s2] ss:$0 sm:$0xff]  ;;  %v3504_v26 = vld [vmem:[#allocation45_spill] sm:$0xff]  ;;  %v3521_v53 = vld [vmem:[#allocation10_spill] sm:$0xff] }
  0xa4   : > { %3495 = vst [vmem:[#allocation6_spill] sm:$0xff] %v2788_v25  ;;  %v1181_v39 = vadd.f32 %v1173_v8, %v1155_v7  ;;  %v1334_v36 = vadd.f32 %v1326_v6, %v1308_v50  ;;  %v1026_v5 = vadd.f32 %v1018_v43, %v1000_v28  ;;  %v2808_v8 = vmul.f32 %v2584_v32, %v2697_v1  ;;  %v3503_v35 = vld [vmem:[#allocation40_spill] sm:$0xff]  ;;  %v3507_v7 = vld [vmem:[#allocation49_spill] sm:$0xff] }
  0xa5   : > { %v1697_v13 = vadd.f32 %v2709_v46, %v1671_v47  ;;  %3496 = vst [vmem:[#allocation28_spill] sm:$0xff] %v2792_v42  ;;  %v1378_v38 = vmul.f32 %v3501_v0, %v3500_v21  ;;  %v2814_v34 = vmul.f32 %v3501_v0, %v2719_v45  ;;  %v1430_v29 = vmul.f32 %v3504_v26, %v2467_v52  ;;  %v3506_v47 = vld [vmem:[#allocation53_spill] sm:$0xff]  ;;  %v3512_v21 = vld [vmem:[#allocation55_spill] sm:$0xff]  ;;  %v3519_v58 = vld [vmem:[#allocation60_spill] sm:$0xff] }
  0xa6   : > { %3497 = vst [vmem:[#allocation7_spill] sm:$0xff] %v2796_v20  ;;  %v1360_v12 = vadd.f32 %v1352_v16, %v1334_v36  ;;  %v1456_v17 = vmul.f32 %v3505_v4, %v2475_v55  ;;  %v1482_v28 = vmul.f32 %v3506_v47, %v3442_v18  ;;  %v1508_v50 = vmul.f32 %v3507_v7, %v2493_v22  ;;  %v3510_v55 = vld [vmem:[#allocation51_spill] sm:$0xff]  ;;  %v2840_v16 = vld [vmem:[#allocation2 + $0x81] sm:$0xff]  ;;  %v3511_v22 = vld [vmem:[#allocation54_spill] sm:$0xff] }
  0xa7   : > { %v1723_v46 = vadd.f32 %v2717_v9, %v1697_v13  ;;  %3498 = vst [vmem:[#allocation8_spill] sm:$0xff] %v2804_v19  ;;  %v1404_v9 = vmul.f32 %v3503_v35, %v2461_v23  ;;  %v1207_v23 = vadd.f32 %v1199_v37, %v1181_v39  ;;  %v3509_v13 = vld [vmem:[#allocation43_spill] sm:$0xff]  ;;  %v2851_v37 = vld [vmem:[#allocation2 + $0x82] sm:$0xff]  ;;  %v3517_v20 = vld [vmem:[#allocation42_spill] sm:$0xff] }
  0xa8   : > { %3499 = vst [vmem:[#allocation13_spill] sm:$0xff] %v2808_v8  ;;  %v1386_v52 = vadd.f32 %v1378_v38, %v1360_v12  ;;  %v1560_v36 = vmul.f32 %v3510_v55, %v3509_v13  ;;  %v3513_v39 = vld [vmem:[#allocation9_spill] sm:$0xff]  ;;  %v3514_v12 = vld [vmem:[#allocation56_spill] sm:$0xff]  ;;  %v2865_v42 = vmul.f32 %v3517_v20, %v2695_v27 }
  0xa9   : > { %3502 = vst [vmem:[#allocation14_spill] sm:$0xff] %v2814_v34  ;;  %v1749_v43 = vadd.f32 %v2713_v2, %v1723_v46  ;;  %v3508_v2 = vld [vmem:[#allocation50_spill] sm:$0xff]  ;;  %v2845_v46 = vmul.f32 %v3511_v22, %v2656_v51  ;;  %v2849_v34 = vmul.f32 %v3512_v21, %v2658_v56  ;;  %v2857_v13 = vmul.f32 %v3514_v12, %v2679_v11  ;;  %v2867_v25 = vld [vmem:[#allocation2 + $0x84] sm:$0xff] }
  0xaa   : > { %v1534_v6 = vmul.f32 %v3508_v2, %v2495_v15  ;;  %v682_v15 = vmul.f32 %v3513_v39, %v2820_v63  ;;  %v1412_v38 = vadd.f32 %v1404_v9, %v1386_v52  ;;  %3518 = vst [vmem:[#allocation12_spill] sm:$0xff] %v2865_v42  ;;  %v2874_v9 = vld [vmem:[#allocation2 + $0x85] sm:$0xff]  ;;  %v3522_v42 = vld [vmem:[#allocation58_spill] sm:$0xff] }
  0xab   : > { %v1760_v18 = vadd.f32 %v2804_v19, %v1749_v43  ;;  %v3515_v43 = vld [vmem:[#allocation59_spill] sm:$0xff]  ;;  %v2872_v19 = vmul.f32 %v3519_v58, %v2697_v1  ;;  %v2876_v52 = vld [vmem:[#allocation2 + $0x86] sm:$0xff]  ;;  %v2884_v12 = vmul.f32 %v3522_v42, %v2719_v45 }
  0xac   : > { %v2861_v8 = vmul.f32 %v3515_v43, %v3480_v48  ;;  %v690_v39 = vadd.f32 %v682_v15, %v664_v49  ;;  %v708_v48 = vmul.f32 %v3521_v53, %v2840_v16  ;;  %v863_v43 = vmul.f32 %v2109_v61, %v2820_v63 }
  0xad   : > { %1768 = vst [vmem:[%s2834_s11] sm:$0xff] %v1760_v18  ;;  %v1438_v20 = vadd.f32 %v1430_v29, %v1412_v38  ;;  %v3524_v18 = vld [vmem:[#allocation11_spill] sm:$0xff]  ;;  %v786_v49 = vmul.f32 %v3483_v54, %v2867_v25  ;;  %v889_v53 = vmul.f32 %v2111_v62, %v2840_v16  ;;  %v812_v29 = vmul.f32 %v2105_v59, %v2874_v9  ;;  %v3527_v54 = vld [vmem:[#allocation18_spill] sm:$0xff]  ;;  %v3528_v59 = vld [vmem:[#allocation29_spill] sm:$0xff] }
  0xae   : > { %3516 = vst [vmem:[#allocation27_spill] sm:$0xff] %v2861_v8  ;;  %v734_v58 = vmul.f32 %v3524_v18, %v2851_v37  ;;  %v716_v22 = vadd.f32 %v708_v48, %v690_v39  ;;  %v871_v15 = vadd.f32 %v863_v43, %v845_v40  ;;  %v838_v38 = vmul.f32 %v3484_v44, %v2876_v52  ;;  %v3526_v39 = vld [vmem:[#allocation17_spill] sm:$0xff] }
  0xaf   : > { %3520 = vst [vmem:[#allocation32_spill] sm:$0xff] %v2872_v19  ;;  %v3525_v19 = vld [vmem:[#allocation37_spill] sm:$0xff]  ;;  %v1464_v61 = vadd.f32 %v1456_v17, %v1438_v20  ;;  %v1044_v18 = vmul.f32 %v2156_v14, %v2820_v63  ;;  %v915_v48 = vmul.f32 %v3526_v39, %v2851_v37  ;;  %v967_v20 = vmul.f32 %v3485_v33, %v2867_v25  ;;  %v3529_v14 = vld [vmem:[#allocation30_spill] sm:$0xff]  ;;  %v3532_v39 = vld [vmem:[#allocation39_spill] sm:$0xff] }
  0xb0   : > { %3523 = vst [vmem:[#allocation36_spill] sm:$0xff] %v2884_v12  ;;  %v760_v21 = vmul.f32 %v3437_v30, %v3525_v19  ;;  %v742_v12 = vadd.f32 %v734_v58, %v716_v22  ;;  %v897_v30 = vadd.f32 %v889_v53, %v871_v15  ;;  %v941_v40 = vmul.f32 %v3527_v54, %v3525_v19  ;;  %v3530_v54 = vld [vmem:[#allocation26_spill] sm:$0xff] }
  0xb1   : > { %v1490_v43 = vadd.f32 %v1482_v28, %v1464_v61  ;;  %v1052_v17 = vadd.f32 %v1044_v18, %v1026_v5  ;;  %v1070_v42 = vmul.f32 %v3528_v59, %v2840_v16  ;;  %v1096_v58 = vmul.f32 %v3529_v14, %v2851_v37  ;;  %v3531_v28 = vld [vmem:[#allocation46_spill] sm:$0xff] }
  0xb2   : > { %v768_v44 = vadd.f32 %v760_v21, %v742_v12  ;;  %v923_v62 = vadd.f32 %v915_v48, %v897_v30  ;;  %v1225_v22 = vmul.f32 %v2262_v57, %v2820_v63  ;;  %v1122_v61 = vmul.f32 %v3530_v54, %v3525_v19  ;;  %v3533_v30 = vld [vmem:[#allocation20_spill] sm:$0xff] }
  0xb3   : > { %v1516_v15 = vadd.f32 %v1508_v50, %v1490_v43  ;;  %v1078_v53 = vadd.f32 %v1070_v42, %v1052_v17  ;;  %v1257_v33 = vadd.f32 %v3532_v39, %v3531_v28  ;;  %v1251_v21 = vmul.f32 %v3429_v31, %v2840_v16  ;;  %v3534_v57 = vld [vmem:[#allocation44_spill] sm:$0xff]  ;;  %v3535_v39 = vld [vmem:[#allocation31_spill] sm:$0xff] }
  0xb4   : > { %v794_v5 = vadd.f32 %v786_v49, %v768_v44  ;;  %v949_v18 = vadd.f32 %v941_v40, %v923_v62  ;;  %v1233_v8 = vadd.f32 %v1225_v22, %v1207_v23  ;;  %v993_v48 = vmul.f32 %v3533_v30, %v2874_v9  ;;  %v3538_v28 = vld [vmem:[#allocation47_spill] sm:$0xff] }
  0xb5   : > { %v1542_v12 = vadd.f32 %v1534_v6, %v1516_v15  ;;  %v1104_v14 = vadd.f32 %v1096_v58, %v1078_v53  ;;  %v1283_v50 = vadd.f32 %v3534_v57, %v1257_v33  ;;  %v1277_v17 = vmul.f32 %v3494_v10, %v2851_v37  ;;  %v3536_v6 = vld [vmem:[#allocation25_spill] sm:$0xff] }
  0xb6   : > { %v975_v42 = vadd.f32 %v967_v20, %v949_v18  ;;  %v1259_v43 = vadd.f32 %v1251_v21, %v1233_v8  ;;  %v1303_v49 = vmul.f32 %v3453_v24, %v3525_v19  ;;  %v1148_v40 = vmul.f32 %v3535_v39, %v2867_v25  ;;  %v3537_v58 = vld [vmem:[#allocation21_spill] sm:$0xff] }
  0xb7   : > { %v1568_v62 = vadd.f32 %v1560_v36, %v1542_v12  ;;  %v1130_v23 = vadd.f32 %v1122_v61, %v1104_v14  ;;  %v1309_v44 = vadd.f32 %v3536_v6, %v1283_v50  ;;  %v820_v22 = vadd.f32 %v812_v29, %v794_v5  ;;  %v3539_v12 = vld [vmem:[#allocation41_spill] sm:$0xff]  ;;  %v2954_v6 = vld [vmem:[#allocation2 + $0x90] sm:$0xff] }
  0xb8   : > { %v1019_v15 = vmul.f32 %v3537_v58, %v2876_v52  ;;  %v1174_v57 = vmul.f32 %v3490_v60, %v2874_v9  ;;  %v1285_v33 = vadd.f32 %v1277_v17, %v1259_v43  ;;  %v1001_v20 = vadd.f32 %v993_v48, %v975_v42 }
  0xb9   : > { %v1594_v8 = vadd.f32 %v2845_v46, %v1568_v62  ;;  %v1156_v53 = vadd.f32 %v1148_v40, %v1130_v23  ;;  %v1335_v36 = vadd.f32 %v3538_v28, %v1309_v44  ;;  %v1200_v14 = vmul.f32 %v2242_v41, %v2876_v52  ;;  %v3540_v23 = vld [vmem:[#allocation52_spill] sm:$0xff]  ;;  %v1929_v44 = vld [vmem:[#allocation2 + $0x73] sm:$0xff] }
  0xba   : > { %v1311_v61 = vadd.f32 %v1303_v49, %v1285_v33  ;;  %v1329_v29 = vmul.f32 %v2582_v3, %v2867_v25  ;;  %v1355_v5 = vmul.f32 %v2584_v32, %v2874_v9  ;;  %v2944_v46 = vmul.f32 %v3501_v0, %v2876_v52  ;;  %v3543_v28 = vld [vmem:[#allocation55_spill] sm:$0xff] }
  0xbb   : > { %v1620_v18 = vadd.f32 %v2849_v34, %v1594_v8  ;;  %v1182_v21 = vadd.f32 %v1174_v57, %v1156_v53  ;;  %v1361_v50 = vadd.f32 %v3539_v12, %v1335_v36  ;;  %v846_v48 = vadd.f32 %v838_v38, %v820_v22  ;;  %v3547_v12 = vld [vmem:[#allocation59_spill] sm:$0xff] }
  0xbc   : > { %v1337_v42 = vadd.f32 %v1329_v29, %v1311_v61  ;;  %v1405_v43 = vmul.f32 %v3503_v35, %v2656_v51  ;;  %v1431_v17 = vmul.f32 %v3504_v26, %v2658_v56  ;;  %v1027_v62 = vadd.f32 %v1019_v15, %v1001_v20  ;;  %v2966_v20 = vld [vmem:[#allocation2 + $0x91] sm:$0xff]  ;;  %v3546_v29 = vld [vmem:[#allocation12_spill] sm:$0xff] }
  0xbd   : > { %v1646_v49 = vadd.f32 %v2857_v13, %v1620_v18  ;;  %v1387_v34 = vadd.f32 %v3540_v23, %v1361_v50  ;;  %v1457_v40 = vmul.f32 %v3505_v4, %v2679_v11  ;;  %v1483_v38 = vmul.f32 %v1929_v44, %v3506_v47  ;;  %v3541_v13 = vld [vmem:[#allocation27_spill] sm:$0xff]  ;;  %v3542_v11 = vld [vmem:[#allocation54_spill] sm:$0xff] }
  0xbe   : > { %v1509_v22 = vmul.f32 %v3507_v7, %v2695_v27  ;;  %v1535_v51 = vmul.f32 %v3508_v2, %v2697_v1  ;;  %v1561_v56 = vmul.f32 %v3510_v55, %v2719_v45  ;;  %v1208_v57 = vadd.f32 %v1200_v14, %v1182_v21  ;;  %v3544_v27 = vld [vmem:[#allocation56_spill] sm:$0xff]  ;;  %v2976_v61 = vld [vmem:[#allocation2 + $0x92] sm:$0xff] }
  0xbf   : > { %v1672_v15 = vadd.f32 %v3541_v13, %v1646_v49  ;;  %v1413_v33 = vadd.f32 %v1405_v43, %v1387_v34  ;;  %v1587_v8 = vmul.f32 %v3542_v11, %v2820_v63  ;;  %v1363_v53 = vadd.f32 %v1355_v5, %v1337_v42  ;;  %v3545_v45 = vld [vmem:[#allocation15_spill] sm:$0xff]  ;;  %v3548_v5 = vld [vmem:[#allocation42_spill] sm:$0xff]  ;;  %v3550_v43 = vld [vmem:[#allocation60_spill] sm:$0xff] }
  0xc0   : > { %v2970_v36 = vmul.f32 %v3543_v28, %v2840_v16  ;;  %v2974_v1 = vmul.f32 %v3544_v27, %v2851_v37  ;;  %v864_v14 = vmul.f32 %v3545_v45, %v2954_v6  ;;  %v2983_v50 = vmul.f32 %v3547_v12, %v3525_v19  ;;  %v3552_v34 = vld [vmem:[#allocation16_spill] sm:$0xff]  ;;  %v3553_v13 = vld [vmem:[#allocation22_spill] sm:$0xff] }
  0xc1   : > { %v1698_v18 = vadd.f32 %v3546_v29, %v1672_v15  ;;  %v1439_v21 = vadd.f32 %v1431_v17, %v1413_v33  ;;  %v2987_v42 = vmul.f32 %v3548_v5, %v2867_v25  ;;  %v2991_v49 = vmul.f32 %v3550_v43, %v2874_v9  ;;  %v3554_v17 = vld [vmem:[#allocation32_spill] sm:$0xff]  ;;  %v3555_v19 = vld [vmem:[#allocation58_spill] sm:$0xff]  ;;  %v3557_v5 = vld [vmem:[#allocation17_spill] sm:$0xff] }
  0xc2   : > { %v872_v23 = vadd.f32 %v864_v14, %v846_v48  ;;  %v890_v44 = vmul.f32 %v3552_v34, %v2966_v20  ;;  %v1045_v15 = vmul.f32 %v3553_v13, %v2954_v6  ;;  %v3000_v29 = vmul.f32 %v3555_v19, %v2876_v52  ;;  %v3004_v27 = vld [vmem:[#allocation2 + $0x94] sm:$0xff]  ;;  %v3560_v13 = vld [vmem:[#allocation36_spill] sm:$0xff] }
  0xc3   : > { %3549 = vst [vmem:[#allocation35_spill] sm:$0xff] %v2987_v42  ;;  %v1724_v33 = vadd.f32 %v3554_v17, %v1698_v18  ;;  %v1465_v45 = vadd.f32 %v1457_v40, %v1439_v21  ;;  %v916_v12 = vmul.f32 %v3557_v5, %v2976_v61  ;;  %v3558_v48 = vld [vmem:[#allocation38_spill] sm:$0xff]  ;;  %v1071_v28 = vmul.f32 %v3528_v59, %v2966_v20  ;;  %v3565_v11 = vld [vmem:[#allocation8_spill] sm:$0xff] }
  0xc4   : > { %3551 = vst [vmem:[#allocation24_spill] sm:$0xff] %v2991_v49  ;;  %v898_v43 = vadd.f32 %v890_v44, %v872_v23  ;;  %v3559_v14 = vld [vmem:[#allocation18_spill] sm:$0xff]  ;;  %v1053_v34 = vadd.f32 %v1045_v15, %v1027_v62  ;;  %v1123_v5 = vmul.f32 %v3530_v54, %v3558_v48  ;;  %v3562_v23 = vld [vmem:[#allocation33_spill] sm:$0xff]  ;;  %v3564_v62 = vld [vmem:[#allocation4_spill] sm:$0xff] }
  0xc5   : > { %3556 = vst [vmem:[#allocation23_spill] sm:$0xff] %v3000_v29  ;;  %v942_v49 = vmul.f32 %v3559_v14, %v3558_v48  ;;  %v1750_v18 = vadd.f32 %v3560_v13, %v1724_v33  ;;  %v1491_v40 = vadd.f32 %v1483_v38, %v1465_v45  ;;  %v3561_v21 = vld [vmem:[#allocation30_spill] sm:$0xff]  ;;  %v1226_v44 = vmul.f32 %v3562_v23, %v2954_v6  ;;  %v3563_v14 = vld [vmem:[#allocation57_spill] sm:$0xff]  ;;  %v3566_v38 = vld [vmem:[#allocation19_spill] sm:$0xff] }
  0xc6   : > { %v1097_v17 = vmul.f32 %v3561_v21, %v2976_v61  ;;  %v924_v19 = vadd.f32 %v916_v12, %v898_v43  ;;  %v1079_v29 = vadd.f32 %v1071_v28, %v1053_v34  ;;  %v1232_v15 = vadd.f32 %v3564_v62, %v3563_v14  ;;  %v3024_v45 = vld [vmem:[#allocation2 + $0x95] sm:$0xff]  ;;  %v3567_v34 = vld [vmem:[#allocation5_spill] sm:$0xff] }
  0xc7   : > { %v1761_v59 = vadd.f32 %v3565_v11, %v1750_v18  ;;  %v1517_v42 = vadd.f32 %v1509_v22, %v1491_v40  ;;  %v968_v13 = vmul.f32 %v3566_v38, %v3004_v27  ;;  %v1252_v33 = vmul.f32 %v3429_v31, %v2966_v20  ;;  %v3026_v54 = vld [vmem:[#allocation2 + $0x96] sm:$0xff] }
  0xc8   : > { %v950_v28 = vadd.f32 %v942_v49, %v924_v19  ;;  %v1105_v12 = vadd.f32 %v1097_v17, %v1079_v29  ;;  %v1234_v43 = vadd.f32 %v1226_v44, %v1208_v57  ;;  %v1258_v21 = vadd.f32 %v3567_v34, %v1232_v15  ;;  %v3568_v31 = vld [vmem:[#allocation6_spill] sm:$0xff]  ;;  %v3569_v17 = vld [vmem:[#allocation28_spill] sm:$0xff] }
  0xc9   : > { %1769 = vst [vmem:[%s2834_s11 + $0x8] sm:$0xff] %v1761_v59  ;;  %v1543_v14 = vadd.f32 %v1535_v51, %v1517_v42  ;;  %v1149_v22 = vmul.f32 %v3535_v39, %v3004_v27  ;;  %v1278_v18 = vmul.f32 %v3494_v10, %v2976_v61  ;;  %v1304_v40 = vmul.f32 %v3453_v24, %v3558_v48 }
  0xca   : > { %v976_v62 = vadd.f32 %v968_v13, %v950_v28  ;;  %v1131_v38 = vadd.f32 %v1123_v5, %v1105_v12  ;;  %v1260_v11 = vadd.f32 %v1252_v33, %v1234_v43  ;;  %v1284_v49 = vadd.f32 %v3568_v31, %v1258_v21  ;;  %v3571_v12 = vld [vmem:[#allocation13_spill] sm:$0xff] }
  0xcb   : > { %v3038_v57 = vadd.f32 %v2944_v46, %v1363_v53  ;;  %v1569_v19 = vadd.f32 %v1561_v56, %v1543_v14  ;;  %v994_v59 = vmul.f32 %v3533_v30, %v3024_v45  ;;  %v1020_v51 = vmul.f32 %v3537_v58, %v3026_v54  ;;  %v3570_v30 = vld [vmem:[#allocation7_spill] sm:$0xff] }
  0xcc   : > { %v1157_v42 = vadd.f32 %v1149_v22, %v1131_v38  ;;  %v1175_v29 = vmul.f32 %v3490_v60, %v3024_v45  ;;  %v1286_v48 = vadd.f32 %v1278_v18, %v1260_v11  ;;  %v1310_v5 = vadd.f32 %v3569_v17, %v1284_v49  ;;  %v1930_v49 = vld [vmem:[#allocation2 + $0x83] sm:$0xff] }
  0xcd   : > { %v1595_v44 = vadd.f32 %v1587_v8, %v1569_v19  ;;  %v1002_v15 = vadd.f32 %v994_v59, %v976_v62  ;;  %v1201_v31 = vmul.f32 %v2242_v41, %v3026_v54  ;;  %v1330_v46 = vmul.f32 %v2582_v3, %v3004_v27  ;;  %v3572_v62 = vld [vmem:[#allocation14_spill] sm:$0xff] }
  0xce   : > { %v1312_v56 = vadd.f32 %v1304_v40, %v1286_v48  ;;  %v1336_v53 = vadd.f32 %v3570_v30, %v1310_v5  ;;  %v1356_v58 = vmul.f32 %v2584_v32, %v3024_v45  ;;  %v1382_v21 = vmul.f32 %v3501_v0, %v3026_v54  ;;  %v1931_v19 = vld [vmem:[#allocation2 + $0x93] sm:$0xff] }
  0xcf   : > { %v1621_v11 = vadd.f32 %v2970_v36, %v1595_v44  ;;  %v1183_v13 = vadd.f32 %v1175_v29, %v1157_v42  ;;  %v1406_v8 = vmul.f32 %v3503_v35, %v2820_v63  ;;  %v3061_v33 = vmul.f32 %v3503_v35, %v2954_v6  ;;  %v3082_v42 = vld [vmem:[#allocation2 + $0xa0] sm:$0xff] }
  0xd0   : > { %v1338_v28 = vadd.f32 %v1330_v46, %v1312_v56  ;;  %v1362_v43 = vadd.f32 %v3571_v12, %v1336_v53  ;;  %v1432_v34 = vmul.f32 %v3504_v26, %v2840_v16  ;;  %v3068_v14 = vmul.f32 %v3504_v26, %v2966_v20  ;;  %v3574_v46 = vld [vmem:[#allocation54_spill] sm:$0xff]  ;;  %v3578_v12 = vld [vmem:[#allocation24_spill] sm:$0xff] }
  0xd1   : > { %v1647_v36 = vadd.f32 %v2974_v1, %v1621_v11  ;;  %v1028_v22 = vadd.f32 %v1020_v51, %v1002_v15  ;;  %v1458_v63 = vmul.f32 %v3505_v4, %v2851_v37  ;;  %v3075_v18 = vmul.f32 %v3505_v4, %v2976_v61  ;;  %v3573_v15 = vld [vmem:[#allocation35_spill] sm:$0xff] }
  0xd2   : > { %v1364_v40 = vadd.f32 %v1356_v58, %v1338_v28  ;;  %v1388_v38 = vadd.f32 %v3572_v62, %v1362_v43  ;;  %v1484_v16 = vmul.f32 %v1930_v49, %v3506_v47  ;;  %v3080_v59 = vmul.f32 %v1931_v19, %v3506_v47  ;;  %v3576_v11 = vld [vmem:[#allocation55_spill] sm:$0xff]  ;;  %v3116_v28 = vld [vmem:[#allocation2 + $0xa2] sm:$0xff] }
  0xd3   : > { %v1673_v1 = vadd.f32 %v2983_v50, %v1647_v36  ;;  %v1209_v51 = vadd.f32 %v1201_v31, %v1183_v13  ;;  %v1510_v37 = vmul.f32 %v3507_v7, %v2867_v25  ;;  %v3089_v29 = vmul.f32 %v3507_v7, %v3004_v27  ;;  %v3099_v50 = vld [vmem:[#allocation2 + $0xa1] sm:$0xff]  ;;  %v3579_v36 = vld [vmem:[#allocation59_spill] sm:$0xff] }
  0xd4   : > { %v1414_v48 = vadd.f32 %v1406_v8, %v1388_v38  ;;  %v1536_v17 = vmul.f32 %v3508_v2, %v2874_v9  ;;  %v3095_v5 = vmul.f32 %v3508_v2, %v3024_v45  ;;  %v1562_v44 = vmul.f32 %v3510_v55, %v2876_v52  ;;  %v3575_v9 = vld [vmem:[#allocation22_spill] sm:$0xff]  ;;  %v3577_v52 = vld [vmem:[#allocation56_spill] sm:$0xff] }
  0xd5   : > { %v1699_v31 = vadd.f32 %v3573_v15, %v1673_v1  ;;  %v3104_v25 = vmul.f32 %v3510_v55, %v3026_v54  ;;  %v1588_v56 = vmul.f32 %v3574_v46, %v2954_v6  ;;  %v1046_v30 = vmul.f32 %v3575_v9, %v3082_v42  ;;  %v3122_v6 = vld [vmem:[#allocation2 + $0xa3] sm:$0xff]  ;;  %v3586_v9 = vld [vmem:[#allocation58_spill] sm:$0xff] }
  0xd6   : > { %v1390_v53 = vadd.f32 %v1382_v21, %v1364_v40  ;;  %v1440_v58 = vadd.f32 %v1432_v34, %v1414_v48  ;;  %v1614_v13 = vmul.f32 %v3576_v11, %v2966_v20  ;;  %v3114_v8 = vmul.f32 %v3577_v52, %v2976_v61  ;;  %v3580_v21 = vld [vmem:[#allocation29_spill] sm:$0xff]  ;;  %v3581_v20 = vld [vmem:[#allocation42_spill] sm:$0xff]  ;;  %v3583_v61 = vld [vmem:[#allocation60_spill] sm:$0xff] }
  0xd7   : > { %v1725_v43 = vadd.f32 %v3578_v12, %v1699_v31  ;;  %v3120_v62 = vmul.f32 %v1931_v19, %v3579_v36  ;;  %v1054_v38 = vadd.f32 %v1046_v30, %v1028_v22  ;;  %v1072_v34 = vmul.f32 %v3580_v21, %v3099_v50  ;;  %v3134_v48 = vld [vmem:[#allocation2 + $0xa4] sm:$0xff]  ;;  %v3585_v22 = vld [vmem:[#allocation23_spill] sm:$0xff]  ;;  %v3587_v30 = vld [vmem:[#allocation30_spill] sm:$0xff] }
  0xd8   : > { %v1466_v40 = vadd.f32 %v1458_v63, %v1440_v58  ;;  %v3128_v49 = vmul.f32 %v3581_v20, %v3004_v27  ;;  %v3132_v1 = vmul.f32 %v3583_v61, %v3024_v45  ;;  %v3136_v15 = vld [vmem:[#allocation2 + $0xa5] sm:$0xff]  ;;  %v1227_v19 = vmul.f32 %v3562_v23, %v3082_v42  ;;  %v3588_v21 = vld [vmem:[#allocation26_spill] sm:$0xff] }
  0xd9   : > { %v1751_v31 = vadd.f32 %v3585_v22, %v1725_v43  ;;  %v3143_v63 = vmul.f32 %v3586_v9, %v3026_v54  ;;  %v1080_v27 = vadd.f32 %v1072_v34, %v1054_v38  ;;  %v1098_v58 = vmul.f32 %v3587_v30, %v3116_v28  ;;  %v3147_v12 = vld [vmem:[#allocation2 + $0xa6] sm:$0xff] }
  0xda   : > { %3582 = vst [vmem:[#allocation40_spill] sm:$0xff] %v3128_v49  ;;  %v1492_v45 = vadd.f32 %v1484_v16, %v1466_v40  ;;  %v1124_v61 = vmul.f32 %v3588_v21, %v3122_v6  ;;  %v1235_v20 = vadd.f32 %v1227_v19, %v1209_v51  ;;  %v3590_v43 = vld [vmem:[#allocation8_spill] sm:$0xff]  ;;  %v1150_v54 = vmul.f32 %v3535_v39, %v3134_v48 }
  0xdb   : > { %3584 = vst [vmem:[#allocation45_spill] sm:$0xff] %v3132_v1  ;;  %v3589_v1 = vld [vmem:[#allocation34_spill] sm:$0xff]  ;;  %v1762_v22 = vadd.f32 %v3590_v43, %v1751_v31  ;;  %v1106_v49 = vadd.f32 %v1098_v58, %v1080_v27  ;;  %v1176_v38 = vmul.f32 %v3490_v60, %v3136_v15  ;;  %v1279_v40 = vmul.f32 %v3494_v10, %v3116_v28  ;;  %v3171_v58 = vld [vmem:[#allocation2] sm:$0xff] }
  0xdc   : > { %v1253_v36 = vmul.f32 %v3589_v1, %v3099_v50  ;;  %v1518_v34 = vadd.f32 %v1510_v37, %v1492_v45  ;;  %v1408_v51 = vmul.f32 %v3503_v35, %v3082_v42  ;;  %v1202_v31 = vmul.f32 %v2242_v41, %v3147_v12 }
  0xdd   : > { %1770 = vst [vmem:[%s2834_s11 + $0x10] sm:$0xff] %v1762_v22  ;;  %v1132_v19 = vadd.f32 %v1124_v61, %v1106_v49  ;;  %v1305_v27 = vmul.f32 %v3453_v24, %v3122_v6  ;;  %v1415_v39 = vadd.f32 %v3061_v33, %v3038_v57  ;;  %v1228_v49 = vmul.f32 %v3171_v58, %v3562_v23 }
  0xde   : > { %v1261_v16 = vadd.f32 %v1253_v36, %v1235_v20  ;;  %v1544_v60 = vadd.f32 %v1536_v17, %v1518_v34  ;;  %v1416_v36 = vadd.f32 %v1408_v51, %v1390_v53  ;;  %v1434_v20 = vmul.f32 %v3504_v26, %v3099_v50 }
  0xdf   : > { %v1158_v30 = vadd.f32 %v1150_v54, %v1132_v19  ;;  %v1331_v41 = vmul.f32 %v2582_v3, %v3134_v48  ;;  %v1441_v61 = vadd.f32 %v3068_v14, %v1415_v39  ;;  %v1460_v33 = vmul.f32 %v3505_v4, %v3116_v28 }
  0xe0   : > { %v1287_v37 = vadd.f32 %v1279_v40, %v1261_v16  ;;  %v1570_v45 = vadd.f32 %v1562_v44, %v1544_v60  ;;  %v1442_v57 = vadd.f32 %v1434_v20, %v1416_v36  ;;  %v1357_v53 = vmul.f32 %v2584_v32, %v3136_v15  ;;  %v335_v44 = vld [vmem:[#allocation2 + $0xb1] sm:$0xff] }
  0xe1   : > { %v1184_v17 = vadd.f32 %v1176_v38, %v1158_v30  ;;  %v1383_v22 = vmul.f32 %v3501_v0, %v3147_v12  ;;  %v1467_v23 = vadd.f32 %v3075_v18, %v1441_v61  ;;  %v1486_v14 = vmul.f32 %v3506_v47, %v3122_v6  ;;  %v364_v60 = vld [vmem:[#allocation2 + $0xb2] sm:$0xff] }
  0xe2   : > { %v1313_v21 = vadd.f32 %v1305_v27, %v1287_v37  ;;  %v1596_v54 = vadd.f32 %v1588_v56, %v1570_v45  ;;  %v1468_v16 = vadd.f32 %v1460_v33, %v1442_v57  ;;  %v3189_v51 = vmul.f32 %v3171_v58, %v3503_v35  ;;  %v422_v45 = vld [vmem:[#allocation2 + $0xb4] sm:$0xff] }
  0xe3   : > { %v1210_v40 = vadd.f32 %v1202_v31, %v1184_v17  ;;  %v1493_v38 = vadd.f32 %v3080_v59, %v1467_v23  ;;  %v1512_v19 = vmul.f32 %v3507_v7, %v3134_v48  ;;  %v1538_v56 = vmul.f32 %v3508_v2, %v3136_v15  ;;  %v451_v17 = vld [vmem:[#allocation2 + $0xb5] sm:$0xff] }
  0xe4   : > { %v1339_v34 = vadd.f32 %v1331_v41, %v1313_v21  ;;  %v1622_v27 = vadd.f32 %v1614_v13, %v1596_v54  ;;  %v1494_v18 = vadd.f32 %v1486_v14, %v1468_v16  ;;  %v1564_v31 = vmul.f32 %v3510_v55, %v3147_v12  ;;  %v393_v41 = vld [vmem:[#allocation2 + $0xb3] sm:$0xff] }
  0xe5   : > { %v1236_v37 = vadd.f32 %v1228_v49, %v1210_v40  ;;  %v1519_v36 = vadd.f32 %v3089_v29, %v1493_v38  ;;  %v1254_v35 = vmul.f32 %v3589_v1, %v335_v44  ;;  %v1589_v13 = vmul.f32 %v3574_v46, %v3082_v42  ;;  %v480_v14 = vld [vmem:[#allocation2 + $0xb6] sm:$0xff]  ;;  %v3593_v38 = vld [vmem:[#allocation45_spill] sm:$0xff] }
  0xe6   : > { %v1365_v39 = vadd.f32 %v1357_v53, %v1339_v34  ;;  %v1648_v59 = vadd.f32 %v3114_v8, %v1622_v27  ;;  %v1520_v30 = vadd.f32 %v1512_v19, %v1494_v18  ;;  %v1615_v49 = vmul.f32 %v3576_v11, %v3099_v50 }
  0xe7   : > { %v1545_v61 = vadd.f32 %v3095_v5, %v1519_v36  ;;  %v1262_v29 = vadd.f32 %v1254_v35, %v1236_v37  ;;  %v1280_v21 = vmul.f32 %v3494_v10, %v364_v60  ;;  %v1641_v33 = vmul.f32 %v3577_v52, %v3116_v28  ;;  %v3592_v10 = vld [vmem:[#allocation59_spill] sm:$0xff]  ;;  %v336_v37 = vld [vmem:[#allocation2 + $0xc1] sm:$0xff] }
  0xe8   : > { %v1391_v20 = vadd.f32 %v1383_v22, %v1365_v39  ;;  %v1674_v57 = vadd.f32 %v3120_v62, %v1648_v59  ;;  %v1546_v8 = vadd.f32 %v1538_v56, %v1520_v30  ;;  %v1306_v5 = vmul.f32 %v3453_v24, %v393_v41  ;;  %v3591_v22 = vld [vmem:[#allocation40_spill] sm:$0xff]  ;;  %v3594_v24 = vld [vmem:[#allocation42_spill] sm:$0xff] }
  0xe9   : > { %v1571_v42 = vadd.f32 %v3104_v25, %v1545_v61  ;;  %v1288_v53 = vadd.f32 %v1280_v21, %v1262_v29  ;;  %v1435_v50 = vmul.f32 %v3504_v26, %v335_v44  ;;  %v1667_v62 = vmul.f32 %v3592_v10, %v3122_v6 }
  0xea   : > { %v1417_v1 = vadd.f32 %v3189_v51, %v1391_v20  ;;  %v1700_v23 = vadd.f32 %v3591_v22, %v1674_v57  ;;  %v1572_v54 = vadd.f32 %v1564_v31, %v1546_v8  ;;  %v1332_v34 = vmul.f32 %v2582_v3, %v422_v45  ;;  %v365_v57 = vld [vmem:[#allocation2 + $0xc2] sm:$0xff] }
  0xeb   : > { %v1597_v16 = vadd.f32 %v1589_v13, %v1571_v42  ;;  %v1314_v40 = vadd.f32 %v1306_v5, %v1288_v53  ;;  %v1461_v25 = vmul.f32 %v3505_v4, %v364_v60  ;;  %v1693_v27 = vmul.f32 %v3594_v24, %v3134_v48 }
  0xec   : > { %v1443_v28 = vadd.f32 %v1435_v50, %v1417_v1  ;;  %v1726_v19 = vadd.f32 %v3593_v38, %v1700_v23  ;;  %v1358_v39 = vmul.f32 %v2584_v32, %v451_v17  ;;  %v1487_v18 = vmul.f32 %v3506_v47, %v393_v41  ;;  %v394_v50 = vld [vmem:[#allocation2 + $0xc3] sm:$0xff] }
  0xed   : > { %v1623_v56 = vadd.f32 %v1615_v49, %v1597_v16  ;;  %v1340_v6 = vadd.f32 %v1332_v34, %v1314_v40  ;;  %v3226_v3 = vmul.f32 %v3171_v58, %v3574_v46  ;;  %v1384_v35 = vmul.f32 %v3501_v0, %v480_v14  ;;  %v423_v16 = vld [vmem:[#allocation2 + $0xc4] sm:$0xff] }
  0xee   : > { %v1469_v36 = vadd.f32 %v1461_v25, %v1443_v28  ;;  %v1752_v31 = vadd.f32 %v3143_v63, %v1726_v19  ;;  %v1513_v59 = vmul.f32 %v3507_v7, %v422_v45  ;;  %v1616_v48 = vmul.f32 %v3576_v11, %v335_v44  ;;  %v3595_v44 = vld [vmem:[#allocation60_spill] sm:$0xff] }
  0xef   : > { %v1649_v32 = vadd.f32 %v1641_v33, %v1623_v56  ;;  %v1366_v20 = vadd.f32 %v1358_v39, %v1340_v6  ;;  %v1598_v13 = vadd.f32 %v3226_v3, %v1572_v54  ;;  %v1436_v49 = vmul.f32 %v3504_v26, %v336_v37  ;;  %v452_v38 = vld [vmem:[#allocation2 + $0xc5] sm:$0xff] }
  0xf0   : > { %v1495_v30 = vadd.f32 %v1487_v18, %v1469_v36  ;;  %v1763_v61 = vadd.f32 %v3590_v43, %v1752_v31  ;;  %v1539_v46 = vmul.f32 %v3508_v2, %v451_v17  ;;  %v1642_v63 = vmul.f32 %v3577_v52, %v364_v60 }
  0xf1   : > { %v1675_v58 = vadd.f32 %v1667_v62, %v1649_v32  ;;  %v1392_v0 = vadd.f32 %v1384_v35, %v1366_v20  ;;  %v1624_v21 = vadd.f32 %v1616_v48, %v1598_v13  ;;  %v1719_v1 = vmul.f32 %v3595_v44, %v3136_v15 }
  0xf2   : > { %v1521_v29 = vadd.f32 %v1513_v59, %v1495_v30  ;;  %1771 = vst [vmem:[%s2834_s11 + $0x18] sm:$0xff] %v1763_v61  ;;  %v1565_v8 = vmul.f32 %v3510_v55, %v480_v14  ;;  %v1668_v33 = vmul.f32 %v3592_v10, %v393_v41  ;;  %v1745_v60 = vmul.f32 %v3586_v9, %v3147_v12 }
  0xf3   : > { %v1701_v42 = vadd.f32 %v1693_v27, %v1675_v58  ;;  %v1418_v26 = vadd.f32 %v3189_v51, %v1392_v0  ;;  %v1650_v5 = vadd.f32 %v1642_v63, %v1624_v21  ;;  %v1694_v22 = vmul.f32 %v3594_v24, %v422_v45  ;;  %v395_v58 = vld [vmem:[#allocation2 + $0xd3] sm:$0xff] }
  0xf4   : > { %v1547_v53 = vadd.f32 %v1539_v46, %v1521_v29  ;;  %v1462_v23 = vmul.f32 %v3505_v4, %v365_v57  ;;  %v1720_v41 = vmul.f32 %v3595_v44, %v451_v17  ;;  %v1488_v40 = vmul.f32 %v3506_v47, %v394_v50  ;;  %v481_v47 = vld [vmem:[#allocation2 + $0xc6] sm:$0xff] }
  0xf5   : > { %v1727_v54 = vadd.f32 %v1719_v1, %v1701_v42  ;;  %v1444_v62 = vadd.f32 %v1436_v49, %v1418_v26  ;;  %v1676_v34 = vadd.f32 %v1668_v33, %v1650_v5  ;;  %v1617_v51 = vmul.f32 %v3576_v11, %v336_v37  ;;  %v366_v49 = vld [vmem:[#allocation2 + $0xd2] sm:$0xff] }
  0xf6   : > { %v1573_v15 = vadd.f32 %v1565_v8, %v1547_v53  ;;  %v1746_v4 = vmul.f32 %v3586_v9, %v480_v14  ;;  %v1514_v19 = vmul.f32 %v3507_v7, %v423_v16  ;;  %v1643_v27 = vmul.f32 %v3577_v52, %v365_v57  ;;  %v337_v7 = vld [vmem:[#allocation2 + $0xd1] sm:$0xff] }
  0xf7   : > { %v1753_v28 = vadd.f32 %v1745_v60, %v1727_v54  ;;  %v1702_v12 = vadd.f32 %v1694_v22, %v1676_v34  ;;  %v1470_v45 = vadd.f32 %v1462_v23, %v1444_v62  ;;  %v1540_v37 = vmul.f32 %v3508_v2, %v452_v38  ;;  %v424_v57 = vld [vmem:[#allocation2 + $0xd4] sm:$0xff] }
  0xf8   : > { %v1599_v25 = vadd.f32 %v3226_v3, %v1573_v15  ;;  %v1669_v35 = vmul.f32 %v3592_v10, %v394_v50  ;;  %v1566_v14 = vmul.f32 %v3510_v55, %v481_v47  ;;  %v1695_v20 = vmul.f32 %v3594_v24, %v423_v16  ;;  %v453_v42 = vld [vmem:[#allocation2 + $0xd5] sm:$0xff] }
  0xf9   : > { %v1764_v39 = vadd.f32 %v3590_v43, %v1753_v28  ;;  %v1728_v17 = vadd.f32 %v1720_v41, %v1702_v12  ;;  %v1496_v18 = vadd.f32 %v1488_v40, %v1470_v45  ;;  %v1721_v2 = vmul.f32 %v3595_v44, %v452_v38  ;;  %v482_v26 = vld [vmem:[#allocation2 + $0xd6] sm:$0xff] }
  0xfa   : > { %v1625_v56 = vadd.f32 %v1617_v51, %v1599_v25  ;;  %v1618_v61 = vmul.f32 %v3576_v11, %v337_v7  ;;  %v1747_v55 = vmul.f32 %v3586_v9, %v481_v47  ;;  %v1644_v21 = vmul.f32 %v3577_v52, %v366_v49 }
  0xfb   : > { %1772 = vst [vmem:[%s2834_s11 + $0x20] sm:$0xff] %v1764_v39  ;;  %v1754_v6 = vadd.f32 %v1746_v4, %v1728_v17  ;;  %v1522_v36 = vadd.f32 %v1514_v19, %v1496_v18  ;;  %v1670_v33 = vmul.f32 %v3592_v10, %v395_v58  ;;  %v1722_v5 = vmul.f32 %v3595_v44, %v453_v42 }
  0xfc   : > { %v1651_v31 = vadd.f32 %v1643_v27, %v1625_v56  ;;  %v1748_v60 = vmul.f32 %v3586_v9, %v482_v26 }
  0xfd   : > { %v1765_v59 = vadd.f32 %v3590_v43, %v1754_v6  ;;  %v1548_v48 = vadd.f32 %v1540_v37, %v1522_v36 }
  0xfe   : > { %v1677_v32 = vadd.f32 %v1669_v35, %v1651_v31 }
  0xff   : > { %1773 = vst [vmem:[%s2834_s11 + $0x28] sm:$0xff] %v1765_v59  ;;  %v1574_v30 = vadd.f32 %v1566_v14, %v1548_v48 }
 0x100   : > { %v1703_v13 = vadd.f32 %v1695_v20, %v1677_v32 }
 0x101   : > { %v1600_v46 = vadd.f32 %v3226_v3, %v1574_v30  ;;  %v1696_v3 = vmul.f32 %v3594_v24, %v424_v57 }
 0x102   : > { %v1729_v63 = vadd.f32 %v1721_v2, %v1703_v13 }
 0x103   : > { %v1626_v29 = vadd.f32 %v1618_v61, %v1600_v46 }
 0x104   : > { %v1755_v0 = vadd.f32 %v1747_v55, %v1729_v63 }
 0x105   : > { %v1652_v8 = vadd.f32 %v1644_v21, %v1626_v29 }
 0x106   : > { %v1766_v1 = vadd.f32 %v3590_v43, %v1755_v0 }
 0x107   : > { %v1678_v11 = vadd.f32 %v1670_v33, %v1652_v8 }
 0x108   : > { %1774 = vst [vmem:[%s2834_s11 + $0x30] sm:$0xff] %v1766_v1 }
 0x109   : > { %v1704_v53 = vadd.f32 %v1696_v3, %v1678_v11 }
 0x10b   : > { %v1730_v50 = vadd.f32 %v1722_v5, %v1704_v53 }
 0x10d   : > { %v1756_v52 = vadd.f32 %v1748_v60, %v1730_v50 }
 0x10f   : > { %v1767_v22 = vadd.f32 %v3590_v43, %v1756_v52 }
 0x111   : > { %1775 = vst [vmem:[%s2834_s11 + $0x38] sm:$0xf] %v1767_v22 }
 0x112 PF: > { %s13_s14 = sadd.s32 1, %s1955_s14   ;;  %s3596_s12 = smov %s1951_s13 }
 0x113   : > { %p10_p5 = scmp.ge.s32.totalorder %s13_s14, 4   ;;  %s3597_s13 = smov %s3599_s15 }
 0x115   :  { %12 = sbr.rel (!%p10_p5) target bundleno = 2 (0x2), region = 125 }

</bundles_post_ra>
